<compile_context>
chip_gen: v7x
topology: tpu7x:2x2x1
jax: 0.10.0
libtpu: 0.0.40
codegen_flags: <defaults>
</compile_context>

<pallas_src>
import math

import numpy as np
import jax
import jax.numpy as jnp
from jax.experimental import pallas as pl
from jax.experimental.pallas import tpu as pltpu

LN_EPS = 1e-5          # torch.nn.LayerNorm default
ROW_TARGET = 512       # target activation rows per grid step (rounded to fit W groups)


def _round_up(a, b):
    return ((a + b - 1) // b) * b


# --------------------------------------------------------------------------- kernel

def _upsample_kernel(x_ref, w1_ref, mmean_ref, w2g_ref, bias_ref, o_ref, odd_sc):
    """Grid = (group_tiles, 2).

    p == 0 : full fused compute for GROUP_TILE*(W rows); store the even target-H half
             straight to its final (pixel-shuffled) location, stash the odd half in VMEM.
    p == 1 : store the stashed odd half (no recompute, no refetch of x)."""
    p = pl.program_id(1)

    @pl.when(p == 0)
    def _():
        # linear1 on the MXU (bf16 operands, f32 accumulation).
        y = jnp.dot(x_ref[...].astype(jnp.bfloat16), w1_ref[...],
                    preferred_element_type=jnp.float32)                    # (RT, 4Do)

        # Per-Do-chunk LayerNorm statistics via block-diagonal averaging matmuls
        # (kron(I4, ones/Do)) with bf16 operands -> full-rate MXU, f32 accumulation.
        mu = jnp.dot(y.astype(jnp.bfloat16), mmean_ref[...],
                     preferred_element_type=jnp.float32)
        d = y - mu
        var = jnp.dot((d * d).astype(jnp.bfloat16), mmean_ref[...],
                      preferred_element_type=jnp.float32)
        zn = d * jax.lax.rsqrt(var + LN_EPS)                               # EUP rsqrt

        # linear2 per chunk through kron(I4, diag(gamma) @ W2); beta folded into bias.
        out = jnp.dot(zn.astype(jnp.bfloat16), w2g_ref[...],
                      preferred_element_type=jnp.float32) + bias_ref[...]  # (RT, 4Do)

        rt, do4 = out.shape
        two_do = do4 // 2
        gt, _, w, _ = o_ref.shape
        # Columns [0:2Do] of group rows are, in flat order, exactly the even target-H
        # output row (w, c, d ordering already correct) -> only a major-axis reshape,
        # no cross-lane shuffle.
        o_ref[...] = out[:, :two_do].reshape(gt, 1, w, two_do)
        odd_sc[...] = out[:, two_do:]

    @pl.when(p == 1)
    def _():
        gt, _, w, two_do = o_ref.shape
        o_ref[...] = odd_sc[...].reshape(gt, 1, w, two_do)


# -------------------------------------------------------------------------- wrapper

def upsample_forward(x, params, Z, H, W, row_target=ROW_TARGET):
    """x: (B, Z*H*W, Di) float32 (or bfloat16). Returns (B, Z*(2H)*(2W), Do) float32."""
    B, N, Di = x.shape
    assert N == Z * H * W, "token count must equal Z*H*W"
    w1, w2 = params["w1"], params["w2"]
    Do4 = w1.shape[1]
    Do = Do4 // 4
    assert w1.shape == (Di, Do4) and w2.shape == (Do, Do)
    # 4*Do must be a lane multiple for dense stat/linear2 matmul tiles (true for Do=32
    # in this demo and Do=192 in Pangu); other Do silently degrades to masked stores.
    assert Do4 % 128 == 0, "4*output_dim must be a multiple of 128"
    TWO_DO = 2 * Do

    # ---- parameter-only precompute (hoisted out of the hot path) --------------------
    # Mean matrix is parameter-independent -> build with numpy (baked constant).
    m_mean = jnp.asarray(
        np.kron(np.eye(4, dtype=np.float32), np.full((Do, Do), 1.0 / Do, np.float32)),
        dtype=jnp.bfloat16)                                              # (4Do, 4Do)
    gamma = params["gamma"].astype(jnp.float32)
    beta = params["beta"].astype(jnp.float32)
    w2f = w2.astype(jnp.float32)
    w2g_bd = jnp.kron(jnp.eye(4, dtype=jnp.float32),
                      gamma[:, None] * w2f).astype(jnp.bfloat16)         # (4Do, 4Do)
    bias4 = jnp.tile(beta @ w2f, 4)[None, :]                             # (1, 4Do) f32
    w1_bf = w1.astype(jnp.bfloat16)                                      # (Di, 4Do)

    # ---- tiling: whole (b, z, h) rows per grid step ----------------------------------
    G = B * Z * H                               # number of W-row groups
    gt = max(1, min(G, row_target // max(W, 1)))
    gt = _round_up(gt, 8 // math.gcd(W, 8))     # RT = gt*W is a multiple of 8 sublanes
    G_pad = _round_up(G, gt)
    RT = gt * W

    rows = B * N
    x_flat = x.reshape(rows, Di)
    if G_pad * W != rows:                       # pad with zero groups (sliced off below)
        x_flat = jnp.pad(x_flat, ((0, G_pad * W - rows), (0, 0)))

    cost = pl.CostEstimate(
        flops=int(2 * G_pad * W * (Di * Do4 + 3 * Do4 * Do4)),
        transcendentals=int(G_pad * W * Do4),
        bytes_accessed=int(G_pad * W * (Di * x_flat.dtype.itemsize + Do4 * 4)
                           + (w1_bf.size + m_mean.size + w2g_bd.size) * 2
                           + bias4.size * 4),
    )

    def resident(shape):
        return pl.BlockSpec(shape, lambda i, p: (0,) * len(shape))

    out = pl.pallas_call(
        _upsample_kernel,
        out_shape=jax.ShapeDtypeStruct((G_pad, 2, W, TWO_DO), jnp.float32),
        grid_spec=pltpu.PrefetchScalarGridSpec(
            num_scalar_prefetch=0,
            grid=(G_pad // gt, 2),
            in_specs=[
                pl.BlockSpec((RT, Di), lambda i, p: (i, 0)),  # same block for p=0/1
                resident((Di, Do4)),                          # w1 (bf16)
                resident((Do4, Do4)),                         # block-diag mean (bf16)
                resident((Do4, Do4)),                         # block-diag gamma*W2 (bf16)
                resident((1, Do4)),                           # beta @ W2 bias (f32)
            ],
            out_specs=pl.BlockSpec((gt, 1, W, TWO_DO), lambda i, p: (i, p, 0, 0)),
            scratch_shapes=[pltpu.VMEM((RT, TWO_DO), jnp.float32)],
        ),
        compiler_params=pltpu.CompilerParams(
            dimension_semantics=("parallel", "arbitrary")),
        cost_estimate=cost,
    )(x_flat, w1_bf, m_mean, w2g_bd, bias4)

    # Metadata-only reshape: flat order of (G, 2, W, 2Do) == (B, Z, 2H, 2W, Do), i.e.
    # the pixel shuffle already happened via the kernel's output indexing.
    return out[:G].reshape(B, Z * (2 * H) * (2 * W), Do)


# -------------------------------------------------------------- pure-JAX reference

def upsample_reference(x, params, Z, H, W):
    """Faithful (op-for-op) mirror of the PyTorch forward, in f32."""
    B = x.shape[0]
    Do = params["w2"].shape[0]
    y = jnp.dot(x, params["w1"])                               # linear1, no bias
    y = y.reshape(B, Z, H, W, 2, 2, Do)
    y = jnp.transpose(y, (0, 1, 2, 4, 3, 5, 6))
    y = y.reshape(B, Z, 2 * H, 2 * W, Do)
    y = y.reshape(B, Z * (2 * H) * (2 * W), Do)
    mu = jnp.mean(y, axis=-1, keepdims=True)
    var = jnp.mean((y - mu) ** 2, axis=-1, keepdims=True)
    yn = (y - mu) * jax.lax.rsqrt(var + LN_EPS) * params["gamma"] + params["beta"]
    return jnp.dot(yn, params["w2"])                           # linear2, no bias


# ------------------------------------------------------------------------------ main

if __name__ == "__main__":
    # Small stand-in for the hard-coded (Z, H, W) = (8, 180, 91) of the full model;
    # the 2x-in-H / 2x-in-W pixel-shuffle structure is identical.
    B, Z, H, W = 2, 8, 12, 8
    IN_DIM, OUT_DIM = 64, 32            # UpSample(input_dim=64, output_dim=32)

    key = jax.random.PRNGKey(0)
    kx, k1, k2, kg, kb = jax.random.split(key, 5)
    x = jax.random.normal(kx, (B, Z * H * W, IN_DIM), jnp.float32)
    params = dict(
        w1=0.02 * jax.random.normal(k1, (IN_DIM, 4 * OUT_DIM), jnp.float32),
        w2=0.02 * jax.random.normal(k2, (OUT_DIM, OUT_DIM), jnp.float32),
        gamma=1.0 + 0.1 * jax.random.normal(kg, (OUT_DIM,), jnp.float32),
        beta=0.1 * jax.random.normal(kb, (OUT_DIM,), jnp.float32),
    )

    out = upsample_forward(x, params, Z, H, W)
    out = jax.block_until_ready(out)

    assert out.shape == (B, Z * (2 * H) * (2 * W), OUT_DIM)
    assert bool(jnp.all(jnp.isfinite(out)))

    ref = upsample_reference(x, params, Z, H, W)
    max_err = float(jnp.max(jnp.abs(out - ref)))
    # bf16 MXU operands with f32 accumulation -> small deviation from the f32 reference.
    assert max_err < 2e-2, f"max abs error vs reference: {max_err}"

    print("KERNEL_OK")
</pallas_src>

<mosaic_0001>
module attributes {stable_mosaic.version = 11 : i64} {
  func.func @_upsample_kernel(%arg0: i32, %arg1: i32, %arg2: memref<512x64xf32, #tpu.memory_space<vmem>>, %arg3: memref<64x128xbf16, #tpu.memory_space<vmem>>, %arg4: memref<128x128xbf16, #tpu.memory_space<vmem>>, %arg5: memref<128x128xbf16, #tpu.memory_space<vmem>>, %arg6: memref<1x128xf32, #tpu.memory_space<vmem>>, %arg7: memref<64x1x8x64xf32, #tpu.memory_space<vmem>>, %arg8: memref<512x64xf32, #tpu.memory_space<vmem>>) attributes {dimension_semantics = [#tpu.dimension_semantics<parallel>, #tpu.dimension_semantics<arbitrary>], iteration_bounds = array<i64: 3, 2>, scalar_prefetch = 0 : i64, scratch_operands = 1 : i64, tpu.core_type = #tpu.core_type<tc>, window_params = [{transform_indices = @transform_0, window_bounds = array<i64: 512, 64>}, {pipeline_mode = #tpu.pipeline_mode<synchronous>, transform_indices = @transform_1, window_bounds = array<i64: 64, 128>}, {pipeline_mode = #tpu.pipeline_mode<synchronous>, transform_indices = @transform_2, window_bounds = array<i64: 128, 128>}, {pipeline_mode = #tpu.pipeline_mode<synchronous>, transform_indices = @transform_3, window_bounds = array<i64: 128, 128>}, {pipeline_mode = #tpu.pipeline_mode<synchronous>, transform_indices = @transform_4, window_bounds = array<i64: 1, 128>}, {transform_indices = @transform_5, window_bounds = array<i64: 64, 1, 8, 64>}]} {
    %c0_i32 = arith.constant 0 : i32
    %0 = arith.cmpi eq, %arg1, %c0_i32 : i32
    %1 = arith.extui %0 : i1 to i32
    %c0_i32_0 = arith.constant 0 : i32
    %2 = arith.cmpi ne, %1, %c0_i32_0 : i32
    scf.if %2 {
      %c0 = arith.constant 0 : index
      %c0_2 = arith.constant 0 : index
      %6 = vector.load %arg2[%c0, %c0_2] : memref<512x64xf32, #tpu.memory_space<vmem>>, vector<512x64xf32>
      %7 = arith.truncf %6 : vector<512x64xf32> to vector<512x64xbf16>
      %c0_3 = arith.constant 0 : index
      %c0_4 = arith.constant 0 : index
      %8 = vector.load %arg3[%c0_3, %c0_4] : memref<64x128xbf16, #tpu.memory_space<vmem>>, vector<64x128xbf16>
      %cst = arith.constant dense<0.000000e+00> : vector<512x128xf32>
      %9 = tpu.matmul %7, %8, %cst {dimension_numbers = #tpu.dot_dimension_numbers<[1], [0], [0], [1], [0, 0, 1, 1], [], []>} : vector<512x64xbf16>, vector<64x128xbf16>, vector<512x128xf32> -> vector<512x128xf32>
      %10 = arith.truncf %9 : vector<512x128xf32> to vector<512x128xbf16>
      %c0_5 = arith.constant 0 : index
      %c0_6 = arith.constant 0 : index
      %11 = vector.load %arg4[%c0_5, %c0_6] : memref<128x128xbf16, #tpu.memory_space<vmem>>, vector<128x128xbf16>
      %cst_7 = arith.constant dense<0.000000e+00> : vector<512x128xf32>
      %12 = tpu.matmul %10, %11, %cst_7 {dimension_numbers = #tpu.dot_dimension_numbers<[1], [0], [0], [1], [0, 0, 1, 1], [], []>} : vector<512x128xbf16>, vector<128x128xbf16>, vector<512x128xf32> -> vector<512x128xf32>
      %13 = arith.subf %9, %12 : vector<512x128xf32>
      %14 = arith.mulf %13, %13 : vector<512x128xf32>
      %15 = arith.truncf %14 : vector<512x128xf32> to vector<512x128xbf16>
      %c0_8 = arith.constant 0 : index
      %c0_9 = arith.constant 0 : index
      %16 = vector.load %arg4[%c0_8, %c0_9] : memref<128x128xbf16, #tpu.memory_space<vmem>>, vector<128x128xbf16>
      %cst_10 = arith.constant dense<0.000000e+00> : vector<512x128xf32>
      %17 = tpu.matmul %15, %16, %cst_10 {dimension_numbers = #tpu.dot_dimension_numbers<[1], [0], [0], [1], [0, 0, 1, 1], [], []>} : vector<512x128xbf16>, vector<128x128xbf16>, vector<512x128xf32> -> vector<512x128xf32>
      %cst_11 = arith.constant 9.99999974E-6 : f32
      %18 = vector.broadcast %cst_11 : f32 to vector<512x128xf32>
      %19 = arith.addf %17, %18 : vector<512x128xf32>
      %20 = math.rsqrt %19 : vector<512x128xf32>
      %21 = arith.mulf %13, %20 : vector<512x128xf32>
      %22 = arith.truncf %21 : vector<512x128xf32> to vector<512x128xbf16>
      %c0_12 = arith.constant 0 : index
      %c0_13 = arith.constant 0 : index
      %23 = vector.load %arg5[%c0_12, %c0_13] : memref<128x128xbf16, #tpu.memory_space<vmem>>, vector<128x128xbf16>
      %cst_14 = arith.constant dense<0.000000e+00> : vector<512x128xf32>
      %24 = tpu.matmul %22, %23, %cst_14 {dimension_numbers = #tpu.dot_dimension_numbers<[1], [0], [0], [1], [0, 0, 1, 1], [], []>} : vector<512x128xbf16>, vector<128x128xbf16>, vector<512x128xf32> -> vector<512x128xf32>
      %c0_15 = arith.constant 0 : index
      %c0_16 = arith.constant 0 : index
      %25 = vector.load %arg6[%c0_15, %c0_16] : memref<1x128xf32, #tpu.memory_space<vmem>>, vector<1x128xf32>
      %26 = vector.broadcast %25 : vector<1x128xf32> to vector<512x128xf32>
      %27 = arith.addf %24, %26 : vector<512x128xf32>
      %28 = vector.extract_strided_slice %27 {offsets = [0, 0], sizes = [512, 64], strides = [1, 1]} : vector<512x128xf32> to vector<512x64xf32>
      %29 = vector.shape_cast %28 : vector<512x64xf32> to vector<64x1x8x64xf32>
      %c0_17 = arith.constant 0 : index
      %c0_18 = arith.constant 0 : index
      %c0_19 = arith.constant 0 : index
      %c0_20 = arith.constant 0 : index
      %30 = vector.load %arg7[%c0_17, %c0_18, %c0_19, %c0_20] : memref<64x1x8x64xf32, #tpu.memory_space<vmem>>, vector<64x1x8x64xf32>
      tpu.vector_store %arg7[%c0_17, %c0_18, %c0_19, %c0_20], %29 {strides = array<i32>} : memref<64x1x8x64xf32, #tpu.memory_space<vmem>>, vector<64x1x8x64xf32>,
      %31 = vector.extract_strided_slice %27 {offsets = [0, 64], sizes = [512, 64], strides = [1, 1]} : vector<512x128xf32> to vector<512x64xf32>
      %c0_21 = arith.constant 0 : index
      %c0_22 = arith.constant 0 : index
      %32 = vector.load %arg8[%c0_21, %c0_22] : memref<512x64xf32, #tpu.memory_space<vmem>>, vector<512x64xf32>
      tpu.vector_store %arg8[%c0_21, %c0_22], %31 {strides = array<i32>} : memref<512x64xf32, #tpu.memory_space<vmem>>, vector<512x64xf32>,
    } else {
    }
    %c1_i32 = arith.constant 1 : i32
    %3 = arith.cmpi eq, %arg1, %c1_i32 : i32
    %4 = arith.extui %3 : i1 to i32
    %c0_i32_1 = arith.constant 0 : i32
    %5 = arith.cmpi ne, %4, %c0_i32_1 : i32
    scf.if %5 {
      %c0 = arith.constant 0 : index
      %c0_2 = arith.constant 0 : index
      %6 = vector.load %arg8[%c0, %c0_2] : memref<512x64xf32, #tpu.memory_space<vmem>>, vector<512x64xf32>
      %7 = vector.shape_cast %6 : vector<512x64xf32> to vector<64x1x8x64xf32>
      %c0_3 = arith.constant 0 : index
      %c0_4 = arith.constant 0 : index
      %c0_5 = arith.constant 0 : index
      %c0_6 = arith.constant 0 : index
      %8 = vector.load %arg7[%c0_3, %c0_4, %c0_5, %c0_6] : memref<64x1x8x64xf32, #tpu.memory_space<vmem>>, vector<64x1x8x64xf32>
      tpu.vector_store %arg7[%c0_3, %c0_4, %c0_5, %c0_6], %7 {strides = array<i32>} : memref<64x1x8x64xf32, #tpu.memory_space<vmem>>, vector<64x1x8x64xf32>,
    } else {
    }
    return
  }
  func.func @transform_0(%arg0: i32, %arg1: i32) -> (i32, i32) {
    %c0_i32 = arith.constant 0 : i32
    %c0_i32_0 = arith.constant 0 : i32
    return %arg0, %c0_i32 : i32, i32
  }
  func.func @transform_1(%arg0: i32, %arg1: i32) -> (i32, i32) {
    %c0_i32 = arith.constant 0 : i32
    %c0_i32_0 = arith.constant 0 : i32
    %c0_i32_1 = arith.constant 0 : i32
    return %c0_i32, %c0_i32_0 : i32, i32
  }
  func.func @transform_2(%arg0: i32, %arg1: i32) -> (i32, i32) {
    %c0_i32 = arith.constant 0 : i32
    %c0_i32_0 = arith.constant 0 : i32
    %c0_i32_1 = arith.constant 0 : i32
    return %c0_i32, %c0_i32_0 : i32, i32
  }
  func.func @transform_3(%arg0: i32, %arg1: i32) -> (i32, i32) {
    %c0_i32 = arith.constant 0 : i32
    %c0_i32_0 = arith.constant 0 : i32
    %c0_i32_1 = arith.constant 0 : i32
    return %c0_i32, %c0_i32_0 : i32, i32
  }
  func.func @transform_4(%arg0: i32, %arg1: i32) -> (i32, i32) {
    %c0_i32 = arith.constant 0 : i32
    %c0_i32_0 = arith.constant 0 : i32
    %c0_i32_1 = arith.constant 0 : i32
    return %c0_i32, %c0_i32_0 : i32, i32
  }
  func.func @transform_5(%arg0: i32, %arg1: i32) -> (i32, i32, i32, i32) {
    %c0_i32 = arith.constant 0 : i32
    %c0_i32_0 = arith.constant 0 : i32
    %c0_i32_1 = arith.constant 0 : i32
    return %arg0, %arg1, %c0_i32, %c0_i32_0 : i32, i32, i32, i32
  }
}

</mosaic_0001>

<bundles_post_ra>
// kernel: tpu_custom_call.1
= control target key start
LH: loop header
LB: loop body
LE: loop exit
PB: predicated region body
PF: predicated region fallthrough
CT: control target
= control target key end

     0   :  { %10 = vsyncpa [#allocation4], 0  ;;  %s5585_s0 = inlined_call_operand.vmem [shape: f32[1536,64], index: 0, kind: input, shape index: {}]   ;;  %s5586_s1 = inlined_call_operand.hbm [shape: bf16[64,128], index: 1, kind: input, shape index: {}]   ;;  %s5587_s2 = inlined_call_operand.hbm [shape: bf16[128,128], index: 2, kind: input, shape index: {}]   ;;  %s5588_s3 = inlined_call_operand.hbm [shape: bf16[128,128], index: 3, kind: input, shape index: {}]   ;;  %s5589_s4 = inlined_call_operand.hbm [shape: f32[1,128], index: 4, kind: input, shape index: {}]   ;;  %s5590_s5 = inlined_call_operand.vmem [shape: f32[192,2,8,64], index: 5, kind: output, shape index: {}]  }
   0x1   :  { %11 = vsyncpa [#allocation6], 0 }
   0x2   :  { %12 = vsyncpa [#allocation9], 0  ;;  %s4111_s18 = smov 0   ;;  %s4113_s19 = smov 0  }
   0x3   :  { %s4115_s20 = smov 0   ;;  %s4117_s21 = smov 0  }
   0x4   :  { %s4119_s22 = smov 0   ;;  %s4121_s23 = smov 0  }
   0x5   :  { %s4123_s24 = smov 0  }
   0x6 LB: > { %5634 = sst [smem:[#allocation14_spill]] %s4064_s22  ;;  %s3084_s25 = sadd.s32 4294967295, %s4072_s24   ;;  %s4072_s24 = sphi %s4123_s24, %s18_s24   ;;  %s4068_s23 = sphi %s4121_s23, %s5721_s23   ;;  %s4064_s22 = sphi %s4119_s22, %s5720_s22   ;;  %s4060_s21 = sphi %s4117_s21, %s5719_s21   ;;  %s4056_s20 = sphi %s4115_s20, %s5718_s20   ;;  %s4052_s19 = sphi %s4113_s19, %s5723_s19   ;;  %s4048_s18 = sphi %s4111_s18, %s5722_s18  }
   0x7   : > { %5635 = sst [smem:[#allocation15_spill]] %s4068_s23  ;;  %s27_s26 = sadd.s32 1, %s4064_s22 }
   0x8   : > { %p28_p0 = scmp.ge.s32.totalorder %s27_s26, 2  ;;  %s30_s27 = sadd.s32 1, %s4068_s23 }
   0x9   : > { %s149_s28 = sadd.s32 1, %s4052_s19  ;;  %p159_p1 = scmp.ne.s32.totalorder %s4052_s19, %s4048_s18 }
   0xa   : > { %s5725_s26 = smov (%p28_p0, %s27_s26), 0  ;;  %s5727_s27 = smov (!%p28_p0, %s30_s27), %s4068_s23 }
   0xb   : > { %5636 = sst [smem:[#allocation16_spill]] %s5725_s26  ;;  %s145_s29 = ssub.s32 %s4064_s22, %s5725_s26 }
   0xc   : > { %p160_p2 = scmp.eq.s32.totalorder %s3084_s25, 5  ;;  %p32_p3 = scmp.ge.s32.totalorder %s5727_s27, 3 }
   0xd   : > { %p3086_p4 = scmp.ge.s32.totalorder %s4072_s24, 1  ;;  %p173_p6 = scmp.lt.s32.totalorder %s4072_s24, 7 }
   0xe   : > { %p4158_p5 = por %p160_p2, %p159_p1  ;;  %s5729_s27 = smov (%p32_p3, %s5727_s27), 0 }
   0xf   : > { %5638 = sst [smem:[#allocation17_spill]] %s5729_s27  ;;  %p4165_p7 = pnand %p3086_p4, %p173_p6 }
  0x10   : > { %s5637_s30 = scalar_select %p4158_p5, 1, 0 }
  0x11   : > { %s5639_s6 = scalar_select %p4165_p7, 1, 0 }
  0x12   : > { %s144_s7 = ssub.s32 %s4068_s23, %s5729_s27  ;;  %p4171_p8 = scmp.eq.s32.totalorder %s3084_s25, 0 }
  0x13   : > { %s146_s9 = sor.u32 %s145_s29, %s144_s7  ;;  %p3662_p9 = pneg %p4165_p7 }
  0x14   : > { %s5640_s8 = scalar_select %p4171_p8, 1, 0 }
  0x15   : > { %p147_p10 = scmp.eq.s32.totalorder %s146_s9, 0  ;;  %p4179_p11 = pnand %p4171_p8, %p3662_p9 }
  0x16   : > { %s4074_s12 = smov [#allocation5]   ;;  %s3894_s16 = scalar_lea.hbm %s5587_s2, 1024 }
  0x17   : > { %s4184_s11 = scalar_select %p147_p10, %s4052_s19, %s149_s28  }
  0x18   : > { %s198_s13 = sshll.u32 %s4074_s12, 4  ;;  %p3895_p12 = scmp.ne.s32.totalorder %s5587_s2, %s3894_s16  ;;  %s199_s13 = int_to_ptr.vmem [resolvable:$true] %s198_s13 }
  0x19   : > { %p4194_p13 = pneg %p4179_p11  ;;  %p3901_p2 = scmp.lt.u32.totalorder %s3894_s16, %s5587_s2 }
  0x1b   : > { %p3897_p0 = pnand %p4194_p13, %p3895_p12 }
  0x1d   : > { %p3898_p1 = pneg %p3897_p0 }
  0x1f   : > { %p3903_p3 = pnand %p3901_p2, %p3898_p1 }
  0x21   : > { %3906 = shalt.err (!%p3903_p3)
}
  0x22   : > { %s3907_s9 = scalar_lea.vmem %s199_s13, 1024  ;;  %p3915_p10 = scmp.lt.s32.totalorder %s199_s13, %s199_s13 }
  0x23   : > { %p3908_p4 = scmp.ne.s32.totalorder %s199_s13, %s3907_s9  ;;  %p3916_p5 = scmp.lt.s32.totalorder %s3907_s9, %s3907_s9 }
  0x25   : > { %p3910_p6 = pnand %p3908_p4, %p4194_p13  ;;  %p3917_p8 = por %p3916_p5, %p3915_p10 }
  0x27   : > { %p3911_p9 = pneg %p3910_p6 }
  0x29   : > { %p3918_p7 = pnand %p3917_p8, %p3911_p9 }
  0x2b   : > { %3921 = shalt.err (!%p3918_p7)
}
  0x2c   : > { %s4075_s12 = smov 64   ;;  %s4076_s14 = smov 4  }
  0x2d   : > { %3668 = dma.hbm_to_vmem [thread:$0]  (!%p4179_p11), %s5587_s2, 1024, %s199_s13, [#allocation6], %s4075_s12, %s4075_s12, %s4076_s14  }
  0x2e   : > { %s4077_s17 = smov [#allocation3]   ;;  %s4078_s28 = smov [#allocation7]  }
  0x2f   : > { %s185_s25 = sshll.u32 %s4077_s17, 4  ;;  %s211_s7 = sshll.u32 %s4078_s28, 4  ;;  %s186_s25 = int_to_ptr.vmem [resolvable:$true] %s185_s25  ;;  %s4213_s7 = int_to_ptr.vmem [resolvable:$true] %s211_s7 }
  0x30   : > { %s3922_s26 = scalar_lea.hbm %s5586_s1, 512 }
  0x31   : > { %p3923_p5 = scmp.ne.s32.totalorder %s5586_s1, %s3922_s26  ;;  %p3929_p12 = scmp.lt.u32.totalorder %s3922_s26, %s5586_s1 }
  0x33   : > { %p3925_p7 = pnand %p3923_p5, %p4194_p13 }
  0x35   : > { %p3926_p8 = pneg %p3925_p7 }
  0x37   : > { %p3931_p0 = pnand %p3929_p12, %p3926_p8 }
  0x39   : > { %3934 = shalt.err (!%p3931_p0)
}
  0x3a   : > { %s3935_s16 = scalar_lea.vmem %s186_s25, 512  ;;  %p3943_p4 = scmp.lt.s32.totalorder %s186_s25, %s186_s25 }
  0x3b   : > { %p3936_p1 = scmp.ne.s32.totalorder %s186_s25, %s3935_s16  ;;  %p3944_p6 = scmp.lt.s32.totalorder %s3935_s16, %s3935_s16 }
  0x3d   : > { %p3938_p2 = pnand %p3936_p1, %p4194_p13  ;;  %p3945_p9 = por %p3944_p6, %p3943_p4 }
  0x3f   : > { %p3939_p3 = pneg %p3938_p2 }
  0x41   : > { %p3946_p10 = pnand %p3945_p9, %p3939_p3 }
  0x43   : > { %3949 = shalt.err (!%p3946_p10)
}
  0x44   : > { %3665 = dma.hbm_to_vmem [thread:$0]  (!%p4179_p11), %s5586_s1, 512, %s186_s25, [#allocation4], %s4075_s12, %s4075_s12, %s4076_s14  }
  0x45   : > { %s3950_s17 = scalar_lea.hbm %s5588_s3, 1024 }
  0x46   : > { %p3951_p5 = scmp.ne.s32.totalorder %s5588_s3, %s3950_s17  ;;  %p3957_p12 = scmp.lt.u32.totalorder %s3950_s17, %s5588_s3 }
  0x48   : > { %p3953_p7 = pnand %p3951_p5, %p4194_p13 }
  0x4a   : > { %p3954_p8 = pneg %p3953_p7 }
  0x4c   : > { %p3959_p0 = pnand %p3957_p12, %p3954_p8 }
  0x4e   : > { %3962 = shalt.err (!%p3959_p0)
}
  0x4f   : > { %s3963_s25 = scalar_lea.vmem %s4213_s7, 1024  ;;  %p3971_p4 = scmp.lt.s32.totalorder %s4213_s7, %s4213_s7 }
  0x50   : > { %p3964_p1 = scmp.ne.s32.totalorder %s4213_s7, %s3963_s25  ;;  %p3972_p6 = scmp.lt.s32.totalorder %s3963_s25, %s3963_s25 }
  0x52   : > { %p3966_p2 = pnand %p3964_p1, %p4194_p13  ;;  %p3973_p9 = por %p3972_p6, %p3971_p4 }
  0x54   : > { %p3967_p3 = pneg %p3966_p2 }
  0x56   : > { %p3974_p10 = pnand %p3973_p9, %p3967_p3 }
  0x58   : > { %3977 = shalt.err (!%p3974_p10)
}
  0x59   : > { %3671 = dma.hbm_to_vmem [thread:$0]  (!%p4179_p11), %s5588_s3, 1024, %s4213_s7, [#allocation6], %s4075_s12, %s4075_s12, %s4076_s14  }
  0x5a   : > { %s4079_s23 = smov [#allocation8]   ;;  %s3978_s28 = scalar_lea.hbm %s5589_s4, 16 }
  0x5b   : > { %s225_s26 = sshll.u32 %s4079_s23, 4  ;;  %p3979_p5 = scmp.ne.s32.totalorder %s5589_s4, %s3978_s28  ;;  %s226_s26 = int_to_ptr.vmem [resolvable:$true] %s225_s26 }
  0x5c   : > { %p3985_p12 = scmp.lt.u32.totalorder %s3978_s28, %s5589_s4 }
  0x5d   : > { %p3981_p7 = pnand %p3979_p5, %p4194_p13 }
  0x5f   : > { %p3982_p8 = pneg %p3981_p7 }
  0x61   : > { %p3987_p0 = pnand %p3985_p12, %p3982_p8 }
  0x63   : > { %3990 = shalt.err (!%p3987_p0)
}
  0x64   : > { %s3991_s12 = scalar_lea.vmem %s226_s26, 16  ;;  %s3998_s14 = scalar_lea.vmem %s226_s26, 32 }
  0x65   : > { %p3992_p1 = scmp.ne.s32.totalorder %s226_s26, %s3991_s12  ;;  %p3999_p4 = scmp.lt.s32.totalorder %s226_s26, %s226_s26 }
  0x66   : > { %p4000_p6 = scmp.lt.s32.totalorder %s3998_s14, %s3991_s12 }
  0x67   : > { %p3994_p2 = pnand %p3992_p1, %p4194_p13 }
  0x68   : > { %p4001_p9 = por %p4000_p6, %p3999_p4 }
  0x69   : > { %p3995_p3 = pneg %p3994_p2 }
  0x6b   : > { %p4002_p10 = pnand %p4001_p9, %p3995_p3 }
  0x6d   : > { %4005 = shalt.err (!%p4002_p10)
}
  0x6e   : > { %3674 = dma.hbm_to_vmem [thread:$0]  (!%p4179_p11), %s5589_s4, 16, %s226_s26, [#allocation9]  }
  0x6f   : > { %p5643_p5 = scmp.ne.s32.totalorder %s5639_s6, 0 }
  0x70   : > { %p5644_p7 = scmp.ne.s32.totalorder (!%p5643_p5), %s5640_s8, 0 }
  0x71   : > { %247 = sbr.rel (%p5643_p5) target bundleno = 1354 (0x54a), region = 40 }
  0x78   : > { %4035 = dma.done.wait (%p5644_p7), [#allocation4], 512  }
  0x79   : > { %4037 = vsyncadd (%p5644_p7), [#allocation4], 4294966784 }
  0x7a   : > { %4039 = dma.done.wait (%p5644_p7), [#allocation6], 2048  }
  0x7b   : > { %4041 = vsyncadd (%p5644_p7), [#allocation6], 4294965248 }
  0x7c   : > { %4043 = dma.done.wait (%p5644_p7), [#allocation9], 16  }
  0x7d   : > { %4045 = vsyncadd (%p5644_p7), [#allocation9], 4294967280  ;;  %s283_s6 = sand.u32 1, %s4048_s18   ;;  %s3098_s10 = sshll.u32 %s4060_s21, 6 }
  0x7e   : > { %s3097_s29 = sshll.u32 %s283_s6, 9  ;;  %p287_p11 = scmp.lt.s32.totalorder %s3098_s10, 191 }
  0x7f   : > { %s4301_s17 = scalar_lea.vmem [#allocation10], %s3097_s29  ;;  %p3100_p13 = scmp.ne.s32.totalorder %s4056_s20, 0 }
  0x80   : > { %s5731_s10 = smov (!%p287_p11, %s3098_s10), 191 }
  0x81   : > { %s3099_s22 = sshll.u32 %s5731_s10, 3  ;;  %297 = sbr.rel (%p3100_p13) target bundleno = 1283 (0x503), region = 60 }
  0x82   : > { %s4299_s27 = scalar_lea.vmem %s5585_s0, %s3099_s22 }
  0x88   : > { %v3746_v0 = vld [vmem:[#allocation3] sm:$0xff]   ;;  %v3747_v1 = vld [vmem:[#allocation3 + $0x8] sm:$0xff]   ;;  %v3748_v2 = vld [vmem:[#allocation3 + $0x10] sm:$0xff]   ;;  %vm426_vm0 = vcmask 523264   ;;  %s4080_s18 = smov 64  }
  0x89   : > { %3318 = vmatprep.subr.bf16.mxu0 %v3746_v0  ;;  %v298_v3 = vld [vmem:[%s4299_s27] sm:$0xff]  ;;  %v299_v4 = vld [vmem:[%s4299_s27 + $0x8] sm:$0xff]  ;;  %v3749_v6 = vld [vmem:[#allocation3 + $0x18] sm:$0xff]  }
  0x8a   : > { %3319 = vmatpush3.bf16.msra.mxu0 %v3746_v0  ;;  %v362_v5 = vpack.c.bf16 %v299_v4, %v298_v3  ;;  %v300_v7 = vld [vmem:[%s4299_s27 + $0x10] sm:$0xff]  ;;  %v301_v8 = vld [vmem:[%s4299_s27 + $0x18] sm:$0xff]  ;;  %v302_v9 = vld [vmem:[%s4299_s27 + $0x20] sm:$0xff] }
  0x8b   : > { %3320 = vmatprep.subr.bf16.mxu0 %v3747_v1  ;;  %v303_v10 = vld [vmem:[%s4299_s27 + $0x28] sm:$0xff]  ;;  %v363_v11 = vpack.c.bf16 %v301_v8, %v300_v7  ;;  %v304_v13 = vld [vmem:[%s4299_s27 + $0x30] sm:$0xff]  ;;  %v305_v14 = vld [vmem:[%s4299_s27 + $0x38] sm:$0xff] }
  0x8c   : > { %3326 = vmatprep.mubr.msk.bf16.mxu0 %vm426_vm0, %v362_v5  ;;  %v364_v12 = vpack.c.bf16 %v303_v10, %v302_v9  ;;  %v306_v15 = vld [vmem:[%s4299_s27 + $0x40] sm:$0xff]  ;;  %v307_v16 = vld [vmem:[%s4299_s27 + $0x48] sm:$0xff]  ;;  %v365_v17 = vpack.c.bf16 %v305_v14, %v304_v13  ;;  %v308_v19 = vld [vmem:[%s4299_s27 + $0x50] sm:$0xff] }
  0x8d   : > { %v366_v18 = vpack.c.bf16 %v307_v16, %v306_v15  ;;  %v309_v20 = vld [vmem:[%s4299_s27 + $0x58] sm:$0xff]  ;;  %v310_v21 = vld [vmem:[%s4299_s27 + $0x60] sm:$0xff]  ;;  %v3751_v23 = vld [vmem:[#allocation5 + $0x8] sm:$0xff]  }
  0x8e   : > { %3321 = vmatpush3.bf16.msra.mxu0 %v3747_v1  ;;  %v3750_v22 = vld [vmem:[#allocation5] sm:$0xff]   ;;  %v311_v24 = vld [vmem:[%s4299_s27 + $0x68] sm:$0xff]  ;;  %v367_v25 = vpack.c.bf16 %v309_v20, %v308_v19  ;;  %v3752_v26 = vld [vmem:[#allocation5 + $0x10] sm:$0xff]  }
  0x8f   : > { %3322 = vmatprep.subr.bf16.mxu0 %v3748_v2  ;;  %3390 = vmatprep.subr.bf16.mxu1 %v3750_v22  ;;  %v368_v27 = vpack.c.bf16 %v311_v24, %v310_v21  ;;  %v3753_v28 = vld [vmem:[#allocation5 + $0x18] sm:$0xff]   ;;  %v312_v29 = vld [vmem:[%s4299_s27 + $0x70] sm:$0xff]  ;;  %v314_v31 = vld [vmem:[%s4299_s27 + $0x80] sm:$0xff] }
  0x90   : > { %3391 = vmatpush3.bf16.msra.mxu1 %v3750_v22  ;;  %v313_v30 = vld [vmem:[%s4299_s27 + $0x78] sm:$0xff]  ;;  %v315_v32 = vld [vmem:[%s4299_s27 + $0x88] sm:$0xff]  ;;  %v3754_v34 = vld [vmem:[#allocation5 + $0x20] sm:$0xff]  }
  0x91   : > { %3392 = vmatprep.subr.bf16.mxu1 %v3751_v23  ;;  %v369_v33 = vpack.c.bf16 %v313_v30, %v312_v29  ;;  %v370_v35 = vpack.c.bf16 %v315_v32, %v314_v31  ;;  %v3755_v36 = vld [vmem:[#allocation5 + $0x28] sm:$0xff]   ;;  %v316_v37 = vld [vmem:[%s4299_s27 + $0x90] sm:$0xff]  ;;  %v317_v38 = vld [vmem:[%s4299_s27 + $0x98] sm:$0xff] }
  0x92   : > { %3323 = vmatpush3.bf16.msra.mxu0 %v3748_v2  ;;  %v318_v39 = vld [vmem:[%s4299_s27 + $0xa0] sm:$0xff]  ;;  %v319_v40 = vld [vmem:[%s4299_s27 + $0xa8] sm:$0xff]  ;;  %v371_v41 = vpack.c.bf16 %v317_v38, %v316_v37  ;;  %v3756_v42 = vld [vmem:[#allocation5 + $0x30] sm:$0xff]  }
  0x93   : > { %3324 = vmatprep.subr.bf16.mxu0 %v3749_v6  ;;  %v372_v43 = vpack.c.bf16 %v319_v40, %v318_v39  ;;  %v320_v44 = vld [vmem:[%s4299_s27 + $0xb0] sm:$0xff]  ;;  %v321_v45 = vld [vmem:[%s4299_s27 + $0xb8] sm:$0xff]  ;;  %v322_v46 = vld [vmem:[%s4299_s27 + $0xc0] sm:$0xff] }
  0x94   : > { %3393 = vmatpush3.bf16.msra.mxu1 %v3751_v23  ;;  %v323_v47 = vld [vmem:[%s4299_s27 + $0xc8] sm:$0xff]  ;;  %v373_v48 = vpack.c.bf16 %v321_v45, %v320_v44  ;;  %v324_v50 = vld [vmem:[%s4299_s27 + $0xd0] sm:$0xff]  ;;  %v325_v51 = vld [vmem:[%s4299_s27 + $0xd8] sm:$0xff] }
  0x95   : > { %3394 = vmatprep.subr.bf16.mxu1 %v3752_v26  ;;  %v374_v49 = vpack.c.bf16 %v323_v47, %v322_v46  ;;  %v326_v52 = vld [vmem:[%s4299_s27 + $0xe0] sm:$0xff]  ;;  %v327_v53 = vld [vmem:[%s4299_s27 + $0xe8] sm:$0xff]  ;;  %v375_v54 = vpack.c.bf16 %v325_v51, %v324_v50  ;;  %v328_v56 = vld [vmem:[%s4299_s27 + $0xf0] sm:$0xff] }
  0x96   : > { %3325 = vmatpush3.bf16.msra.mxu0 %v3749_v6  ;;  %v376_v55 = vpack.c.bf16 %v327_v53, %v326_v52  ;;  %v329_v57 = vld [vmem:[%s4299_s27 + $0xf8] sm:$0xff]  ;;  %v330_v58 = vld [vmem:[%s4299_s27 + $0x100] sm:$0xff]  ;;  %v331_v59 = vld [vmem:[%s4299_s27 + $0x108] sm:$0xff] }
  0x97   : > { %3470 = vmatprep.subr.bf16.mxu0 %v3750_v22  ;;  %v377_v60 = vpack.c.bf16 %v329_v57, %v328_v56  ;;  %v378_v61 = vpack.c.bf16 %v331_v59, %v330_v58  ;;  %v332_v62 = vld [vmem:[%s4299_s27 + $0x110] sm:$0xff]  ;;  %v333_v63 = vld [vmem:[%s4299_s27 + $0x118] sm:$0xff]  ;;  %v334_v0 = vld [vmem:[%s4299_s27 + $0x120] sm:$0xff] }
  0x98   : > { %3395 = vmatpush3.bf16.msra.mxu1 %v3752_v26  ;;  %v335_v1 = vld [vmem:[%s4299_s27 + $0x128] sm:$0xff]  ;;  %v379_v2 = vpack.c.bf16 %v333_v63, %v332_v62  ;;  %v336_v4 = vld [vmem:[%s4299_s27 + $0x130] sm:$0xff]  ;;  %v337_v5 = vld [vmem:[%s4299_s27 + $0x138] sm:$0xff] }
  0x99   : > { %3327 = vmatmul.mubr.msk.bf16.vlgmr.msra.gmra.mrb[0].mxu0 %vm426_vm0, %v363_v11  ;;  %3396 = vmatprep.subr.bf16.mxu1 %v3753_v28  ;;  %v380_v3 = vpack.c.bf16 %v335_v1, %v334_v0  ;;  %v338_v6 = vld [vmem:[%s4299_s27 + $0x140] sm:$0xff]  ;;  %v339_v7 = vld [vmem:[%s4299_s27 + $0x148] sm:$0xff]  ;;  %v381_v8 = vpack.c.bf16 %v337_v5, %v336_v4  ;;  %v340_v10 = vld [vmem:[%s4299_s27 + $0x150] sm:$0xff] }
  0x9a   : > { %3330 = vmatprep.mubr.msk.bf16.mxu0 %vm426_vm0, %v364_v12  ;;  %3471 = vmatpush3.bf16.msra.mxu0 %v3750_v22  ;;  %v382_v9 = vpack.c.bf16 %v339_v7, %v338_v6  ;;  %v341_v11 = vld [vmem:[%s4299_s27 + $0x158] sm:$0xff]  ;;  %v342_v12 = vld [vmem:[%s4299_s27 + $0x160] sm:$0xff]  ;;  %v343_v13 = vld [vmem:[%s4299_s27 + $0x168] sm:$0xff] }
  0x9b   : > { %3472 = vmatprep.subr.bf16.mxu0 %v3751_v23  ;;  %v383_v14 = vpack.c.bf16 %v341_v11, %v340_v10  ;;  %v384_v15 = vpack.c.bf16 %v343_v13, %v342_v12  ;;  %v344_v16 = vld [vmem:[%s4299_s27 + $0x170] sm:$0xff]  ;;  %v347_v19 = vld [vmem:[%s4299_s27 + $0x188] sm:$0xff]  ;;  %v3757_v21 = vld [vmem:[#allocation5 + $0x38] sm:$0xff]  }
  0x9c   : > { %3397 = vmatpush3.bf16.msra.mxu1 %v3753_v28  ;;  %v349_v24 = vld [vmem:[%s4299_s27 + $0x198] sm:$0xff]  ;;  %v352_v29 = vld [vmem:[%s4299_s27 + $0x1b0] sm:$0xff]  ;;  %v354_v31 = vld [vmem:[%s4299_s27 + $0x1c0] sm:$0xff] }
  0x9d   : > { %3398 = vmatprep.subr.bf16.mxu1 %v3754_v34  ;;  %v353_v30 = vld [vmem:[%s4299_s27 + $0x1b8] sm:$0xff]  ;;  %v355_v32 = vld [vmem:[%s4299_s27 + $0x1c8] sm:$0xff]  ;;  %v358_v37 = vld [vmem:[%s4299_s27 + $0x1e0] sm:$0xff] }
  0x9e   : > { %3473 = vmatpush3.bf16.msra.mxu0 %v3751_v23  ;;  %v348_v23 = vld [vmem:[%s4299_s27 + $0x190] sm:$0xff]  ;;  %v359_v38 = vld [vmem:[%s4299_s27 + $0x1e8] sm:$0xff] }
  0x9f   : > { %3474 = vmatprep.subr.bf16.mxu0 %v3752_v26  ;;  %v392_v40 = vpack.c.bf16 %v359_v38, %v358_v37 }
  0xa0   : > { %3399 = vmatpush3.bf16.msra.mxu1 %v3754_v34 }
  0xa1   : > { %3331 = vmatmul.mubr.msk.bf16.gmra.mrb[4].mxu0 %vm426_vm0, %v365_v17  ;;  %3400 = vmatprep.subr.bf16.mxu1 %v3755_v36  ;;  %v345_v17 = vld [vmem:[%s4299_s27 + $0x178] sm:$0xff] }
  0xa2   : > { %3334 = vmatprep.mubr.msk.bf16.mxu0 %vm426_vm0, %v366_v18  ;;  %3475 = vmatpush3.bf16.msra.mxu0 %v3752_v26  ;;  %v346_v18 = vld [vmem:[%s4299_s27 + $0x180] sm:$0xff]  ;;  %v385_v20 = vpack.c.bf16 %v345_v17, %v344_v16  ;;  %v351_v26 = vld [vmem:[%s4299_s27 + $0x1a8] sm:$0xff] }
  0xa3   : > { %3476 = vmatprep.subr.bf16.mxu0 %v3753_v28  ;;  %v386_v22 = vpack.c.bf16 %v347_v19, %v346_v18 }
  0xa4   : > { %3401 = vmatpush3.bf16.msra.mxu1 %v3755_v36 }
  0xa5   : > { %3402 = vmatprep.subr.bf16.mxu1 %v3756_v42 }
  0xa6   : > { %3477 = vmatpush3.bf16.msra.mxu0 %v3753_v28 }
  0xa7   : > { %3478 = vmatprep.subr.bf16.mxu0 %v3754_v34 }
  0xa8   : > { %3403 = vmatpush3.bf16.msra.mxu1 %v3756_v42 }
  0xa9   : > { %3335 = vmatmul.mubr.msk.bf16.gmra.mrb[8].mxu0 %vm426_vm0, %v367_v25  ;;  %3404 = vmatprep.subr.bf16.mxu1 %v3757_v21  ;;  %v350_v25 = vld [vmem:[%s4299_s27 + $0x1a0] sm:$0xff] }
  0xaa   : > { %3338 = vmatprep.mubr.msk.bf16.mxu0 %vm426_vm0, %v368_v27  ;;  %3479 = vmatpush3.bf16.msra.mxu0 %v3754_v34  ;;  %v387_v27 = vpack.c.bf16 %v349_v24, %v348_v23  ;;  %v388_v28 = vpack.c.bf16 %v351_v26, %v350_v25  ;;  %v390_v34 = vpack.c.bf16 %v355_v32, %v354_v31 }
  0xab   : > { %3480 = vmatprep.subr.bf16.mxu0 %v3755_v36 }
  0xac   : > { %3405 = vmatpush3.bf16.msra.mxu1 %v3757_v21 }
  0xae   : > { %3481 = vmatpush3.bf16.msra.mxu0 %v3755_v36  ;;  %v357_v36 = vld [vmem:[%s4299_s27 + $0x1d8] sm:$0xff] }
  0xaf   : > { %3482 = vmatprep.subr.bf16.mxu0 %v3756_v42 }
  0xb1   : > { %3339 = vmatmul.mubr.msk.bf16.gmra.mrb[12].mxu0 %vm426_vm0, %v369_v33  ;;  %v389_v33 = vpack.c.bf16 %v353_v30, %v352_v29 }
  0xb2   : > { %3342 = vmatprep.mubr.msk.bf16.mxu0 %vm426_vm0, %v370_v35  ;;  %3483 = vmatpush3.bf16.msra.mxu0 %v3756_v42  ;;  %v356_v35 = vld [vmem:[%s4299_s27 + $0x1d0] sm:$0xff]  ;;  %v361_v42 = vld [vmem:[%s4299_s27 + $0x1f8] sm:$0xff] }
  0xb3   : > { %3484 = vmatprep.subr.bf16.mxu0 %v3757_v21  ;;  %v391_v39 = vpack.c.bf16 %v357_v36, %v356_v35 }
  0xb6   : > { %3485 = vmatpush3.bf16.msra.mxu0 %v3757_v21 }
  0xb9   : > { %3343 = vmatmul.mubr.msk.bf16.gmra.mrb[16].mxu0 %vm426_vm0, %v371_v41  ;;  %v360_v41 = vld [vmem:[%s4299_s27 + $0x1f0] sm:$0xff] }
  0xba   : > { %3346 = vmatprep.mubr.msk.bf16.mxu0 %vm426_vm0, %v372_v43  ;;  %v393_v43 = vpack.c.bf16 %v361_v42, %v360_v41 }
  0xc1   : > { %3347 = vmatmul.mubr.msk.bf16.gmra.mrb[20].mxu0 %vm426_vm0, %v373_v48 }
  0xc2   : > { %3350 = vmatprep.mubr.msk.bf16.mxu0 %vm426_vm0, %v374_v49 }
  0xc9   : > { %3351 = vmatmul.mubr.msk.bf16.gmra.mrb[24].mxu0 %vm426_vm0, %v375_v54 }
  0xca   : > { %3354 = vmatprep.mubr.msk.bf16.mxu0 %vm426_vm0, %v376_v55 }
  0xd1   : > { %3355 = vmatmul.mubr.msk.bf16.gmra.mrb[28].mxu0 %vm426_vm0, %v377_v60 }
  0xd2   : > { %3358 = vmatprep.mubr.msk.bf16.mxu0 %vm426_vm0, %v378_v61 }
  0xd9   : > { %3359 = vmatmul.mubr.msk.bf16.gmra.mrb[32].mxu0 %vm426_vm0, %v379_v2 }
  0xda   : > { %3362 = vmatprep.mubr.msk.bf16.mxu0 %vm426_vm0, %v380_v3 }
  0xe1   : > { %3363 = vmatmul.mubr.msk.bf16.gmra.mrb[36].mxu0 %vm426_vm0, %v381_v8 }
  0xe2   : > { %3366 = vmatprep.mubr.msk.bf16.mxu0 %vm426_vm0, %v382_v9 }
  0xe9   : > { %3367 = vmatmul.mubr.msk.bf16.gmra.mrb[40].mxu0 %vm426_vm0, %v383_v14 }
  0xea   : > { %3370 = vmatprep.mubr.msk.bf16.mxu0 %vm426_vm0, %v384_v15 }
  0xf1   : > { %3371 = vmatmul.mubr.msk.bf16.gmra.mrb[44].mxu0 %vm426_vm0, %v385_v20 }
  0xf2   : > { %3374 = vmatprep.mubr.msk.bf16.mxu0 %vm426_vm0, %v386_v22 }
  0xf9   : > { %3375 = vmatmul.mubr.msk.bf16.gmra.mrb[48].mxu0 %vm426_vm0, %v387_v27 }
  0xfa   : > { %3378 = vmatprep.mubr.msk.bf16.mxu0 %vm426_vm0, %v388_v28 }
 0x101   : > { %3379 = vmatmul.mubr.msk.bf16.gmra.mrb[52].mxu0 %vm426_vm0, %v389_v33 }
 0x102   : > { %3382 = vmatprep.mubr.msk.bf16.mxu0 %vm426_vm0, %v390_v34 }
 0x109   : > { %3383 = vmatmul.mubr.msk.bf16.gmra.mrb[56].mxu0 %vm426_vm0, %v391_v39 }
 0x10a   : > { %3386 = vmatprep.mubr.msk.bf16.mxu0 %vm426_vm0, %v392_v40 }
 0x111   : > { %3387 = vmatmul.mubr.msk.bf16.gmra.mrb[60].mxu0 %vm426_vm0, %v393_v43 }
 0x16c   : > { %v4400_v44 = vpop.f32.mrb[0].mxu0 }
 0x16d   : > { %v4402_v45 = vpop.f32.mrb[1].mxu0 }
 0x16e   : > { %v4404_v46 = vpop.f32.mrb[2].mxu0 }
 0x16f   : > { %v813_v47 = vpack.c.bf16 %v4404_v46, %v4400_v44  ;;  %v4408_v48 = vpop.f32.mrb[3].mxu0 }
 0x170   : > { %v812_v49 = vpack.c.bf16 %v4408_v48, %v4402_v45 }
 0x172   : > { %3406 = vmatprep.mubr.bf16.mxu1 %v812_v49 }
 0x173   : > { %3407 = vmatmul.mubr.bf16.vlgmr.msra.gmra.mrb[0].mxu1 %v813_v47 }
 0x174   : > { %v4412_v50 = vpop.f32.mrb[4].mxu0 }
 0x175   : > { %v4414_v51 = vpop.f32.mrb[5].mxu0 }
 0x176   : > { %v4416_v52 = vpop.f32.mrb[6].mxu0 }
 0x177   : > { %v815_v53 = vpack.c.bf16 %v4416_v52, %v4412_v50  ;;  %v4420_v54 = vpop.f32.mrb[7].mxu0 }
 0x178   : > { %v814_v55 = vpack.c.bf16 %v4420_v54, %v4414_v51 }
 0x17a   : > { %3410 = vmatprep.mubr.bf16.mxu1 %v814_v55 }
 0x17b   : > { %3411 = vmatmul.mubr.bf16.gmra.mrb[4].mxu1 %v815_v53 }
 0x17c   : > { %v4424_v56 = vpop.f32.mrb[8].mxu0 }
 0x17d   : > { %v4426_v57 = vpop.f32.mrb[9].mxu0 }
 0x17e   : > { %v4428_v58 = vpop.f32.mrb[10].mxu0 }
 0x17f   : > { %v817_v59 = vpack.c.bf16 %v4428_v58, %v4424_v56  ;;  %v4432_v60 = vpop.f32.mrb[11].mxu0 }
 0x180   : > { %v816_v61 = vpack.c.bf16 %v4432_v60, %v4426_v57 }
 0x182   : > { %3414 = vmatprep.mubr.bf16.mxu1 %v816_v61 }
 0x183   : > { %3415 = vmatmul.mubr.bf16.gmra.mrb[8].mxu1 %v817_v59 }
 0x184   : > { %v4436_v62 = vpop.f32.mrb[12].mxu0 }
 0x185   : > { %v4438_v63 = vpop.f32.mrb[13].mxu0 }
 0x186   : > { %v4440_v0 = vpop.f32.mrb[14].mxu0 }
 0x187   : > { %v819_v1 = vpack.c.bf16 %v4440_v0, %v4436_v62  ;;  %v4444_v2 = vpop.f32.mrb[15].mxu0 }
 0x188   : > { %v818_v3 = vpack.c.bf16 %v4444_v2, %v4438_v63 }
 0x18a   : > { %3418 = vmatprep.mubr.bf16.mxu1 %v818_v3 }
 0x18b   : > { %3419 = vmatmul.mubr.bf16.gmra.mrb[12].mxu1 %v819_v1 }
 0x18c   : > { %v4448_v4 = vpop.f32.mrb[16].mxu0 }
 0x18d   : > { %v4450_v5 = vpop.f32.mrb[17].mxu0 }
 0x18e   : > { %v4452_v6 = vpop.f32.mrb[18].mxu0 }
 0x18f   : > { %v821_v7 = vpack.c.bf16 %v4452_v6, %v4448_v4  ;;  %v4456_v8 = vpop.f32.mrb[19].mxu0 }
 0x190   : > { %v820_v9 = vpack.c.bf16 %v4456_v8, %v4450_v5 }
 0x192   : > { %3422 = vmatprep.mubr.bf16.mxu1 %v820_v9 }
 0x193   : > { %3423 = vmatmul.mubr.bf16.gmra.mrb[16].mxu1 %v821_v7 }
 0x194   : > { %v4460_v10 = vpop.f32.mrb[20].mxu0 }
 0x195   : > { %v4462_v11 = vpop.f32.mrb[21].mxu0 }
 0x196   : > { %v4464_v12 = vpop.f32.mrb[22].mxu0 }
 0x197   : > { %v823_v13 = vpack.c.bf16 %v4464_v12, %v4460_v10  ;;  %v4468_v14 = vpop.f32.mrb[23].mxu0 }
 0x198   : > { %v822_v15 = vpack.c.bf16 %v4468_v14, %v4462_v11 }
 0x19a   : > { %3426 = vmatprep.mubr.bf16.mxu1 %v822_v15 }
 0x19b   : > { %3427 = vmatmul.mubr.bf16.gmra.mrb[20].mxu1 %v823_v13 }
 0x19c   : > { %v4472_v16 = vpop.f32.mrb[24].mxu0 }
 0x19d   : > { %v4474_v17 = vpop.f32.mrb[25].mxu0 }
 0x19e   : > { %v4476_v18 = vpop.f32.mrb[26].mxu0 }
 0x19f   : > { %v825_v19 = vpack.c.bf16 %v4476_v18, %v4472_v16  ;;  %v4480_v20 = vpop.f32.mrb[27].mxu0 }
 0x1a0   : > { %v824_v21 = vpack.c.bf16 %v4480_v20, %v4474_v17 }
 0x1a2   : > { %3430 = vmatprep.mubr.bf16.mxu1 %v824_v21 }
 0x1a3   : > { %3431 = vmatmul.mubr.bf16.gmra.mrb[24].mxu1 %v825_v19 }
 0x1a4   : > { %v4484_v22 = vpop.f32.mrb[28].mxu0 }
 0x1a5   : > { %v4486_v23 = vpop.f32.mrb[29].mxu0 }
 0x1a6   : > { %v4488_v24 = vpop.f32.mrb[30].mxu0 }
 0x1a7   : > { %v827_v25 = vpack.c.bf16 %v4488_v24, %v4484_v22  ;;  %v4492_v26 = vpop.f32.mrb[31].mxu0 }
 0x1a8   : > { %v826_v27 = vpack.c.bf16 %v4492_v26, %v4486_v23 }
 0x1aa   : > { %3434 = vmatprep.mubr.bf16.mxu1 %v826_v27 }
 0x1ab   : > { %3435 = vmatmul.mubr.bf16.gmra.mrb[28].mxu1 %v827_v25 }
 0x1ac   : > { %v4496_v28 = vpop.f32.mrb[32].mxu0 }
 0x1ad   : > { %v4498_v29 = vpop.f32.mrb[33].mxu0 }
 0x1ae   : > { %v4500_v30 = vpop.f32.mrb[34].mxu0 }
 0x1af   : > { %v829_v31 = vpack.c.bf16 %v4500_v30, %v4496_v28  ;;  %v4504_v32 = vpop.f32.mrb[35].mxu0 }
 0x1b0   : > { %v828_v33 = vpack.c.bf16 %v4504_v32, %v4498_v29 }
 0x1b2   : > { %3438 = vmatprep.mubr.bf16.mxu1 %v828_v33 }
 0x1b3   : > { %3439 = vmatmul.mubr.bf16.gmra.mrb[32].mxu1 %v829_v31 }
 0x1b4   : > { %v4508_v34 = vpop.f32.mrb[36].mxu0 }
 0x1b5   : > { %v4510_v35 = vpop.f32.mrb[37].mxu0 }
 0x1b6   : > { %v4512_v36 = vpop.f32.mrb[38].mxu0 }
 0x1b7   : > { %v831_v37 = vpack.c.bf16 %v4512_v36, %v4508_v34  ;;  %v4516_v38 = vpop.f32.mrb[39].mxu0 }
 0x1b8   : > { %v830_v39 = vpack.c.bf16 %v4516_v38, %v4510_v35 }
 0x1ba   : > { %3442 = vmatprep.mubr.bf16.mxu1 %v830_v39 }
 0x1bb   : > { %3443 = vmatmul.mubr.bf16.gmra.mrb[36].mxu1 %v831_v37 }
 0x1bc   : > { %v4520_v40 = vpop.f32.mrb[40].mxu0 }
 0x1bd   : > { %v4522_v41 = vpop.f32.mrb[41].mxu0 }
 0x1be   : > { %v4524_v42 = vpop.f32.mrb[42].mxu0 }
 0x1bf   : > { %v833_v43 = vpack.c.bf16 %v4524_v42, %v4520_v40  ;;  %v4528_v47 = vpop.f32.mrb[43].mxu0 }
 0x1c0   : > { %v832_v49 = vpack.c.bf16 %v4528_v47, %v4522_v41 }
 0x1c2   : > { %3446 = vmatprep.mubr.bf16.mxu1 %v832_v49 }
 0x1c3   : > { %3447 = vmatmul.mubr.bf16.gmra.mrb[40].mxu1 %v833_v43 }
 0x1c4   : > { %v4532_v53 = vpop.f32.mrb[44].mxu0 }
 0x1c5   : > { %v4534_v55 = vpop.f32.mrb[45].mxu0 }
 0x1c6   : > { %v4536_v59 = vpop.f32.mrb[46].mxu0 }
 0x1c7   : > { %v835_v61 = vpack.c.bf16 %v4536_v59, %v4532_v53  ;;  %v4540_v1 = vpop.f32.mrb[47].mxu0 }
 0x1c8   : > { %v834_v3 = vpack.c.bf16 %v4540_v1, %v4534_v55 }
 0x1ca   : > { %3450 = vmatprep.mubr.bf16.mxu1 %v834_v3 }
 0x1cb   : > { %3451 = vmatmul.mubr.bf16.gmra.mrb[44].mxu1 %v835_v61 }
 0x1cc   : > { %v4544_v7 = vpop.f32.mrb[48].mxu0 }
 0x1cd   : > { %v4546_v9 = vpop.f32.mrb[49].mxu0 }
 0x1ce   : > { %v4548_v13 = vpop.f32.mrb[50].mxu0 }
 0x1cf   : > { %5645 = vst [vmem:[#allocation18_spill] sm:$0xff] %v4548_v13  ;;  %v837_v15 = vpack.c.bf16 %v4548_v13, %v4544_v7  ;;  %v4552_v19 = vpop.f32.mrb[51].mxu0 }
 0x1d0   : > { %5646 = vst [vmem:[#allocation19_spill] sm:$0xff] %v4552_v19  ;;  %v836_v21 = vpack.c.bf16 %v4552_v19, %v4546_v9 }
 0x1d2   : > { %3454 = vmatprep.mubr.bf16.mxu1 %v836_v21 }
 0x1d3   : > { %3455 = vmatmul.mubr.bf16.gmra.mrb[48].mxu1 %v837_v15 }
 0x1d4   : > { %v4556_v25 = vpop.f32.mrb[52].mxu0 }
 0x1d5   : > { %5647 = vst [vmem:[#allocation20_spill] sm:$0xff] %v4556_v25  ;;  %v4558_v27 = vpop.f32.mrb[53].mxu0 }
 0x1d6   : > { %5648 = vst [vmem:[#allocation21_spill] sm:$0xff] %v4558_v27  ;;  %v4560_v31 = vpop.f32.mrb[54].mxu0 }
 0x1d7   : > { %5649 = vst [vmem:[#allocation22_spill] sm:$0xff] %v4560_v31  ;;  %v839_v33 = vpack.c.bf16 %v4560_v31, %v4556_v25  ;;  %v4564_v37 = vpop.f32.mrb[55].mxu0 }
 0x1d8   : > { %5650 = vst [vmem:[#allocation23_spill] sm:$0xff] %v4564_v37  ;;  %v838_v39 = vpack.c.bf16 %v4564_v37, %v4558_v27 }
 0x1da   : > { %3458 = vmatprep.mubr.bf16.mxu1 %v838_v39 }
 0x1db   : > { %3459 = vmatmul.mubr.bf16.gmra.mrb[52].mxu1 %v839_v33 }
 0x1dc   : > { %v4568_v43 = vpop.f32.mrb[56].mxu0 }
 0x1dd   : > { %5651 = vst [vmem:[#allocation24_spill] sm:$0xff] %v4568_v43  ;;  %v4570_v49 = vpop.f32.mrb[57].mxu0 }
 0x1de   : > { %5652 = vst [vmem:[#allocation25_spill] sm:$0xff] %v4570_v49  ;;  %v4572_v61 = vpop.f32.mrb[58].mxu0 }
 0x1df   : > { %5653 = vst [vmem:[#allocation26_spill] sm:$0xff] %v4572_v61  ;;  %v841_v3 = vpack.c.bf16 %v4572_v61, %v4568_v43  ;;  %v4576_v15 = vpop.f32.mrb[59].mxu0  ;;  %v3758_v43 = vld [vmem:[#allocation7] sm:$0xff]  }
 0x1e0   : > { %5654 = vst [vmem:[#allocation27_spill] sm:$0xff] %v4576_v15  ;;  %v840_v21 = vpack.c.bf16 %v4576_v15, %v4570_v49  ;;  %3550 = vmatprep.subr.bf16.mxu0 %v3758_v43  ;;  %3630 = vmatprep.subr.bf16.mxu1 %v3758_v43 }
 0x1e1   : > { %3638 = vmatpush3.bf16.msra.mxu1 %v3758_v43 }
 0x1e2   : > { %3462 = vmatprep.mubr.bf16.mxu1 %v840_v21 }
 0x1e3   : > { %3463 = vmatmul.mubr.bf16.gmra.mrb[56].mxu1 %v841_v3 }
 0x1e4   : > { %v4580_v31 = vpop.f32.mrb[60].mxu0 }
 0x1e5   : > { %5655 = vst [vmem:[#allocation28_spill] sm:$0xff] %v4580_v31  ;;  %v4582_v39 = vpop.f32.mrb[61].mxu0 }
 0x1e6   : > { %5656 = vst [vmem:[#allocation29_spill] sm:$0xff] %v4582_v39  ;;  %v4584_v33 = vpop.f32.mrb[62].mxu0 }
 0x1e7   : > { %5657 = vst [vmem:[#allocation30_spill] sm:$0xff] %v4584_v33  ;;  %v843_v37 = vpack.c.bf16 %v4584_v33, %v4580_v31  ;;  %v4588_v27 = vpop.f32.mrb[63].mxu0 }
 0x1e8   : > { %5658 = vst [vmem:[#allocation31_spill] sm:$0xff] %v4588_v27  ;;  %v842_v61 = vpack.c.bf16 %v4588_v27, %v4582_v39  ;;  %v3759_v27 = vld [vmem:[#allocation7 + $0x8] sm:$0xff]   ;;  %v3760_v39 = vld [vmem:[#allocation7 + $0x10] sm:$0xff]  }
 0x1e9   : > { %3631 = vmatprep.subr.bf16.mxu1 %v3759_v27 }
 0x1ea   : > { %3466 = vmatprep.mubr.bf16.mxu1 %v842_v61  ;;  %3639 = vmatpush3.bf16.msra.mxu1 %v3759_v27 }
 0x1eb   : > { %3467 = vmatmul.mubr.bf16.gmra.mrb[60].mxu1 %v843_v37  ;;  %3632 = vmatprep.subr.bf16.mxu1 %v3760_v39 }
 0x1ee   : > { %3640 = vmatpush3.bf16.msra.mxu1 %v3760_v39 }
 0x246   : > { %v3408_v3 = vpop.f32.mrb[0].mxu1 }
 0x247   : > { %v4593_v21 = vsub.f32 %v4400_v44, %v3408_v3  ;;  %v942_v15 = vpop.f32.mrb[1].mxu1 }
 0x248   : > { %v4596_v49 = vsub.f32 %v4402_v45, %v942_v15  ;;  %v3409_v33 = vpop.f32.mrb[2].mxu1 }
 0x249   : > { %v4599_v31 = vsub.f32 %v4404_v46, %v3409_v33  ;;  %v945_v25 = vpop.f32.mrb[3].mxu1  ;;  %v1263_v46 = vmul.f32 %v4593_v21, %v4593_v21 }
 0x24a   : > { %5659 = vst [vmem:[#allocation32_spill] sm:$0xff] %v4596_v49  ;;  %v4602_v37 = vsub.f32 %v4408_v48, %v945_v25  ;;  %v1261_v44 = vmul.f32 %v4596_v49, %v4596_v49 }
 0x24b   : > { %5660 = vst [vmem:[#allocation33_spill] sm:$0xff] %v4599_v31  ;;  %v1264_v61 = vmul.f32 %v4599_v31, %v4599_v31  ;;  %v3761_v31 = vld [vmem:[#allocation7 + $0x18] sm:$0xff]  }
 0x24c   : > { %5661 = vst [vmem:[#allocation34_spill] sm:$0xff] %v4602_v37  ;;  %v1262_v45 = vmul.f32 %v4602_v37, %v4602_v37  ;;  %3633 = vmatprep.subr.bf16.mxu1 %v3761_v31 }
 0x24d   : > { %v1326_v48 = vpack.c.bf16 %v1264_v61, %v1263_v46  ;;  %v3762_v61 = vld [vmem:[#allocation7 + $0x20] sm:$0xff]   ;;  %3641 = vmatpush3.bf16.msra.mxu1 %v3761_v31 }
 0x24e   : > { %v3412_v15 = vpop.f32.mrb[4].mxu1  ;;  %v1325_v33 = vpack.c.bf16 %v1262_v45, %v1261_v44  ;;  %3634 = vmatprep.subr.bf16.mxu1 %v3762_v61 }
 0x24f   : > { %v4613_v25 = vsub.f32 %v4412_v50, %v3412_v15  ;;  %v958_v3 = vpop.f32.mrb[5].mxu1  ;;  %v3763_v15 = vld [vmem:[#allocation7 + $0x28] sm:$0xff]  }
 0x250   : > { %v4616_v19 = vsub.f32 %v4414_v51, %v958_v3  ;;  %v3413_v49 = vpop.f32.mrb[6].mxu1  ;;  %3486 = vmatprep.mubr.bf16.mxu0 %v1325_v33 }
 0x251   : > { %v4619_v37 = vsub.f32 %v4416_v52, %v3413_v49  ;;  %v961_v13 = vpop.f32.mrb[7].mxu1  ;;  %3487 = vmatmul.mubr.bf16.vlgmr.msra.gmra.mrb[64].mxu0 %v1326_v48  ;;  %v1267_v52 = vmul.f32 %v4613_v25, %v4613_v25  ;;  %3642 = vmatpush3.bf16.msra.mxu1 %v3762_v61 }
 0x252   : > { %v4622_v44 = vsub.f32 %v4420_v54, %v961_v13  ;;  %3551 = vmatpush3.bf16.msra.mxu0 %v3758_v43  ;;  %v1265_v51 = vmul.f32 %v4616_v19, %v4616_v19  ;;  %3635 = vmatprep.subr.bf16.mxu1 %v3763_v15 }
 0x253   : > { %v1268_v50 = vmul.f32 %v4619_v37, %v4619_v37  ;;  %3552 = vmatprep.subr.bf16.mxu0 %v3759_v27 }
 0x254   : > { %5662 = vst [vmem:[#allocation35_spill] sm:$0xff] %v4622_v44  ;;  %v1266_v45 = vmul.f32 %v4622_v44, %v4622_v44 }
 0x255   : > { %v1328_v46 = vpack.c.bf16 %v1268_v50, %v1267_v52  ;;  %v3764_v50 = vld [vmem:[#allocation7 + $0x30] sm:$0xff]   ;;  %3643 = vmatpush3.bf16.msra.mxu1 %v3763_v15 }
 0x256   : > { %v3416_v49 = vpop.f32.mrb[8].mxu1  ;;  %v1327_v54 = vpack.c.bf16 %v1266_v45, %v1265_v51  ;;  %3553 = vmatpush3.bf16.msra.mxu0 %v3759_v27  ;;  %3636 = vmatprep.subr.bf16.mxu1 %v3764_v50 }
 0x257   : > { %v4633_v13 = vsub.f32 %v4424_v56, %v3416_v49  ;;  %v974_v43 = vpop.f32.mrb[9].mxu1  ;;  %3554 = vmatprep.subr.bf16.mxu0 %v3760_v39 }
 0x258   : > { %v4636_v33 = vsub.f32 %v4426_v57, %v974_v43  ;;  %v3417_v48 = vpop.f32.mrb[10].mxu1  ;;  %3490 = vmatprep.mubr.bf16.mxu0 %v1327_v54 }
 0x259   : > { %v4639_v3 = vsub.f32 %v4428_v58, %v3417_v48  ;;  %v977_v44 = vpop.f32.mrb[11].mxu1  ;;  %3491 = vmatmul.mubr.bf16.gmra.mrb[68].mxu0 %v1328_v46  ;;  %v1271_v58 = vmul.f32 %v4633_v13, %v4633_v13  ;;  %3644 = vmatpush3.bf16.msra.mxu1 %v3764_v50 }
 0x25a   : > { %v4642_v27 = vsub.f32 %v4432_v60, %v977_v44  ;;  %3555 = vmatpush3.bf16.msra.mxu0 %v3760_v39  ;;  %v1269_v57 = vmul.f32 %v4636_v33, %v4636_v33 }
 0x25b   : > { %v1272_v56 = vmul.f32 %v4639_v3, %v4639_v3  ;;  %3556 = vmatprep.subr.bf16.mxu0 %v3761_v31 }
 0x25c   : > { %v1270_v51 = vmul.f32 %v4642_v27, %v4642_v27 }
 0x25d   : > { %v1330_v52 = vpack.c.bf16 %v1272_v56, %v1271_v58 }
 0x25e   : > { %v3420_v45 = vpop.f32.mrb[12].mxu1  ;;  %v1329_v60 = vpack.c.bf16 %v1270_v51, %v1269_v57  ;;  %3557 = vmatpush3.bf16.msra.mxu0 %v3761_v31 }
 0x25f   : > { %v4653_v39 = vsub.f32 %v4436_v62, %v3420_v45  ;;  %v990_v44 = vpop.f32.mrb[13].mxu1  ;;  %3558 = vmatprep.subr.bf16.mxu0 %v3762_v61 }
 0x260   : > { %v4656_v49 = vsub.f32 %v4438_v63, %v990_v44  ;;  %v3421_v54 = vpop.f32.mrb[14].mxu1  ;;  %3494 = vmatprep.mubr.bf16.mxu0 %v1329_v60 }
 0x261   : > { %v4659_v43 = vsub.f32 %v4440_v0, %v3421_v54  ;;  %v993_v46 = vpop.f32.mrb[15].mxu1  ;;  %3495 = vmatmul.mubr.bf16.gmra.mrb[72].mxu0 %v1330_v52  ;;  %v1275_v0 = vmul.f32 %v4653_v39, %v4653_v39 }
 0x262   : > { %v4662_v48 = vsub.f32 %v4444_v2, %v993_v46  ;;  %3559 = vmatpush3.bf16.msra.mxu0 %v3762_v61  ;;  %v1273_v63 = vmul.f32 %v4656_v49, %v4656_v49 }
 0x263   : > { %v1276_v62 = vmul.f32 %v4659_v43, %v4659_v43  ;;  %3560 = vmatprep.subr.bf16.mxu0 %v3763_v15 }
 0x264   : > { %v1274_v31 = vmul.f32 %v4662_v48, %v4662_v48 }
 0x265   : > { %v1332_v51 = vpack.c.bf16 %v1276_v62, %v1275_v0 }
 0x266   : > { %v3424_v56 = vpop.f32.mrb[16].mxu1  ;;  %v1331_v57 = vpack.c.bf16 %v1274_v31, %v1273_v63  ;;  %3561 = vmatpush3.bf16.msra.mxu0 %v3763_v15 }
 0x267   : > { %v4673_v2 = vsub.f32 %v4448_v4, %v3424_v56  ;;  %v1006_v61 = vpop.f32.mrb[17].mxu1  ;;  %3562 = vmatprep.subr.bf16.mxu0 %v3764_v50 }
 0x268   : > { %v4676_v58 = vsub.f32 %v4450_v5, %v1006_v61  ;;  %v3425_v45 = vpop.f32.mrb[18].mxu1  ;;  %3498 = vmatprep.mubr.bf16.mxu0 %v1331_v57 }
 0x269   : > { %v4679_v60 = vsub.f32 %v4452_v6, %v3425_v45  ;;  %v1009_v44 = vpop.f32.mrb[19].mxu1  ;;  %3499 = vmatmul.mubr.bf16.gmra.mrb[76].mxu0 %v1332_v51  ;;  %v1279_v54 = vmul.f32 %v4673_v2, %v4673_v2 }
 0x26a   : > { %v4682_v52 = vsub.f32 %v4456_v8, %v1009_v44  ;;  %3563 = vmatpush3.bf16.msra.mxu0 %v3764_v50  ;;  %v1277_v15 = vmul.f32 %v4676_v58, %v4676_v58 }
 0x26b   : > { %v1280_v4 = vmul.f32 %v4679_v60, %v4679_v60 }
 0x26c   : > { %v1278_v5 = vmul.f32 %v4682_v52, %v4682_v52 }
 0x26d   : > { %v1334_v63 = vpack.c.bf16 %v1280_v4, %v1279_v54 }
 0x26e   : > { %v3428_v6 = vpop.f32.mrb[20].mxu1  ;;  %v1333_v46 = vpack.c.bf16 %v1278_v5, %v1277_v15 }
 0x26f   : > { %v4693_v62 = vsub.f32 %v4460_v10, %v3428_v6  ;;  %v1022_v8 = vpop.f32.mrb[21].mxu1 }
 0x270   : > { %v4696_v50 = vsub.f32 %v4462_v11, %v1022_v8  ;;  %v3429_v31 = vpop.f32.mrb[22].mxu1  ;;  %3502 = vmatprep.mubr.bf16.mxu0 %v1333_v46 }
 0x271   : > { %v4699_v0 = vsub.f32 %v4464_v12, %v3429_v31  ;;  %v1025_v56 = vpop.f32.mrb[23].mxu1  ;;  %3503 = vmatmul.mubr.bf16.gmra.mrb[80].mxu0 %v1334_v63  ;;  %v1283_v51 = vmul.f32 %v4693_v62, %v4693_v62 }
 0x272   : > { %v4702_v57 = vsub.f32 %v4468_v14, %v1025_v56  ;;  %v1281_v10 = vmul.f32 %v4696_v50, %v4696_v50 }
 0x273   : > { %v1284_v61 = vmul.f32 %v4699_v0, %v4699_v0 }
 0x274   : > { %v1282_v11 = vmul.f32 %v4702_v57, %v4702_v57 }
 0x275   : > { %v1336_v14 = vpack.c.bf16 %v1284_v61, %v1283_v51 }
 0x276   : > { %v3432_v45 = vpop.f32.mrb[24].mxu1  ;;  %v1335_v12 = vpack.c.bf16 %v1282_v11, %v1281_v10 }
 0x277   : > { %v4713_v44 = vsub.f32 %v4472_v16, %v3432_v45  ;;  %v1038_v4 = vpop.f32.mrb[25].mxu1 }
 0x278   : > { %v4716_v15 = vsub.f32 %v4474_v17, %v1038_v4  ;;  %v3433_v5 = vpop.f32.mrb[26].mxu1  ;;  %3506 = vmatprep.mubr.bf16.mxu0 %v1335_v12 }
 0x279   : > { %v4719_v54 = vsub.f32 %v4476_v18, %v3433_v5  ;;  %v1041_v6 = vpop.f32.mrb[27].mxu1  ;;  %3507 = vmatmul.mubr.bf16.gmra.mrb[84].mxu0 %v1336_v14  ;;  %v1287_v63 = vmul.f32 %v4713_v44, %v4713_v44 }
 0x27a   : > { %v4722_v46 = vsub.f32 %v4480_v20, %v1041_v6  ;;  %v1285_v16 = vmul.f32 %v4716_v15, %v4716_v15 }
 0x27b   : > { %v1288_v8 = vmul.f32 %v4719_v54, %v4719_v54 }
 0x27c   : > { %v1286_v17 = vmul.f32 %v4722_v46, %v4722_v46 }
 0x27d   : > { %v1338_v20 = vpack.c.bf16 %v1288_v8, %v1287_v63 }
 0x27e   : > { %v3436_v31 = vpop.f32.mrb[28].mxu1  ;;  %v1337_v18 = vpack.c.bf16 %v1286_v17, %v1285_v16 }
 0x27f   : > { %v4733_v56 = vsub.f32 %v4484_v22, %v3436_v31  ;;  %v1054_v61 = vpop.f32.mrb[29].mxu1 }
 0x280   : > { %v4736_v10 = vsub.f32 %v4486_v23, %v1054_v61  ;;  %v3437_v11 = vpop.f32.mrb[30].mxu1  ;;  %3510 = vmatprep.mubr.bf16.mxu0 %v1337_v18 }
 0x281   : > { %v4739_v51 = vsub.f32 %v4488_v24, %v3437_v11  ;;  %v1057_v45 = vpop.f32.mrb[31].mxu1  ;;  %3511 = vmatmul.mubr.bf16.gmra.mrb[88].mxu0 %v1338_v20  ;;  %v1291_v14 = vmul.f32 %v4733_v56, %v4733_v56 }
 0x282   : > { %v4742_v12 = vsub.f32 %v4492_v26, %v1057_v45  ;;  %v1289_v22 = vmul.f32 %v4736_v10, %v4736_v10 }
 0x283   : > { %v1292_v4 = vmul.f32 %v4739_v51, %v4739_v51 }
 0x284   : > { %v1290_v23 = vmul.f32 %v4742_v12, %v4742_v12 }
 0x285   : > { %v1340_v26 = vpack.c.bf16 %v1292_v4, %v1291_v14 }
 0x286   : > { %v3440_v5 = vpop.f32.mrb[32].mxu1  ;;  %v1339_v24 = vpack.c.bf16 %v1290_v23, %v1289_v22 }
 0x287   : > { %v4753_v6 = vsub.f32 %v4496_v28, %v3440_v5  ;;  %v1070_v8 = vpop.f32.mrb[33].mxu1 }
 0x288   : > { %v4756_v16 = vsub.f32 %v4498_v29, %v1070_v8  ;;  %v3441_v17 = vpop.f32.mrb[34].mxu1  ;;  %3514 = vmatprep.mubr.bf16.mxu0 %v1339_v24 }
 0x289   : > { %v4759_v63 = vsub.f32 %v4500_v30, %v3441_v17  ;;  %v1073_v31 = vpop.f32.mrb[35].mxu1  ;;  %3515 = vmatmul.mubr.bf16.gmra.mrb[92].mxu0 %v1340_v26  ;;  %v1295_v20 = vmul.f32 %v4753_v6, %v4753_v6 }
 0x28a   : > { %v4762_v18 = vsub.f32 %v4504_v32, %v1073_v31  ;;  %v1293_v28 = vmul.f32 %v4756_v16, %v4756_v16 }
 0x28b   : > { %v1296_v61 = vmul.f32 %v4759_v63, %v4759_v63 }
 0x28c   : > { %v1294_v29 = vmul.f32 %v4762_v18, %v4762_v18 }
 0x28d   : > { %v1342_v32 = vpack.c.bf16 %v1296_v61, %v1295_v20 }
 0x28e   : > { %v3444_v11 = vpop.f32.mrb[36].mxu1  ;;  %v1341_v30 = vpack.c.bf16 %v1294_v29, %v1293_v28 }
 0x28f   : > { %v4773_v45 = vsub.f32 %v4508_v34, %v3444_v11  ;;  %v1086_v4 = vpop.f32.mrb[37].mxu1 }
 0x290   : > { %v4776_v22 = vsub.f32 %v4510_v35, %v1086_v4  ;;  %v3445_v23 = vpop.f32.mrb[38].mxu1  ;;  %3518 = vmatprep.mubr.bf16.mxu0 %v1341_v30 }
 0x291   : > { %v4779_v14 = vsub.f32 %v4512_v36, %v3445_v23  ;;  %v1089_v5 = vpop.f32.mrb[39].mxu1  ;;  %3519 = vmatmul.mubr.bf16.gmra.mrb[96].mxu0 %v1342_v32  ;;  %v1299_v26 = vmul.f32 %v4773_v45, %v4773_v45 }
 0x292   : > { %v4782_v24 = vsub.f32 %v4516_v38, %v1089_v5  ;;  %v1297_v34 = vmul.f32 %v4776_v22, %v4776_v22 }
 0x293   : > { %v1300_v8 = vmul.f32 %v4779_v14, %v4779_v14 }
 0x294   : > { %v1298_v35 = vmul.f32 %v4782_v24, %v4782_v24 }
 0x295   : > { %v1344_v38 = vpack.c.bf16 %v1300_v8, %v1299_v26 }
 0x296   : > { %v3448_v17 = vpop.f32.mrb[40].mxu1  ;;  %v1343_v36 = vpack.c.bf16 %v1298_v35, %v1297_v34 }
 0x297   : > { %v4793_v31 = vsub.f32 %v4520_v40, %v3448_v17  ;;  %v1102_v61 = vpop.f32.mrb[41].mxu1 }
 0x298   : > { %v4796_v28 = vsub.f32 %v4522_v41, %v1102_v61  ;;  %v3449_v29 = vpop.f32.mrb[42].mxu1  ;;  %3522 = vmatprep.mubr.bf16.mxu0 %v1343_v36 }
 0x299   : > { %v4799_v20 = vsub.f32 %v4524_v42, %v3449_v29  ;;  %v1105_v11 = vpop.f32.mrb[43].mxu1  ;;  %3523 = vmatmul.mubr.bf16.gmra.mrb[100].mxu0 %v1344_v38  ;;  %v1303_v32 = vmul.f32 %v4793_v31, %v4793_v31 }
 0x29a   : > { %v4802_v30 = vsub.f32 %v4528_v47, %v1105_v11  ;;  %v1301_v40 = vmul.f32 %v4796_v28, %v4796_v28 }
 0x29b   : > { %v1304_v4 = vmul.f32 %v4799_v20, %v4799_v20 }
 0x29c   : > { %v1302_v41 = vmul.f32 %v4802_v30, %v4802_v30 }
 0x29d   : > { %v1346_v47 = vpack.c.bf16 %v1304_v4, %v1303_v32  ;;  %v5667_v32 = vld [vmem:[#allocation18_spill] sm:$0xff] }
 0x29e   : > { %v3452_v23 = vpop.f32.mrb[44].mxu1  ;;  %v1345_v42 = vpack.c.bf16 %v1302_v41, %v1301_v40 }
 0x29f   : > { %v4813_v5 = vsub.f32 %v4532_v53, %v3452_v23  ;;  %v1118_v8 = vpop.f32.mrb[45].mxu1 }
 0x2a0   : > { %v4816_v34 = vsub.f32 %v4534_v55, %v1118_v8  ;;  %v3453_v35 = vpop.f32.mrb[46].mxu1  ;;  %3526 = vmatprep.mubr.bf16.mxu0 %v1345_v42  ;;  %v5669_v8 = vld [vmem:[#allocation19_spill] sm:$0xff] }
 0x2a1   : > { %v4819_v26 = vsub.f32 %v4536_v59, %v3453_v35  ;;  %v1121_v17 = vpop.f32.mrb[47].mxu1  ;;  %3527 = vmatmul.mubr.bf16.gmra.mrb[104].mxu0 %v1346_v47  ;;  %v1307_v38 = vmul.f32 %v4813_v5, %v4813_v5 }
 0x2a2   : > { %5663 = vst [vmem:[#allocation36_spill] sm:$0xff] %v4816_v34  ;;  %v4822_v36 = vsub.f32 %v4540_v1, %v1121_v17  ;;  %v1305_v53 = vmul.f32 %v4816_v34, %v4816_v34 }
 0x2a3   : > { %v1308_v61 = vmul.f32 %v4819_v26, %v4819_v26 }
 0x2a4   : > { %5664 = vst [vmem:[#allocation37_spill] sm:$0xff] %v4822_v36  ;;  %v1306_v55 = vmul.f32 %v4822_v36, %v4822_v36 }
 0x2a5   : > { %v1348_v1 = vpack.c.bf16 %v1308_v61, %v1307_v38 }
 0x2a6   : > { %v3456_v29 = vpop.f32.mrb[48].mxu1  ;;  %v1347_v59 = vpack.c.bf16 %v1306_v55, %v1305_v53  ;;  %v5671_v55 = vld [vmem:[#allocation20_spill] sm:$0xff] }
 0x2a7   : > { %v4833_v11 = vsub.f32 %v4544_v7, %v3456_v29  ;;  %v1134_v4 = vpop.f32.mrb[49].mxu1 }
 0x2a8   : > { %v4836_v40 = vsub.f32 %v4546_v9, %v1134_v4  ;;  %v3457_v41 = vpop.f32.mrb[50].mxu1  ;;  %3530 = vmatprep.mubr.bf16.mxu0 %v1347_v59  ;;  %v5673_v4 = vld [vmem:[#allocation21_spill] sm:$0xff] }
 0x2a9   : > { %5665 = vst [vmem:[#allocation38_spill] sm:$0xff] %v4833_v11  ;;  %v4839_v23 = vsub.f32 %v5667_v32, %v3457_v41  ;;  %v1137_v42 = vpop.f32.mrb[51].mxu1  ;;  %3531 = vmatmul.mubr.bf16.gmra.mrb[108].mxu0 %v1348_v1  ;;  %v1311_v17 = vmul.f32 %v4833_v11, %v4833_v11  ;;  %v5675_v32 = vld [vmem:[#allocation22_spill] sm:$0xff] }
 0x2aa   : > { %5666 = vst [vmem:[#allocation39_spill] sm:$0xff] %v4836_v40  ;;  %v4842_v47 = vsub.f32 %v5669_v8, %v1137_v42  ;;  %v1309_v7 = vmul.f32 %v4836_v40, %v4836_v40 }
 0x2ab   : > { %5668 = vst [vmem:[#allocation18_spill] sm:$0xff] %v4839_v23  ;;  %v1312_v35 = vmul.f32 %v4839_v23, %v4839_v23 }
 0x2ac   : > { %5670 = vst [vmem:[#allocation19_spill] sm:$0xff] %v4842_v47  ;;  %v1310_v9 = vmul.f32 %v4842_v47, %v4842_v47  ;;  %v5677_v47 = vld [vmem:[#allocation23_spill] sm:$0xff] }
 0x2ad   : > { %v1350_v59 = vpack.c.bf16 %v1312_v35, %v1311_v17  ;;  %v3765_v17 = vld [vmem:[#allocation7 + $0x38] sm:$0xff]  }
 0x2ae   : > { %v3460_v61 = vpop.f32.mrb[52].mxu1  ;;  %v1349_v53 = vpack.c.bf16 %v1310_v9, %v1309_v7  ;;  %3564 = vmatprep.subr.bf16.mxu0 %v3765_v17  ;;  %3637 = vmatprep.subr.bf16.mxu1 %v3765_v17 }
 0x2af   : > { %v4853_v38 = vsub.f32 %v5671_v55, %v3460_v61  ;;  %v1150_v29 = vpop.f32.mrb[53].mxu1  ;;  %3565 = vmatpush3.bf16.msra.mxu0 %v3765_v17  ;;  %3645 = vmatpush3.bf16.msra.mxu1 %v3765_v17 }
 0x2b0   : > { %v4856_v1 = vsub.f32 %v5673_v4, %v1150_v29  ;;  %v3461_v41 = vpop.f32.mrb[54].mxu1  ;;  %3534 = vmatprep.mubr.bf16.mxu0 %v1349_v53  ;;  %v5679_v29 = vld [vmem:[#allocation24_spill] sm:$0xff] }
 0x2b1   : > { %5672 = vst [vmem:[#allocation20_spill] sm:$0xff] %v4853_v38  ;;  %v4859_v42 = vsub.f32 %v5675_v32, %v3461_v41  ;;  %v1153_v8 = vpop.f32.mrb[55].mxu1  ;;  %3535 = vmatmul.mubr.bf16.gmra.mrb[112].mxu0 %v1350_v59  ;;  %v1315_v61 = vmul.f32 %v4853_v38, %v4853_v38  ;;  %v5681_v41 = vld [vmem:[#allocation25_spill] sm:$0xff] }
 0x2b2   : > { %5674 = vst [vmem:[#allocation21_spill] sm:$0xff] %v4856_v1  ;;  %v4862_v40 = vsub.f32 %v5677_v47, %v1153_v8  ;;  %v1313_v9 = vmul.f32 %v4856_v1, %v4856_v1 }
 0x2b3   : > { %5676 = vst [vmem:[#allocation22_spill] sm:$0xff] %v4859_v42  ;;  %v1316_v7 = vmul.f32 %v4859_v42, %v4859_v42 }
 0x2b4   : > { %5678 = vst [vmem:[#allocation23_spill] sm:$0xff] %v4862_v40  ;;  %v1314_v35 = vmul.f32 %v4862_v40, %v4862_v40  ;;  %v5683_v40 = vld [vmem:[#allocation26_spill] sm:$0xff] }
 0x2b5   : > { %v1352_v4 = vpack.c.bf16 %v1316_v7, %v1315_v61 }
 0x2b6   : > { %v3464_v53 = vpop.f32.mrb[56].mxu1  ;;  %v1351_v55 = vpack.c.bf16 %v1314_v35, %v1313_v9  ;;  %v5685_v9 = vld [vmem:[#allocation27_spill] sm:$0xff] }
 0x2b7   : > { %v4873_v47 = vsub.f32 %v5679_v29, %v3464_v53  ;;  %v1166_v59 = vpop.f32.mrb[57].mxu1  ;;  %v5687_v29 = vld [vmem:[#allocation28_spill] sm:$0xff] }
 0x2b8   : > { %v4876_v32 = vsub.f32 %v5681_v41, %v1166_v59  ;;  %v3465_v8 = vpop.f32.mrb[58].mxu1  ;;  %3538 = vmatprep.mubr.bf16.mxu0 %v1351_v55  ;;  %v5689_v41 = vld [vmem:[#allocation29_spill] sm:$0xff] }
 0x2b9   : > { %5680 = vst [vmem:[#allocation24_spill] sm:$0xff] %v4873_v47  ;;  %v4879_v1 = vsub.f32 %v5683_v40, %v3465_v8  ;;  %v1169_v42 = vpop.f32.mrb[59].mxu1  ;;  %3539 = vmatmul.mubr.bf16.gmra.mrb[116].mxu0 %v1352_v4  ;;  %v1319_v61 = vmul.f32 %v4873_v47, %v4873_v47 }
 0x2ba   : > { %5682 = vst [vmem:[#allocation25_spill] sm:$0xff] %v4876_v32  ;;  %v4882_v35 = vsub.f32 %v5685_v9, %v1169_v42  ;;  %v1317_v7 = vmul.f32 %v4876_v32, %v4876_v32 }
 0x2bb   : > { %5684 = vst [vmem:[#allocation26_spill] sm:$0xff] %v4879_v1  ;;  %v1320_v53 = vmul.f32 %v4879_v1, %v4879_v1  ;;  %v5691_v1 = vld [vmem:[#allocation30_spill] sm:$0xff] }
 0x2bc   : > { %5686 = vst [vmem:[#allocation27_spill] sm:$0xff] %v4882_v35  ;;  %v1318_v17 = vmul.f32 %v4882_v35, %v4882_v35  ;;  %v5693_v35 = vld [vmem:[#allocation31_spill] sm:$0xff] }
 0x2bd   : > { %v1354_v42 = vpack.c.bf16 %v1320_v53, %v1319_v61 }
 0x2be   : > { %v3468_v55 = vpop.f32.mrb[60].mxu1  ;;  %v1353_v40 = vpack.c.bf16 %v1318_v17, %v1317_v7 }
 0x2bf   : > { %v4893_v59 = vsub.f32 %v5687_v29, %v3468_v55  ;;  %v1182_v4 = vpop.f32.mrb[61].mxu1 }
 0x2c0   : > { %v4896_v8 = vsub.f32 %v5689_v41, %v1182_v4  ;;  %v3469_v9 = vpop.f32.mrb[62].mxu1  ;;  %3542 = vmatprep.mubr.bf16.mxu0 %v1353_v40 }
 0x2c1   : > { %5688 = vst [vmem:[#allocation28_spill] sm:$0xff] %v4893_v59  ;;  %v4899_v32 = vsub.f32 %v5691_v1, %v3469_v9  ;;  %v1185_v38 = vpop.f32.mrb[63].mxu1  ;;  %3543 = vmatmul.mubr.bf16.gmra.mrb[120].mxu0 %v1354_v42  ;;  %v1323_v61 = vmul.f32 %v4893_v59, %v4893_v59 }
 0x2c2   : > { %5690 = vst [vmem:[#allocation29_spill] sm:$0xff] %v4896_v8  ;;  %v4902_v23 = vsub.f32 %v5693_v35, %v1185_v38  ;;  %v1321_v17 = vmul.f32 %v4896_v8, %v4896_v8 }
 0x2c3   : > { %5692 = vst [vmem:[#allocation30_spill] sm:$0xff] %v4899_v32  ;;  %v1324_v7 = vmul.f32 %v4899_v32, %v4899_v32 }
 0x2c4   : > { %5694 = vst [vmem:[#allocation31_spill] sm:$0xff] %v4902_v23  ;;  %v1322_v53 = vmul.f32 %v4902_v23, %v4902_v23 }
 0x2c5   : > { %v1356_v1 = vpack.c.bf16 %v1324_v7, %v1323_v61 }
 0x2c6   : > { %v1355_v55 = vpack.c.bf16 %v1322_v53, %v1321_v17 }
 0x2c8   : > { %3546 = vmatprep.mubr.bf16.mxu0 %v1355_v55 }
 0x2c9   : > { %3547 = vmatmul.mubr.bf16.gmra.mrb[124].mxu0 %v1356_v1 }
 0x324   : > { %v3488_v40 = vpop.f32.mrb[64].mxu0 }
 0x325   : > { %v1400_v29 = vadd.f32 1e-05, %v3488_v40  ;;  %v1391_v38 = vpop.f32.mrb[65].mxu0 }
 0x326   : > { %v1392_v35 = vadd.f32 1e-05, %v1391_v38  ;;  %v3489_v4 = vpop.f32.mrb[66].mxu0 }
 0x327   : > { %3766 = vrsqrt.f32 %v1400_v29  ;;  %v1403_v42 = vadd.f32 1e-05, %v3489_v4  ;;  %v1394_v41 = vpop.f32.mrb[67].mxu0 }
 0x328   : > { %3768 = vrsqrt.f32 %v1392_v35  ;;  %v1395_v9 = vadd.f32 1e-05, %v1394_v41  ;;  %v5695_v35 = vld [vmem:[#allocation33_spill] sm:$0xff] }
 0x329   : > { %3770 = vrsqrt.f32 %v1403_v42 }
 0x32a   : > { %3772 = vrsqrt.f32 %v1395_v9 }
 0x32c   : > { %v3492_v23 = vpop.f32.mrb[68].mxu0 }
 0x32d   : > { %v1416_v8 = vadd.f32 1e-05, %v3492_v23  ;;  %v1407_v32 = vpop.f32.mrb[69].mxu0 }
 0x32e   : > { %v1408_v59 = vadd.f32 1e-05, %v1407_v32  ;;  %v3493_v17 = vpop.f32.mrb[70].mxu0  ;;  %v5696_v32 = vld [vmem:[#allocation32_spill] sm:$0xff] }
 0x32f   : > { %3774 = vrsqrt.f32 %v1416_v8  ;;  %v1419_v7 = vadd.f32 1e-05, %v3493_v17  ;;  %v1410_v53 = vpop.f32.mrb[71].mxu0  ;;  %v5697_v8 = vld [vmem:[#allocation34_spill] sm:$0xff] }
 0x330   : > { %3776 = vrsqrt.f32 %v1408_v59  ;;  %v1411_v61 = vadd.f32 1e-05, %v1410_v53 }
 0x331   : > { %v3767_v55 = vpop.eup %3766  ;;  %3778 = vrsqrt.f32 %v1419_v7 }
 0x332   : > { %v3769_v1 = vpop.eup %3768  ;;  %3780 = vrsqrt.f32 %v1411_v61  ;;  %v1712_v38 = vmul.f32 %v3767_v55, %v4593_v21 }
 0x333   : > { %v3771_v40 = vpop.eup %3770  ;;  %v1710_v9 = vmul.f32 %v3769_v1, %v5696_v32 }
 0x334   : > { %v3773_v29 = vpop.eup %3772  ;;  %v1713_v4 = vmul.f32 %v3771_v40, %v5695_v35  ;;  %v3496_v42 = vpop.f32.mrb[72].mxu0 }
 0x335   : > { %v1432_v23 = vadd.f32 1e-05, %v3496_v42  ;;  %v1423_v41 = vpop.f32.mrb[73].mxu0  ;;  %v1711_v17 = vmul.f32 %v3773_v29, %v5697_v8 }
 0x336   : > { %v1424_v47 = vadd.f32 1e-05, %v1423_v41  ;;  %v3497_v59 = vpop.f32.mrb[74].mxu0  ;;  %v1775_v53 = vpack.c.bf16 %v1713_v4, %v1712_v38 }
 0x337   : > { %3782 = vrsqrt.f32 %v1432_v23  ;;  %v1435_v7 = vadd.f32 1e-05, %v3497_v59  ;;  %v1426_v11 = vpop.f32.mrb[75].mxu0  ;;  %v1774_v61 = vpack.c.bf16 %v1711_v17, %v1710_v9  ;;  %v5698_v23 = vld [vmem:[#allocation35_spill] sm:$0xff] }
 0x338   : > { %3784 = vrsqrt.f32 %v1424_v47  ;;  %v1427_v36 = vadd.f32 1e-05, %v1426_v11 }
 0x339   : > { %v3775_v34 = vpop.eup %3774  ;;  %3786 = vrsqrt.f32 %v1435_v7  ;;  %3566 = vmatprep.mubr.bf16.mxu0 %v1774_v61 }
 0x33a   : > { %v3777_v21 = vpop.eup %3776  ;;  %3788 = vrsqrt.f32 %v1427_v36  ;;  %3567 = vmatmul.mubr.bf16.vlgmr.msra.gmra.mrb[128].mxu0 %v1775_v53  ;;  %v1716_v1 = vmul.f32 %v3775_v34, %v4613_v25 }
 0x33b   : > { %v3779_v55 = vpop.eup %3778  ;;  %v1714_v42 = vmul.f32 %v3777_v21, %v4616_v19 }
 0x33c   : > { %v3781_v40 = vpop.eup %3780  ;;  %v1717_v29 = vmul.f32 %v3779_v55, %v4619_v37  ;;  %v3500_v35 = vpop.f32.mrb[76].mxu0 }
 0x33d   : > { %v1448_v38 = vadd.f32 1e-05, %v3500_v35  ;;  %v1439_v4 = vpop.f32.mrb[77].mxu0  ;;  %v1715_v47 = vmul.f32 %v3781_v40, %v5698_v23 }
 0x33e   : > { %v1440_v11 = vadd.f32 1e-05, %v1439_v4  ;;  %v3501_v41 = vpop.f32.mrb[78].mxu0  ;;  %v1777_v32 = vpack.c.bf16 %v1717_v29, %v1716_v1 }
 0x33f   : > { %3790 = vrsqrt.f32 %v1448_v38  ;;  %v1451_v9 = vadd.f32 1e-05, %v3501_v41  ;;  %v1442_v36 = vpop.f32.mrb[79].mxu0  ;;  %v1776_v8 = vpack.c.bf16 %v1715_v47, %v1714_v42 }
 0x340   : > { %3792 = vrsqrt.f32 %v1440_v11  ;;  %v1443_v17 = vadd.f32 1e-05, %v1442_v36 }
 0x341   : > { %v3783_v59 = vpop.eup %3782  ;;  %3794 = vrsqrt.f32 %v1451_v9  ;;  %3570 = vmatprep.mubr.bf16.mxu1 %v1776_v8 }
 0x342   : > { %v3785_v37 = vpop.eup %3784  ;;  %3796 = vrsqrt.f32 %v1443_v17  ;;  %3571 = vmatmul.mubr.bf16.vlgmr.msra.gmra.mrb[64].mxu1 %v1777_v32  ;;  %v1720_v53 = vmul.f32 %v3783_v59, %v4633_v13 }
 0x343   : > { %v3787_v25 = vpop.eup %3786  ;;  %v1718_v55 = vmul.f32 %v3785_v37, %v4636_v33 }
 0x344   : > { %v3789_v34 = vpop.eup %3788  ;;  %v3504_v19 = vpop.f32.mrb[80].mxu0  ;;  %v1721_v7 = vmul.f32 %v3787_v25, %v4639_v3 }
 0x345   : > { %v1464_v61 = vadd.f32 1e-05, %v3504_v19  ;;  %v1455_v21 = vpop.f32.mrb[81].mxu0  ;;  %v1719_v40 = vmul.f32 %v3789_v34, %v4642_v27 }
 0x346   : > { %v1456_v1 = vadd.f32 1e-05, %v1455_v21  ;;  %v3505_v29 = vpop.f32.mrb[82].mxu0  ;;  %v1779_v35 = vpack.c.bf16 %v1721_v7, %v1720_v53 }
 0x347   : > { %3798 = vrsqrt.f32 %v1464_v61  ;;  %v1467_v38 = vadd.f32 1e-05, %v3505_v29  ;;  %v1458_v4 = vpop.f32.mrb[83].mxu0  ;;  %v1778_v42 = vpack.c.bf16 %v1719_v40, %v1718_v55 }
 0x348   : > { %3800 = vrsqrt.f32 %v1456_v1  ;;  %v1459_v23 = vadd.f32 1e-05, %v1458_v4 }
 0x349   : > { %v3791_v47 = vpop.eup %3790  ;;  %3802 = vrsqrt.f32 %v1467_v38  ;;  %3574 = vmatprep.mubr.bf16.mxu1 %v1778_v42 }
 0x34a   : > { %v3793_v13 = vpop.eup %3792  ;;  %3804 = vrsqrt.f32 %v1459_v23  ;;  %3575 = vmatmul.mubr.bf16.gmra.mrb[68].mxu1 %v1779_v35  ;;  %v1724_v27 = vmul.f32 %v3791_v47, %v4653_v39 }
 0x34b   : > { %v3795_v3 = vpop.eup %3794  ;;  %v1722_v36 = vmul.f32 %v3793_v13, %v4656_v49 }
 0x34c   : > { %v3797_v11 = vpop.eup %3796  ;;  %v3508_v33 = vpop.f32.mrb[84].mxu0  ;;  %v1725_v41 = vmul.f32 %v3795_v3, %v4659_v43 }
 0x34d   : > { %v1480_v32 = vadd.f32 1e-05, %v3508_v33  ;;  %v1471_v9 = vpop.f32.mrb[85].mxu0  ;;  %v1723_v8 = vmul.f32 %v3797_v11, %v4662_v48 }
 0x34e   : > { %v1472_v17 = vadd.f32 1e-05, %v1471_v9  ;;  %v3509_v59 = vpop.f32.mrb[86].mxu0  ;;  %v1781_v37 = vpack.c.bf16 %v1725_v41, %v1724_v27 }
 0x34f   : > { %3806 = vrsqrt.f32 %v1480_v32  ;;  %v1483_v25 = vadd.f32 1e-05, %v3509_v59  ;;  %v1474_v34 = vpop.f32.mrb[87].mxu0  ;;  %v1780_v19 = vpack.c.bf16 %v1723_v8, %v1722_v36 }
 0x350   : > { %3808 = vrsqrt.f32 %v1472_v17  ;;  %v1475_v53 = vadd.f32 1e-05, %v1474_v34 }
 0x351   : > { %v3799_v7 = vpop.eup %3798  ;;  %3810 = vrsqrt.f32 %v1483_v25  ;;  %3578 = vmatprep.mubr.bf16.mxu1 %v1780_v19 }
 0x352   : > { %v3801_v39 = vpop.eup %3800  ;;  %3812 = vrsqrt.f32 %v1475_v53  ;;  %3579 = vmatmul.mubr.bf16.gmra.mrb[72].mxu1 %v1781_v37  ;;  %v1728_v48 = vmul.f32 %v3799_v7, %v4673_v2 }
 0x353   : > { %v3803_v43 = vpop.eup %3802  ;;  %v1726_v1 = vmul.f32 %v3801_v39, %v4676_v58 }
 0x354   : > { %v3805_v61 = vpop.eup %3804  ;;  %v3512_v49 = vpop.f32.mrb[88].mxu0  ;;  %v1729_v21 = vmul.f32 %v3803_v43, %v4679_v60 }
 0x355   : > { %v1496_v55 = vadd.f32 1e-05, %v3512_v49  ;;  %v1487_v40 = vpop.f32.mrb[89].mxu0  ;;  %v1727_v29 = vmul.f32 %v3805_v61, %v4682_v52 }
 0x356   : > { %v1488_v35 = vadd.f32 1e-05, %v1487_v40  ;;  %v3513_v38 = vpop.f32.mrb[90].mxu0  ;;  %v1783_v4 = vpack.c.bf16 %v1729_v21, %v1728_v48 }
 0x357   : > { %3814 = vrsqrt.f32 %v1496_v55  ;;  %v1499_v42 = vadd.f32 1e-05, %v3513_v38  ;;  %v1490_v23 = vpop.f32.mrb[91].mxu0  ;;  %v1782_v47 = vpack.c.bf16 %v1727_v29, %v1726_v1 }
 0x358   : > { %3816 = vrsqrt.f32 %v1488_v35  ;;  %v1491_v13 = vadd.f32 1e-05, %v1490_v23 }
 0x359   : > { %v3807_v3 = vpop.eup %3806  ;;  %3818 = vrsqrt.f32 %v1499_v42  ;;  %3582 = vmatprep.mubr.bf16.mxu1 %v1782_v47 }
 0x35a   : > { %v3809_v2 = vpop.eup %3808  ;;  %3820 = vrsqrt.f32 %v1491_v13  ;;  %3583 = vmatmul.mubr.bf16.gmra.mrb[76].mxu1 %v1783_v4  ;;  %v1732_v52 = vmul.f32 %v3807_v3, %v4693_v62 }
 0x35b   : > { %v3811_v60 = vpop.eup %3810  ;;  %v1730_v32 = vmul.f32 %v3809_v2, %v4696_v50 }
 0x35c   : > { %v3813_v11 = vpop.eup %3812  ;;  %v3516_v58 = vpop.f32.mrb[92].mxu0  ;;  %v1733_v33 = vmul.f32 %v3811_v60, %v4699_v0 }
 0x35d   : > { %v1512_v27 = vadd.f32 1e-05, %v3516_v58  ;;  %v1503_v41 = vpop.f32.mrb[93].mxu0  ;;  %v1731_v9 = vmul.f32 %v3813_v11, %v4702_v57 }
 0x35e   : > { %v1504_v36 = vadd.f32 1e-05, %v1503_v41  ;;  %v3517_v8 = vpop.f32.mrb[94].mxu0  ;;  %v1785_v17 = vpack.c.bf16 %v1733_v33, %v1732_v52 }
 0x35f   : > { %3822 = vrsqrt.f32 %v1512_v27  ;;  %v1515_v59 = vadd.f32 1e-05, %v3517_v8  ;;  %v1506_v37 = vpop.f32.mrb[95].mxu0  ;;  %v1784_v25 = vpack.c.bf16 %v1731_v9, %v1730_v32 }
 0x360   : > { %3824 = vrsqrt.f32 %v1504_v36  ;;  %v1507_v34 = vadd.f32 1e-05, %v1506_v37 }
 0x361   : > { %v3815_v19 = vpop.eup %3814  ;;  %3826 = vrsqrt.f32 %v1515_v59  ;;  %3586 = vmatprep.mubr.bf16.mxu1 %v1784_v25 }
 0x362   : > { %v3817_v62 = vpop.eup %3816  ;;  %3828 = vrsqrt.f32 %v1507_v34  ;;  %3587 = vmatmul.mubr.bf16.gmra.mrb[80].mxu1 %v1785_v17  ;;  %v1736_v57 = vmul.f32 %v3815_v19, %v4713_v44 }
 0x363   : > { %v3819_v0 = vpop.eup %3818  ;;  %v1734_v61 = vmul.f32 %v3817_v62, %v4716_v15 }
 0x364   : > { %v3821_v53 = vpop.eup %3820  ;;  %v3520_v50 = vpop.f32.mrb[96].mxu0  ;;  %v1737_v7 = vmul.f32 %v3819_v0, %v4719_v54 }
 0x365   : > { %v1528_v39 = vadd.f32 1e-05, %v3520_v50  ;;  %v1519_v43 = vpop.f32.mrb[97].mxu0  ;;  %v1735_v49 = vmul.f32 %v3821_v53, %v4722_v46 }
 0x366   : > { %v1520_v48 = vadd.f32 1e-05, %v1519_v43  ;;  %v3521_v21 = vpop.f32.mrb[98].mxu0  ;;  %v1787_v55 = vpack.c.bf16 %v1737_v7, %v1736_v57 }
 0x367   : > { %3830 = vrsqrt.f32 %v1528_v39  ;;  %v1531_v40 = vadd.f32 1e-05, %v3521_v21  ;;  %v1522_v1 = vpop.f32.mrb[99].mxu0  ;;  %v1786_v29 = vpack.c.bf16 %v1735_v49, %v1734_v61 }
 0x368   : > { %3832 = vrsqrt.f32 %v1520_v48  ;;  %v1523_v35 = vadd.f32 1e-05, %v1522_v1 }
 0x369   : > { %v3823_v38 = vpop.eup %3822  ;;  %3834 = vrsqrt.f32 %v1531_v40  ;;  %3590 = vmatprep.mubr.bf16.mxu1 %v1786_v29 }
 0x36a   : > { %v3825_v44 = vpop.eup %3824  ;;  %3836 = vrsqrt.f32 %v1523_v35  ;;  %3591 = vmatmul.mubr.bf16.gmra.mrb[84].mxu1 %v1787_v55  ;;  %v1740_v46 = vmul.f32 %v3823_v38, %v4733_v56 }
 0x36b   : > { %v3827_v54 = vpop.eup %3826  ;;  %v1738_v13 = vmul.f32 %v3825_v44, %v4736_v10 }
 0x36c   : > { %v3829_v4 = vpop.eup %3828  ;;  %v3524_v15 = vpop.f32.mrb[100].mxu0  ;;  %v1741_v42 = vmul.f32 %v3827_v54, %v4739_v51 }
 0x36d   : > { %v1544_v23 = vadd.f32 1e-05, %v3524_v15  ;;  %v1535_v47 = vpop.f32.mrb[101].mxu0  ;;  %v1739_v3 = vmul.f32 %v3829_v4, %v4742_v12 }
 0x36e   : > { %v1536_v2 = vadd.f32 1e-05, %v1535_v47  ;;  %v3525_v60 = vpop.f32.mrb[102].mxu0  ;;  %v1789_v11 = vpack.c.bf16 %v1741_v42, %v1740_v46 }
 0x36f   : > { %3838 = vrsqrt.f32 %v1544_v23  ;;  %v1547_v58 = vadd.f32 1e-05, %v3525_v60  ;;  %v1538_v52 = vpop.f32.mrb[103].mxu0  ;;  %v1788_v33 = vpack.c.bf16 %v1739_v3, %v1738_v13 }
 0x370   : > { %3840 = vrsqrt.f32 %v1536_v2  ;;  %v1539_v27 = vadd.f32 1e-05, %v1538_v52 }
 0x371   : > { %v3831_v41 = vpop.eup %3830  ;;  %3842 = vrsqrt.f32 %v1547_v58  ;;  %3594 = vmatprep.mubr.bf16.mxu1 %v1788_v33 }
 0x372   : > { %v3833_v56 = vpop.eup %3832  ;;  %3844 = vrsqrt.f32 %v1539_v27  ;;  %3595 = vmatmul.mubr.bf16.gmra.mrb[88].mxu1 %v1789_v11  ;;  %v1744_v12 = vmul.f32 %v3831_v41, %v4753_v6 }
 0x373   : > { %v3835_v51 = vpop.eup %3834  ;;  %v1742_v17 = vmul.f32 %v3833_v56, %v4756_v16  ;;  %v5699_v56 = vld [vmem:[#allocation36_spill] sm:$0xff] }
 0x374   : > { %v3837_v32 = vpop.eup %3836  ;;  %v3528_v10 = vpop.f32.mrb[104].mxu0  ;;  %v1745_v9 = vmul.f32 %v3835_v51, %v4759_v63 }
 0x375   : > { %v1560_v36 = vadd.f32 1e-05, %v3528_v10  ;;  %v1551_v8 = vpop.f32.mrb[105].mxu0  ;;  %v1743_v59 = vmul.f32 %v3837_v32, %v4762_v18  ;;  %v5700_v32 = vld [vmem:[#allocation37_spill] sm:$0xff] }
 0x376   : > { %v1552_v37 = vadd.f32 1e-05, %v1551_v8  ;;  %v3529_v25 = vpop.f32.mrb[106].mxu0  ;;  %v1791_v34 = vpack.c.bf16 %v1745_v9, %v1744_v12 }
 0x377   : > { %3846 = vrsqrt.f32 %v1560_v36  ;;  %v1563_v19 = vadd.f32 1e-05, %v3529_v25  ;;  %v1554_v62 = vpop.f32.mrb[107].mxu0  ;;  %v1790_v0 = vpack.c.bf16 %v1743_v59, %v1742_v17 }
 0x378   : > { %3848 = vrsqrt.f32 %v1552_v37  ;;  %v1555_v53 = vadd.f32 1e-05, %v1554_v62  ;;  %v5701_v62 = vld [vmem:[#allocation38_spill] sm:$0xff] }
 0x379   : > { %v3839_v50 = vpop.eup %3838  ;;  %3850 = vrsqrt.f32 %v1563_v19  ;;  %3598 = vmatprep.mubr.bf16.mxu1 %v1790_v0 }
 0x37a   : > { %v3841_v6 = vpop.eup %3840  ;;  %3852 = vrsqrt.f32 %v1555_v53  ;;  %3599 = vmatmul.mubr.bf16.gmra.mrb[92].mxu1 %v1791_v34  ;;  %v1748_v18 = vmul.f32 %v3839_v50, %v4773_v45  ;;  %v5702_v53 = vld [vmem:[#allocation18_spill] sm:$0xff] }
 0x37b   : > { %v3843_v63 = vpop.eup %3842  ;;  %v1746_v61 = vmul.f32 %v3841_v6, %v4776_v22 }
 0x37c   : > { %v3845_v57 = vpop.eup %3844  ;;  %v3532_v16 = vpop.f32.mrb[108].mxu0  ;;  %v1749_v7 = vmul.f32 %v3843_v63, %v4779_v14 }
 0x37d   : > { %v1576_v39 = vadd.f32 1e-05, %v3532_v16  ;;  %v1567_v43 = vpop.f32.mrb[109].mxu0  ;;  %v1747_v49 = vmul.f32 %v3845_v57, %v4782_v24  ;;  %v5703_v57 = vld [vmem:[#allocation39_spill] sm:$0xff] }
 0x37e   : > { %v1568_v48 = vadd.f32 1e-05, %v1567_v43  ;;  %v3533_v21 = vpop.f32.mrb[110].mxu0  ;;  %v1793_v55 = vpack.c.bf16 %v1749_v7, %v1748_v18  ;;  %v5704_v18 = vld [vmem:[#allocation19_spill] sm:$0xff] }
 0x37f   : > { %3854 = vrsqrt.f32 %v1576_v39  ;;  %v1579_v40 = vadd.f32 1e-05, %v3533_v21  ;;  %v1570_v1 = vpop.f32.mrb[111].mxu0  ;;  %v1792_v29 = vpack.c.bf16 %v1747_v49, %v1746_v61 }
 0x380   : > { %3856 = vrsqrt.f32 %v1568_v48  ;;  %v1571_v35 = vadd.f32 1e-05, %v1570_v1 }
 0x381   : > { %v3847_v38 = vpop.eup %3846  ;;  %3858 = vrsqrt.f32 %v1579_v40  ;;  %3602 = vmatprep.mubr.bf16.mxu1 %v1792_v29 }
 0x382   : > { %v3849_v45 = vpop.eup %3848  ;;  %3860 = vrsqrt.f32 %v1571_v35  ;;  %3603 = vmatmul.mubr.bf16.gmra.mrb[96].mxu1 %v1793_v55  ;;  %v1752_v24 = vmul.f32 %v3847_v38, %v4793_v31 }
 0x383   : > { %v3851_v14 = vpop.eup %3850  ;;  %v1750_v46 = vmul.f32 %v3849_v45, %v4796_v28  ;;  %v5705_v45 = vld [vmem:[#allocation20_spill] sm:$0xff] }
 0x384   : > { %v3853_v44 = vpop.eup %3852  ;;  %v3536_v22 = vpop.f32.mrb[112].mxu0  ;;  %v1753_v54 = vmul.f32 %v3851_v14, %v4799_v20 }
 0x385   : > { %v1592_v4 = vadd.f32 1e-05, %v3536_v22  ;;  %v1583_v15 = vpop.f32.mrb[113].mxu0  ;;  %v1751_v42 = vmul.f32 %v3853_v44, %v4802_v30  ;;  %v5706_v44 = vld [vmem:[#allocation22_spill] sm:$0xff] }
 0x386   : > { %v1584_v23 = vadd.f32 1e-05, %v1583_v15  ;;  %v3537_v47 = vpop.f32.mrb[114].mxu0  ;;  %v1795_v13 = vpack.c.bf16 %v1753_v54, %v1752_v24 }
 0x387   : > { %3862 = vrsqrt.f32 %v1592_v4  ;;  %v1595_v3 = vadd.f32 1e-05, %v3537_v47  ;;  %v1586_v2 = vpop.f32.mrb[115].mxu0  ;;  %v1794_v60 = vpack.c.bf16 %v1751_v42, %v1750_v46  ;;  %v5707_v4 = vld [vmem:[#allocation21_spill] sm:$0xff]  ;;  %v5708_v46 = vld [vmem:[#allocation23_spill] sm:$0xff] }
 0x388   : > { %3864 = vrsqrt.f32 %v1584_v23  ;;  %v1587_v11 = vadd.f32 1e-05, %v1586_v2 }
 0x389   : > { %v3855_v58 = vpop.eup %3854  ;;  %3866 = vrsqrt.f32 %v1595_v3  ;;  %3606 = vmatprep.mubr.bf16.mxu1 %v1794_v60 }
 0x38a   : > { %v3857_v31 = vpop.eup %3856  ;;  %3868 = vrsqrt.f32 %v1587_v11  ;;  %3607 = vmatmul.mubr.bf16.gmra.mrb[100].mxu1 %v1795_v13  ;;  %v1756_v30 = vmul.f32 %v3855_v58, %v4813_v5 }
 0x38b   : > { %v3859_v20 = vpop.eup %3858  ;;  %v1754_v51 = vmul.f32 %v3857_v31, %v5699_v56 }
 0x38c   : > { %v3861_v52 = vpop.eup %3860  ;;  %v3540_v28 = vpop.f32.mrb[116].mxu0  ;;  %v1757_v33 = vmul.f32 %v3859_v20, %v4819_v26 }
 0x38d   : > { %v1608_v27 = vadd.f32 1e-05, %v3540_v28  ;;  %v1599_v41 = vpop.f32.mrb[117].mxu0  ;;  %v1755_v10 = vmul.f32 %v3861_v52, %v5700_v32  ;;  %v5709_v28 = vld [vmem:[#allocation24_spill] sm:$0xff] }
 0x38e   : > { %v1600_v12 = vadd.f32 1e-05, %v1599_v41  ;;  %v3541_v9 = vpop.f32.mrb[118].mxu0  ;;  %v1797_v36 = vpack.c.bf16 %v1757_v33, %v1756_v30  ;;  %v5710_v33 = vld [vmem:[#allocation26_spill] sm:$0xff]  ;;  %v5711_v41 = vld [vmem:[#allocation25_spill] sm:$0xff] }
 0x38f   : > { %3870 = vrsqrt.f32 %v1608_v27  ;;  %v1611_v8 = vadd.f32 1e-05, %v3541_v9  ;;  %v1602_v17 = vpop.f32.mrb[119].mxu0  ;;  %v1796_v59 = vpack.c.bf16 %v1755_v10, %v1754_v51  ;;  %v5712_v51 = vld [vmem:[#allocation27_spill] sm:$0xff] }
 0x390   : > { %3872 = vrsqrt.f32 %v1600_v12  ;;  %v1603_v37 = vadd.f32 1e-05, %v1602_v17 }
 0x391   : > { %v3863_v25 = vpop.eup %3862  ;;  %3874 = vrsqrt.f32 %v1611_v8  ;;  %3610 = vmatprep.mubr.bf16.mxu1 %v1796_v59  ;;  %v5713_v59 = vld [vmem:[#allocation28_spill] sm:$0xff] }
 0x392   : > { %v3865_v5 = vpop.eup %3864  ;;  %3876 = vrsqrt.f32 %v1603_v37  ;;  %3611 = vmatmul.mubr.bf16.gmra.mrb[104].mxu1 %v1797_v36  ;;  %v1760_v0 = vmul.f32 %v3863_v25, %v5701_v62  ;;  %v5714_v25 = vld [vmem:[#allocation30_spill] sm:$0xff] }
 0x393   : > { %v3867_v26 = vpop.eup %3866  ;;  %v1758_v16 = vmul.f32 %v3865_v5, %v5703_v57 }
 0x394   : > { %v3869_v34 = vpop.eup %3868  ;;  %v3544_v19 = vpop.f32.mrb[120].mxu0  ;;  %v1761_v50 = vmul.f32 %v3867_v26, %v5702_v53  ;;  %v5715_v26 = vld [vmem:[#allocation29_spill] sm:$0xff] }
 0x395   : > { %v1624_v6 = vadd.f32 1e-05, %v3544_v19  ;;  %v1615_v63 = vpop.f32.mrb[121].mxu0  ;;  %v1759_v7 = vmul.f32 %v3869_v34, %v5704_v18  ;;  %v5716_v19 = vld [vmem:[#allocation31_spill] sm:$0xff] }
 0x396   : > { %v1616_v39 = vadd.f32 1e-05, %v1615_v63  ;;  %v3545_v43 = vpop.f32.mrb[122].mxu0  ;;  %v1799_v61 = vpack.c.bf16 %v1761_v50, %v1760_v0  ;;  %v4976_v50 = vld [vmem:[#allocation8] ss:$0 sm:$0xff] }
 0x397   : > { %3878 = vrsqrt.f32 %v1624_v6  ;;  %v1627_v49 = vadd.f32 1e-05, %v3545_v43  ;;  %v1618_v48 = vpop.f32.mrb[123].mxu0  ;;  %v1798_v21 = vpack.c.bf16 %v1759_v7, %v1758_v16 }
 0x398   : > { %3880 = vrsqrt.f32 %v1616_v39  ;;  %v1619_v55 = vadd.f32 1e-05, %v1618_v48 }
 0x399   : > { %v3871_v40 = vpop.eup %3870  ;;  %3882 = vrsqrt.f32 %v1627_v49  ;;  %3614 = vmatprep.mubr.bf16.mxu1 %v1798_v21 }
 0x39a   : > { %v3873_v1 = vpop.eup %3872  ;;  %3884 = vrsqrt.f32 %v1619_v55  ;;  %3615 = vmatmul.mubr.bf16.gmra.mrb[108].mxu1 %v1799_v61  ;;  %v1764_v14 = vmul.f32 %v3871_v40, %v5705_v45 }
 0x39b   : > { %v3875_v29 = vpop.eup %3874  ;;  %v1762_v15 = vmul.f32 %v3873_v1, %v5707_v4 }
 0x39c   : > { %v3877_v35 = vpop.eup %3876  ;;  %v3548_v38 = vpop.f32.mrb[124].mxu0  ;;  %v1765_v22 = vmul.f32 %v3875_v29, %v5706_v44 }
 0x39d   : > { %v1640_v24 = vadd.f32 1e-05, %v3548_v38  ;;  %v1631_v54 = vpop.f32.mrb[125].mxu0  ;;  %v1763_v42 = vmul.f32 %v3877_v35, %v5708_v46 }
 0x39e   : > { %v1632_v23 = vadd.f32 1e-05, %v1631_v54  ;;  %v3549_v47 = vpop.f32.mrb[126].mxu0  ;;  %v1801_v13 = vpack.c.bf16 %v1765_v22, %v1764_v14 }
 0x39f   : > { %3886 = vrsqrt.f32 %v1640_v24  ;;  %v1643_v3 = vadd.f32 1e-05, %v3549_v47  ;;  %v1634_v2 = vpop.f32.mrb[127].mxu0  ;;  %v1800_v60 = vpack.c.bf16 %v1763_v42, %v1762_v15 }
 0x3a0   : > { %3888 = vrsqrt.f32 %v1632_v23  ;;  %v1635_v11 = vadd.f32 1e-05, %v1634_v2 }
 0x3a1   : > { %v3879_v58 = vpop.eup %3878  ;;  %3890 = vrsqrt.f32 %v1643_v3  ;;  %3618 = vmatprep.mubr.bf16.mxu1 %v1800_v60 }
 0x3a2   : > { %v3881_v31 = vpop.eup %3880  ;;  %3892 = vrsqrt.f32 %v1635_v11  ;;  %3619 = vmatmul.mubr.bf16.gmra.mrb[112].mxu1 %v1801_v13  ;;  %v1768_v30 = vmul.f32 %v3879_v58, %v5709_v28 }
 0x3a3   : > { %v3883_v20 = vpop.eup %3882  ;;  %v1766_v56 = vmul.f32 %v3881_v31, %v5711_v41 }
 0x3a4   : > { %v3885_v52 = vpop.eup %3884  ;;  %v1769_v27 = vmul.f32 %v3883_v20, %v5710_v33 }
 0x3a5   : > { %v1767_v32 = vmul.f32 %v3885_v52, %v5712_v51 }
 0x3a6   : > { %v1803_v10 = vpack.c.bf16 %v1769_v27, %v1768_v30 }
 0x3a7   : > { %v1802_v12 = vpack.c.bf16 %v1767_v32, %v1766_v56 }
 0x3a9   : > { %v3887_v9 = vpop.eup %3886  ;;  %3622 = vmatprep.mubr.bf16.mxu1 %v1802_v12 }
 0x3aa   : > { %v3889_v36 = vpop.eup %3888  ;;  %3623 = vmatmul.mubr.bf16.gmra.mrb[116].mxu1 %v1803_v10  ;;  %v1772_v37 = vmul.f32 %v3887_v9, %v5713_v59 }
 0x3ab   : > { %v3891_v8 = vpop.eup %3890  ;;  %v1770_v34 = vmul.f32 %v3889_v36, %v5715_v26 }
 0x3ac   : > { %v3893_v17 = vpop.eup %3892  ;;  %v1773_v5 = vmul.f32 %v3891_v8, %v5714_v25 }
 0x3ad   : > { %v1771_v62 = vmul.f32 %v3893_v17, %v5716_v19 }
 0x3ae   : > { %v1805_v0 = vpack.c.bf16 %v1773_v5, %v1772_v37 }
 0x3af   : > { %v1804_v53 = vpack.c.bf16 %v1771_v62, %v1770_v34 }
 0x3b1   : > { %3626 = vmatprep.mubr.bf16.mxu1 %v1804_v53 }
 0x3b2   : > { %3627 = vmatmul.mubr.bf16.gmra.mrb[120].mxu1 %v1805_v0 }
 0x40d   : > { %v3568_v6 = vpop.f32.mrb[128].mxu0 }
 0x40e   : > { %v1920_v63 = vadd.f32 %v3568_v6, %v4976_v50  ;;  %v1911_v57 = vpop.f32.mrb[129].mxu0 }
 0x40f   : > { %v1912_v16 = vadd.f32 %v4976_v50, %v1911_v57  ;;  %v3569_v18 = vpop.f32.mrb[130].mxu0 }
 0x410   : > { %2168 = vst.msk [vmem:[%s4301_s17 + $0x10] sm:$0xff] %vm426_vm0, %v1920_v63  ;;  %v1923_v7 = vadd.f32 %v3569_v18, %v4976_v50  ;;  %2298 = vrot.lane.b32.xlu1 %v1920_v63, %s4080_s18  ;;  %v1914_v39 = vpop.f32.mrb[131].mxu0 }
 0x411   : > { %2166 = vst.msk [vmem:[%s4301_s17] sm:$0xff] %vm426_vm0, %v1912_v16  ;;  %v1915_v43 = vadd.f32 %v4976_v50, %v1914_v39  ;;  %2294 = vrot.lane.b32.xlu0 %v1912_v16, %s4080_s18 }
 0x412   : > { %2169 = vst.msk [vmem:[%s4301_s17 + $0x18] sm:$0xff] %vm426_vm0, %v1923_v7 }
 0x413   : > { %2167 = vst.msk [vmem:[%s4301_s17 + $0x8] sm:$0xff] %vm426_vm0, %v1915_v43 }
 0x414   : > { %2300 = vrot.lane.b32.xlu1 %v1923_v7, %s4080_s18 }
 0x415   : > { %v3572_v61 = vpop.f32.mrb[64].mxu1  ;;  %2296 = vrot.lane.b32.xlu0 %v1915_v43, %s4080_s18 }
 0x416   : > { %v1936_v49 = vadd.f32 %v3572_v61, %v4976_v50  ;;  %v1927_v48 = vpop.f32.mrb[65].mxu1 }
 0x417   : > { %v1928_v21 = vadd.f32 %v4976_v50, %v1927_v48  ;;  %v3573_v55 = vpop.f32.mrb[66].mxu1 }
 0x418   : > { %2172 = vst.msk [vmem:[%s4301_s17 + $0x30] sm:$0xff] %vm426_vm0, %v1936_v49  ;;  %v1939_v40 = vadd.f32 %v3573_v55, %v4976_v50  ;;  %v1930_v1 = vpop.f32.mrb[67].mxu1 }
 0x419   : > { %2170 = vst.msk [vmem:[%s4301_s17 + $0x20] sm:$0xff] %vm426_vm0, %v1928_v21  ;;  %v1931_v29 = vadd.f32 %v4976_v50, %v1930_v1  ;;  %2306 = vrot.lane.b32.xlu0 %v1936_v49, %s4080_s18 }
 0x41a   : > { %2173 = vst.msk [vmem:[%s4301_s17 + $0x38] sm:$0xff] %vm426_vm0, %v1939_v40  ;;  %2308 = vrot.lane.b32.xlu1 %v1939_v40, %s4080_s18 }
 0x41b   : > { %2171 = vst.msk [vmem:[%s4301_s17 + $0x28] sm:$0xff] %vm426_vm0, %v1931_v29 }
 0x41d   : > { %v3576_v35 = vpop.f32.mrb[68].mxu1  ;;  %2302 = vrot.lane.b32.xlu0 %v1928_v21, %s4080_s18 }
 0x41e   : > { %v1952_v38 = vadd.f32 %v3576_v35, %v4976_v50  ;;  %v1943_v45 = vpop.f32.mrb[69].mxu1  ;;  %2304 = vrot.lane.b32.xlu1 %v1931_v29, %s4080_s18 }
 0x41f   : > { %v1944_v14 = vadd.f32 %v4976_v50, %v1943_v45  ;;  %v3577_v44 = vpop.f32.mrb[70].mxu1 }
 0x420   : > { %2176 = vst.msk [vmem:[%s4301_s17 + $0x50] sm:$0xff] %vm426_vm0, %v1952_v38  ;;  %v1955_v22 = vadd.f32 %v3577_v44, %v4976_v50  ;;  %v1946_v24 = vpop.f32.mrb[71].mxu1 }
 0x421   : > { %2174 = vst.msk [vmem:[%s4301_s17 + $0x40] sm:$0xff] %vm426_vm0, %v1944_v14  ;;  %v1947_v54 = vadd.f32 %v4976_v50, %v1946_v24  ;;  %2314 = vrot.lane.b32.xlu0 %v1952_v38, %s4080_s18 }
 0x422   : > { %2177 = vst.msk [vmem:[%s4301_s17 + $0x58] sm:$0xff] %vm426_vm0, %v1955_v22  ;;  %2316 = vrot.lane.b32.xlu1 %v1955_v22, %s4080_s18 }
 0x423   : > { %2175 = vst.msk [vmem:[%s4301_s17 + $0x48] sm:$0xff] %vm426_vm0, %v1947_v54 }
 0x425   : > { %v3580_v4 = vpop.f32.mrb[72].mxu1  ;;  %2310 = vrot.lane.b32.xlu0 %v1944_v14, %s4080_s18 }
 0x426   : > { %v1968_v15 = vadd.f32 %v3580_v4, %v4976_v50  ;;  %v1959_v46 = vpop.f32.mrb[73].mxu1  ;;  %2312 = vrot.lane.b32.xlu1 %v1947_v54, %s4080_s18 }
 0x427   : > { %v1960_v42 = vadd.f32 %v4976_v50, %v1959_v46  ;;  %v3581_v23 = vpop.f32.mrb[74].mxu1 }
 0x428   : > { %2180 = vst.msk [vmem:[%s4301_s17 + $0x70] sm:$0xff] %vm426_vm0, %v1968_v15  ;;  %v1971_v47 = vadd.f32 %v3581_v23, %v4976_v50  ;;  %v1962_v13 = vpop.f32.mrb[75].mxu1 }
 0x429   : > { %2178 = vst.msk [vmem:[%s4301_s17 + $0x60] sm:$0xff] %vm426_vm0, %v1960_v42  ;;  %v1963_v3 = vadd.f32 %v4976_v50, %v1962_v13  ;;  %2322 = vrot.lane.b32.xlu0 %v1968_v15, %s4080_s18 }
 0x42a   : > { %2181 = vst.msk [vmem:[%s4301_s17 + $0x78] sm:$0xff] %vm426_vm0, %v1971_v47  ;;  %2324 = vrot.lane.b32.xlu1 %v1971_v47, %s4080_s18 }
 0x42b   : > { %2179 = vst.msk [vmem:[%s4301_s17 + $0x68] sm:$0xff] %vm426_vm0, %v1963_v3 }
 0x42d   : > { %v3584_v2 = vpop.f32.mrb[76].mxu1  ;;  %2318 = vrot.lane.b32.xlu0 %v1960_v42, %s4080_s18 }
 0x42e   : > { %v1984_v60 = vadd.f32 %v3584_v2, %v4976_v50  ;;  %v1975_v11 = vpop.f32.mrb[77].mxu1  ;;  %2320 = vrot.lane.b32.xlu1 %v1963_v3, %s4080_s18 }
 0x42f   : > { %v1976_v58 = vadd.f32 %v4976_v50, %v1975_v11  ;;  %v3585_v31 = vpop.f32.mrb[78].mxu1 }
 0x430   : > { %2184 = vst.msk [vmem:[%s4301_s17 + $0x90] sm:$0xff] %vm426_vm0, %v1984_v60  ;;  %v1987_v20 = vadd.f32 %v3585_v31, %v4976_v50  ;;  %v1978_v52 = vpop.f32.mrb[79].mxu1 }
 0x431   : > { %2182 = vst.msk [vmem:[%s4301_s17 + $0x80] sm:$0xff] %vm426_vm0, %v1976_v58  ;;  %v1979_v28 = vadd.f32 %v4976_v50, %v1978_v52  ;;  %2330 = vrot.lane.b32.xlu0 %v1984_v60, %s4080_s18 }
 0x432   : > { %2185 = vst.msk [vmem:[%s4301_s17 + $0x98] sm:$0xff] %vm426_vm0, %v1987_v20  ;;  %2332 = vrot.lane.b32.xlu1 %v1987_v20, %s4080_s18 }
 0x433   : > { %2183 = vst.msk [vmem:[%s4301_s17 + $0x88] sm:$0xff] %vm426_vm0, %v1979_v28 }
 0x435   : > { %v3588_v30 = vpop.f32.mrb[80].mxu1  ;;  %2326 = vrot.lane.b32.xlu0 %v1976_v58, %s4080_s18 }
 0x436   : > { %v2000_v33 = vadd.f32 %v3588_v30, %v4976_v50  ;;  %v1991_v27 = vpop.f32.mrb[81].mxu1  ;;  %2328 = vrot.lane.b32.xlu1 %v1979_v28, %s4080_s18 }
 0x437   : > { %v1992_v41 = vadd.f32 %v4976_v50, %v1991_v27  ;;  %v3589_v56 = vpop.f32.mrb[82].mxu1 }
 0x438   : > { %2188 = vst.msk [vmem:[%s4301_s17 + $0xb0] sm:$0xff] %vm426_vm0, %v2000_v33  ;;  %v2003_v51 = vadd.f32 %v3589_v56, %v4976_v50  ;;  %v1994_v32 = vpop.f32.mrb[83].mxu1 }
 0x439   : > { %2186 = vst.msk [vmem:[%s4301_s17 + $0xa0] sm:$0xff] %vm426_vm0, %v1992_v41  ;;  %v1995_v10 = vadd.f32 %v4976_v50, %v1994_v32  ;;  %2338 = vrot.lane.b32.xlu0 %v2000_v33, %s4080_s18 }
 0x43a   : > { %2189 = vst.msk [vmem:[%s4301_s17 + $0xb8] sm:$0xff] %vm426_vm0, %v2003_v51  ;;  %2340 = vrot.lane.b32.xlu1 %v2003_v51, %s4080_s18 }
 0x43b   : > { %2187 = vst.msk [vmem:[%s4301_s17 + $0xa8] sm:$0xff] %vm426_vm0, %v1995_v10 }
 0x43d   : > { %v3592_v12 = vpop.f32.mrb[84].mxu1  ;;  %2334 = vrot.lane.b32.xlu0 %v1992_v41, %s4080_s18 }
 0x43e   : > { %v2016_v9 = vadd.f32 %v3592_v12, %v4976_v50  ;;  %v2007_v36 = vpop.f32.mrb[85].mxu1  ;;  %2336 = vrot.lane.b32.xlu1 %v1995_v10, %s4080_s18 }
 0x43f   : > { %v2008_v8 = vadd.f32 %v4976_v50, %v2007_v36  ;;  %v3593_v17 = vpop.f32.mrb[86].mxu1 }
 0x440   : > { %2192 = vst.msk [vmem:[%s4301_s17 + $0xd0] sm:$0xff] %vm426_vm0, %v2016_v9  ;;  %v2019_v59 = vadd.f32 %v3593_v17, %v4976_v50  ;;  %v2010_v37 = vpop.f32.mrb[87].mxu1 }
 0x441   : > { %2190 = vst.msk [vmem:[%s4301_s17 + $0xc0] sm:$0xff] %vm426_vm0, %v2008_v8  ;;  %v2011_v25 = vadd.f32 %v4976_v50, %v2010_v37  ;;  %2346 = vrot.lane.b32.xlu0 %v2016_v9, %s4080_s18 }
 0x442   : > { %2193 = vst.msk [vmem:[%s4301_s17 + $0xd8] sm:$0xff] %vm426_vm0, %v2019_v59  ;;  %2348 = vrot.lane.b32.xlu1 %v2019_v59, %s4080_s18 }
 0x443   : > { %2191 = vst.msk [vmem:[%s4301_s17 + $0xc8] sm:$0xff] %vm426_vm0, %v2011_v25 }
 0x445   : > { %v3596_v5 = vpop.f32.mrb[88].mxu1  ;;  %2342 = vrot.lane.b32.xlu0 %v2008_v8, %s4080_s18 }
 0x446   : > { %v2032_v26 = vadd.f32 %v3596_v5, %v4976_v50  ;;  %v2023_v34 = vpop.f32.mrb[89].mxu1  ;;  %2344 = vrot.lane.b32.xlu1 %v2011_v25, %s4080_s18 }
 0x447   : > { %v2024_v19 = vadd.f32 %v4976_v50, %v2023_v34  ;;  %v3597_v62 = vpop.f32.mrb[90].mxu1 }
 0x448   : > { %2196 = vst.msk [vmem:[%s4301_s17 + $0xf0] sm:$0xff] %vm426_vm0, %v2032_v26  ;;  %v2035_v0 = vadd.f32 %v3597_v62, %v4976_v50  ;;  %v2026_v53 = vpop.f32.mrb[91].mxu1 }
 0x449   : > { %2194 = vst.msk [vmem:[%s4301_s17 + $0xe0] sm:$0xff] %vm426_vm0, %v2024_v19  ;;  %v2027_v6 = vadd.f32 %v4976_v50, %v2026_v53  ;;  %2354 = vrot.lane.b32.xlu0 %v2032_v26, %s4080_s18 }
 0x44a   : > { %2197 = vst.msk [vmem:[%s4301_s17 + $0xf8] sm:$0xff] %vm426_vm0, %v2035_v0  ;;  %2356 = vrot.lane.b32.xlu1 %v2035_v0, %s4080_s18 }
 0x44b   : > { %2195 = vst.msk [vmem:[%s4301_s17 + $0xe8] sm:$0xff] %vm426_vm0, %v2027_v6 }
 0x44d   : > { %v3600_v63 = vpop.f32.mrb[92].mxu1  ;;  %2350 = vrot.lane.b32.xlu0 %v2024_v19, %s4080_s18 }
 0x44e   : > { %v2048_v57 = vadd.f32 %v3600_v63, %v4976_v50  ;;  %v2039_v16 = vpop.f32.mrb[93].mxu1  ;;  %2352 = vrot.lane.b32.xlu1 %v2027_v6, %s4080_s18 }
 0x44f   : > { %v2040_v18 = vadd.f32 %v4976_v50, %v2039_v16  ;;  %v3601_v7 = vpop.f32.mrb[94].mxu1 }
 0x450   : > { %2200 = vst.msk [vmem:[%s4301_s17 + $0x110] sm:$0xff] %vm426_vm0, %v2048_v57  ;;  %v2051_v39 = vadd.f32 %v3601_v7, %v4976_v50  ;;  %v2042_v43 = vpop.f32.mrb[95].mxu1 }
 0x451   : > { %2198 = vst.msk [vmem:[%s4301_s17 + $0x100] sm:$0xff] %vm426_vm0, %v2040_v18  ;;  %v2043_v61 = vadd.f32 %v4976_v50, %v2042_v43  ;;  %2362 = vrot.lane.b32.xlu0 %v2048_v57, %s4080_s18 }
 0x452   : > { %2201 = vst.msk [vmem:[%s4301_s17 + $0x118] sm:$0xff] %vm426_vm0, %v2051_v39  ;;  %2364 = vrot.lane.b32.xlu1 %v2051_v39, %s4080_s18 }
 0x453   : > { %2199 = vst.msk [vmem:[%s4301_s17 + $0x108] sm:$0xff] %vm426_vm0, %v2043_v61 }
 0x455   : > { %v3604_v49 = vpop.f32.mrb[96].mxu1  ;;  %2358 = vrot.lane.b32.xlu0 %v2040_v18, %s4080_s18 }
 0x456   : > { %v2064_v48 = vadd.f32 %v3604_v49, %v4976_v50  ;;  %v2055_v21 = vpop.f32.mrb[97].mxu1  ;;  %2360 = vrot.lane.b32.xlu1 %v2043_v61, %s4080_s18 }
 0x457   : > { %v2056_v55 = vadd.f32 %v4976_v50, %v2055_v21  ;;  %v3605_v40 = vpop.f32.mrb[98].mxu1 }
 0x458   : > { %2204 = vst.msk [vmem:[%s4301_s17 + $0x130] sm:$0xff] %vm426_vm0, %v2064_v48  ;;  %v2067_v1 = vadd.f32 %v3605_v40, %v4976_v50  ;;  %v2058_v29 = vpop.f32.mrb[99].mxu1 }
 0x459   : > { %2202 = vst.msk [vmem:[%s4301_s17 + $0x120] sm:$0xff] %vm426_vm0, %v2056_v55  ;;  %v2059_v35 = vadd.f32 %v4976_v50, %v2058_v29  ;;  %2370 = vrot.lane.b32.xlu0 %v2064_v48, %s4080_s18 }
 0x45a   : > { %2205 = vst.msk [vmem:[%s4301_s17 + $0x138] sm:$0xff] %vm426_vm0, %v2067_v1  ;;  %2372 = vrot.lane.b32.xlu1 %v2067_v1, %s4080_s18 }
 0x45b   : > { %2203 = vst.msk [vmem:[%s4301_s17 + $0x128] sm:$0xff] %vm426_vm0, %v2059_v35 }
 0x45d   : > { %v3608_v38 = vpop.f32.mrb[100].mxu1  ;;  %2366 = vrot.lane.b32.xlu0 %v2056_v55, %s4080_s18 }
 0x45e   : > { %v2080_v45 = vadd.f32 %v3608_v38, %v4976_v50  ;;  %v2071_v14 = vpop.f32.mrb[101].mxu1  ;;  %2368 = vrot.lane.b32.xlu1 %v2059_v35, %s4080_s18 }
 0x45f   : > { %v2072_v44 = vadd.f32 %v4976_v50, %v2071_v14  ;;  %v3609_v22 = vpop.f32.mrb[102].mxu1 }
 0x460   : > { %2208 = vst.msk [vmem:[%s4301_s17 + $0x150] sm:$0xff] %vm426_vm0, %v2080_v45  ;;  %v2083_v24 = vadd.f32 %v3609_v22, %v4976_v50  ;;  %v2074_v54 = vpop.f32.mrb[103].mxu1 }
 0x461   : > { %2206 = vst.msk [vmem:[%s4301_s17 + $0x140] sm:$0xff] %vm426_vm0, %v2072_v44  ;;  %v2075_v4 = vadd.f32 %v4976_v50, %v2074_v54  ;;  %2378 = vrot.lane.b32.xlu0 %v2080_v45, %s4080_s18 }
 0x462   : > { %2209 = vst.msk [vmem:[%s4301_s17 + $0x158] sm:$0xff] %vm426_vm0, %v2083_v24  ;;  %2380 = vrot.lane.b32.xlu1 %v2083_v24, %s4080_s18 }
 0x463   : > { %2207 = vst.msk [vmem:[%s4301_s17 + $0x148] sm:$0xff] %vm426_vm0, %v2075_v4 }
 0x465   : > { %v3612_v15 = vpop.f32.mrb[104].mxu1  ;;  %2374 = vrot.lane.b32.xlu0 %v2072_v44, %s4080_s18 }
 0x466   : > { %v2096_v46 = vadd.f32 %v3612_v15, %v4976_v50  ;;  %v2087_v42 = vpop.f32.mrb[105].mxu1  ;;  %2376 = vrot.lane.b32.xlu1 %v2075_v4, %s4080_s18 }
 0x467   : > { %v2088_v23 = vadd.f32 %v4976_v50, %v2087_v42  ;;  %v3613_v47 = vpop.f32.mrb[106].mxu1 }
 0x468   : > { %2212 = vst.msk [vmem:[%s4301_s17 + $0x170] sm:$0xff] %vm426_vm0, %v2096_v46  ;;  %v2099_v13 = vadd.f32 %v3613_v47, %v4976_v50  ;;  %v2090_v3 = vpop.f32.mrb[107].mxu1 }
 0x469   : > { %2210 = vst.msk [vmem:[%s4301_s17 + $0x160] sm:$0xff] %vm426_vm0, %v2088_v23  ;;  %v2091_v2 = vadd.f32 %v4976_v50, %v2090_v3  ;;  %2386 = vrot.lane.b32.xlu0 %v2096_v46, %s4080_s18 }
 0x46a   : > { %2213 = vst.msk [vmem:[%s4301_s17 + $0x178] sm:$0xff] %vm426_vm0, %v2099_v13  ;;  %2388 = vrot.lane.b32.xlu1 %v2099_v13, %s4080_s18 }
 0x46b   : > { %2211 = vst.msk [vmem:[%s4301_s17 + $0x168] sm:$0xff] %vm426_vm0, %v2091_v2 }
 0x46d   : > { %v3616_v60 = vpop.f32.mrb[108].mxu1  ;;  %2382 = vrot.lane.b32.xlu0 %v2088_v23, %s4080_s18 }
 0x46e   : > { %v2112_v11 = vadd.f32 %v3616_v60, %v4976_v50  ;;  %v2103_v58 = vpop.f32.mrb[109].mxu1  ;;  %2384 = vrot.lane.b32.xlu1 %v2091_v2, %s4080_s18 }
 0x46f   : > { %v2104_v31 = vadd.f32 %v4976_v50, %v2103_v58  ;;  %v3617_v20 = vpop.f32.mrb[110].mxu1 }
 0x470   : > { %2216 = vst.msk [vmem:[%s4301_s17 + $0x190] sm:$0xff] %vm426_vm0, %v2112_v11  ;;  %v2115_v52 = vadd.f32 %v3617_v20, %v4976_v50  ;;  %v2106_v28 = vpop.f32.mrb[111].mxu1 }
 0x471   : > { %2214 = vst.msk [vmem:[%s4301_s17 + $0x180] sm:$0xff] %vm426_vm0, %v2104_v31  ;;  %v2107_v30 = vadd.f32 %v4976_v50, %v2106_v28  ;;  %2394 = vrot.lane.b32.xlu0 %v2112_v11, %s4080_s18 }
 0x472   : > { %2217 = vst.msk [vmem:[%s4301_s17 + $0x198] sm:$0xff] %vm426_vm0, %v2115_v52  ;;  %2396 = vrot.lane.b32.xlu1 %v2115_v52, %s4080_s18 }
 0x473   : > { %2215 = vst.msk [vmem:[%s4301_s17 + $0x188] sm:$0xff] %vm426_vm0, %v2107_v30 }
 0x475   : > { %v3620_v33 = vpop.f32.mrb[112].mxu1  ;;  %2390 = vrot.lane.b32.xlu0 %v2104_v31, %s4080_s18 }
 0x476   : > { %v2128_v27 = vadd.f32 %v3620_v33, %v4976_v50  ;;  %v2119_v41 = vpop.f32.mrb[113].mxu1  ;;  %2392 = vrot.lane.b32.xlu1 %v2107_v30, %s4080_s18 }
 0x477   : > { %v2120_v56 = vadd.f32 %v4976_v50, %v2119_v41  ;;  %v3621_v51 = vpop.f32.mrb[114].mxu1 }
 0x478   : > { %2220 = vst.msk [vmem:[%s4301_s17 + $0x1b0] sm:$0xff] %vm426_vm0, %v2128_v27  ;;  %v2131_v32 = vadd.f32 %v3621_v51, %v4976_v50  ;;  %v2122_v10 = vpop.f32.mrb[115].mxu1 }
 0x479   : > { %2218 = vst.msk [vmem:[%s4301_s17 + $0x1a0] sm:$0xff] %vm426_vm0, %v2120_v56  ;;  %v2123_v12 = vadd.f32 %v4976_v50, %v2122_v10  ;;  %2402 = vrot.lane.b32.xlu0 %v2128_v27, %s4080_s18 }
 0x47a   : > { %2221 = vst.msk [vmem:[%s4301_s17 + $0x1b8] sm:$0xff] %vm426_vm0, %v2131_v32  ;;  %2404 = vrot.lane.b32.xlu1 %v2131_v32, %s4080_s18 }
 0x47b   : > { %2219 = vst.msk [vmem:[%s4301_s17 + $0x1a8] sm:$0xff] %vm426_vm0, %v2123_v12 }
 0x47d   : > { %v3624_v9 = vpop.f32.mrb[116].mxu1  ;;  %2398 = vrot.lane.b32.xlu0 %v2120_v56, %s4080_s18 }
 0x47e   : > { %v2144_v36 = vadd.f32 %v3624_v9, %v4976_v50  ;;  %v2135_v8 = vpop.f32.mrb[117].mxu1  ;;  %2400 = vrot.lane.b32.xlu1 %v2123_v12, %s4080_s18 }
 0x47f   : > { %v2136_v17 = vadd.f32 %v4976_v50, %v2135_v8  ;;  %v3625_v59 = vpop.f32.mrb[118].mxu1 }
 0x480   : > { %2224 = vst.msk [vmem:[%s4301_s17 + $0x1d0] sm:$0xff] %vm426_vm0, %v2144_v36  ;;  %v2147_v37 = vadd.f32 %v3625_v59, %v4976_v50  ;;  %v2138_v25 = vpop.f32.mrb[119].mxu1 }
 0x481   : > { %2222 = vst.msk [vmem:[%s4301_s17 + $0x1c0] sm:$0xff] %vm426_vm0, %v2136_v17  ;;  %v2139_v5 = vadd.f32 %v4976_v50, %v2138_v25  ;;  %2410 = vrot.lane.b32.xlu0 %v2144_v36, %s4080_s18 }
 0x482   : > { %2225 = vst.msk [vmem:[%s4301_s17 + $0x1d8] sm:$0xff] %vm426_vm0, %v2147_v37  ;;  %v2299_v26 = vpop.permute.xlu1 %2298  ;;  %2412 = vrot.lane.b32.xlu1 %v2147_v37, %s4080_s18 }
 0x483   : > { %2223 = vst.msk [vmem:[%s4301_s17 + $0x1c8] sm:$0xff] %vm426_vm0, %v2139_v5  ;;  %2488 = vst.msk [vmem:[#allocation2 + $0x10] sm:$0xff] %vm426_vm0, %v2299_v26  ;;  %v2295_v34 = vpop.permute.xlu0 %2294 }
 0x484   : > { %2486 = vst.msk [vmem:[#allocation2] sm:$0xff] %vm426_vm0, %v2295_v34 }
 0x485   : > { %2406 = vrot.lane.b32.xlu0 %v2136_v17, %s4080_s18  ;;  %v3628_v19 = vpop.f32.mrb[120].mxu1 }
 0x486   : > { %v2160_v62 = vadd.f32 %v3628_v19, %v4976_v50  ;;  %2408 = vrot.lane.b32.xlu1 %v2139_v5, %s4080_s18  ;;  %v2301_v0 = vpop.permute.xlu1 %2300  ;;  %v2151_v53 = vpop.f32.mrb[121].mxu1 }
 0x487   : > { %2489 = vst.msk [vmem:[#allocation2 + $0x18] sm:$0xff] %vm426_vm0, %v2301_v0  ;;  %v2152_v6 = vadd.f32 %v4976_v50, %v2151_v53  ;;  %v2297_v63 = vpop.permute.xlu0 %2296  ;;  %v3629_v57 = vpop.f32.mrb[122].mxu1 }
 0x488   : > { %2228 = vst.msk [vmem:[%s4301_s17 + $0x1f0] sm:$0xff] %vm426_vm0, %v2160_v62  ;;  %2487 = vst.msk [vmem:[#allocation2 + $0x8] sm:$0xff] %vm426_vm0, %v2297_v63  ;;  %v2163_v16 = vadd.f32 %v3629_v57, %v4976_v50  ;;  %v2154_v18 = vpop.f32.mrb[123].mxu1 }
 0x489   : > { %2226 = vst.msk [vmem:[%s4301_s17 + $0x1e0] sm:$0xff] %vm426_vm0, %v2152_v6  ;;  %v2155_v7 = vadd.f32 %v4976_v50, %v2154_v18  ;;  %2414 = vrot.lane.b32.xlu0 %v2152_v6, %s4080_s18 }
 0x48a   : > { %2229 = vst.msk [vmem:[%s4301_s17 + $0x1f8] sm:$0xff] %vm426_vm0, %v2163_v16 }
 0x48b   : > { %2227 = vst.msk [vmem:[%s4301_s17 + $0x1e8] sm:$0xff] %vm426_vm0, %v2155_v7  ;;  %v2307_v39 = vpop.permute.xlu0 %2306  ;;  %2416 = vrot.lane.b32.xlu1 %v2155_v7, %s4080_s18 }
 0x48c   : > { %2492 = vst.msk [vmem:[#allocation2 + $0x30] sm:$0xff] %vm426_vm0, %v2307_v39  ;;  %v2309_v43 = vpop.permute.xlu1 %2308 }
 0x48d   : > { %2493 = vst.msk [vmem:[#allocation2 + $0x38] sm:$0xff] %vm426_vm0, %v2309_v43  ;;  %2418 = vrot.lane.b32.xlu0 %v2160_v62, %s4080_s18 }
 0x48f   : > { %v2303_v61 = vpop.permute.xlu0 %2302  ;;  %2420 = vrot.lane.b32.xlu1 %v2163_v16, %s4080_s18 }
 0x490   : > { %2490 = vst.msk [vmem:[#allocation2 + $0x20] sm:$0xff] %vm426_vm0, %v2303_v61  ;;  %v2305_v50 = vpop.permute.xlu1 %2304 }
 0x491   : > { %2491 = vst.msk [vmem:[#allocation2 + $0x28] sm:$0xff] %vm426_vm0, %v2305_v50 }
 0x493   : > { %v2315_v49 = vpop.permute.xlu0 %2314 }
 0x494   : > { %2496 = vst.msk [vmem:[#allocation2 + $0x50] sm:$0xff] %vm426_vm0, %v2315_v49  ;;  %v2317_v48 = vpop.permute.xlu1 %2316 }
 0x495   : > { %2497 = vst.msk [vmem:[#allocation2 + $0x58] sm:$0xff] %vm426_vm0, %v2317_v48 }
 0x497   : > { %v2311_v21 = vpop.permute.xlu0 %2310 }
 0x498   : > { %2494 = vst.msk [vmem:[#allocation2 + $0x40] sm:$0xff] %vm426_vm0, %v2311_v21  ;;  %v2313_v55 = vpop.permute.xlu1 %2312 }
 0x499   : > { %2495 = vst.msk [vmem:[#allocation2 + $0x48] sm:$0xff] %vm426_vm0, %v2313_v55 }
 0x49b   : > { %v2323_v40 = vpop.permute.xlu0 %2322 }
 0x49c   : > { %2500 = vst.msk [vmem:[#allocation2 + $0x70] sm:$0xff] %vm426_vm0, %v2323_v40  ;;  %v2325_v1 = vpop.permute.xlu1 %2324 }
 0x49d   : > { %2501 = vst.msk [vmem:[#allocation2 + $0x78] sm:$0xff] %vm426_vm0, %v2325_v1 }
 0x49f   : > { %v2319_v29 = vpop.permute.xlu0 %2318 }
 0x4a0   : > { %2498 = vst.msk [vmem:[#allocation2 + $0x60] sm:$0xff] %vm426_vm0, %v2319_v29  ;;  %v2321_v35 = vpop.permute.xlu1 %2320 }
 0x4a1   : > { %2499 = vst.msk [vmem:[#allocation2 + $0x68] sm:$0xff] %vm426_vm0, %v2321_v35 }
 0x4a3   : > { %v2331_v38 = vpop.permute.xlu0 %2330 }
 0x4a4   : > { %2504 = vst.msk [vmem:[#allocation2 + $0x90] sm:$0xff] %vm426_vm0, %v2331_v38  ;;  %v2333_v45 = vpop.permute.xlu1 %2332 }
 0x4a5   : > { %2505 = vst.msk [vmem:[#allocation2 + $0x98] sm:$0xff] %vm426_vm0, %v2333_v45 }
 0x4a7   : > { %v2327_v14 = vpop.permute.xlu0 %2326 }
 0x4a8   : > { %2502 = vst.msk [vmem:[#allocation2 + $0x80] sm:$0xff] %vm426_vm0, %v2327_v14  ;;  %v2329_v44 = vpop.permute.xlu1 %2328 }
 0x4a9   : > { %2503 = vst.msk [vmem:[#allocation2 + $0x88] sm:$0xff] %vm426_vm0, %v2329_v44 }
 0x4ab   : > { %v2339_v22 = vpop.permute.xlu0 %2338 }
 0x4ac   : > { %2508 = vst.msk [vmem:[#allocation2 + $0xb0] sm:$0xff] %vm426_vm0, %v2339_v22  ;;  %v2341_v24 = vpop.permute.xlu1 %2340 }
 0x4ad   : > { %2509 = vst.msk [vmem:[#allocation2 + $0xb8] sm:$0xff] %vm426_vm0, %v2341_v24 }
 0x4af   : > { %v2335_v54 = vpop.permute.xlu0 %2334 }
 0x4b0   : > { %2506 = vst.msk [vmem:[#allocation2 + $0xa0] sm:$0xff] %vm426_vm0, %v2335_v54  ;;  %v2337_v4 = vpop.permute.xlu1 %2336 }
 0x4b1   : > { %2507 = vst.msk [vmem:[#allocation2 + $0xa8] sm:$0xff] %vm426_vm0, %v2337_v4 }
 0x4b3   : > { %v2347_v15 = vpop.permute.xlu0 %2346 }
 0x4b4   : > { %2512 = vst.msk [vmem:[#allocation2 + $0xd0] sm:$0xff] %vm426_vm0, %v2347_v15  ;;  %v2349_v46 = vpop.permute.xlu1 %2348 }
 0x4b5   : > { %2513 = vst.msk [vmem:[#allocation2 + $0xd8] sm:$0xff] %vm426_vm0, %v2349_v46 }
 0x4b7   : > { %v2343_v42 = vpop.permute.xlu0 %2342 }
 0x4b8   : > { %2510 = vst.msk [vmem:[#allocation2 + $0xc0] sm:$0xff] %vm426_vm0, %v2343_v42  ;;  %v2345_v23 = vpop.permute.xlu1 %2344 }
 0x4b9   : > { %2511 = vst.msk [vmem:[#allocation2 + $0xc8] sm:$0xff] %vm426_vm0, %v2345_v23 }
 0x4bb   : > { %v2355_v47 = vpop.permute.xlu0 %2354 }
 0x4bc   : > { %2516 = vst.msk [vmem:[#allocation2 + $0xf0] sm:$0xff] %vm426_vm0, %v2355_v47  ;;  %v2357_v13 = vpop.permute.xlu1 %2356 }
 0x4bd   : > { %2517 = vst.msk [vmem:[#allocation2 + $0xf8] sm:$0xff] %vm426_vm0, %v2357_v13 }
 0x4bf   : > { %v2351_v3 = vpop.permute.xlu0 %2350 }
 0x4c0   : > { %2514 = vst.msk [vmem:[#allocation2 + $0xe0] sm:$0xff] %vm426_vm0, %v2351_v3  ;;  %v2353_v2 = vpop.permute.xlu1 %2352 }
 0x4c1   : > { %2515 = vst.msk [vmem:[#allocation2 + $0xe8] sm:$0xff] %vm426_vm0, %v2353_v2 }
 0x4c3   : > { %v2363_v60 = vpop.permute.xlu0 %2362 }
 0x4c4   : > { %2520 = vst.msk [vmem:[#allocation2 + $0x110] sm:$0xff] %vm426_vm0, %v2363_v60  ;;  %v2365_v11 = vpop.permute.xlu1 %2364 }
 0x4c5   : > { %2521 = vst.msk [vmem:[#allocation2 + $0x118] sm:$0xff] %vm426_vm0, %v2365_v11 }
 0x4c7   : > { %v2359_v58 = vpop.permute.xlu0 %2358 }
 0x4c8   : > { %2518 = vst.msk [vmem:[#allocation2 + $0x100] sm:$0xff] %vm426_vm0, %v2359_v58  ;;  %v2361_v31 = vpop.permute.xlu1 %2360 }
 0x4c9   : > { %2519 = vst.msk [vmem:[#allocation2 + $0x108] sm:$0xff] %vm426_vm0, %v2361_v31 }
 0x4cb   : > { %v2371_v20 = vpop.permute.xlu0 %2370 }
 0x4cc   : > { %2524 = vst.msk [vmem:[#allocation2 + $0x130] sm:$0xff] %vm426_vm0, %v2371_v20  ;;  %v2373_v52 = vpop.permute.xlu1 %2372 }
 0x4cd   : > { %2525 = vst.msk [vmem:[#allocation2 + $0x138] sm:$0xff] %vm426_vm0, %v2373_v52 }
 0x4cf   : > { %v2367_v28 = vpop.permute.xlu0 %2366 }
 0x4d0   : > { %2522 = vst.msk [vmem:[#allocation2 + $0x120] sm:$0xff] %vm426_vm0, %v2367_v28  ;;  %v2369_v30 = vpop.permute.xlu1 %2368 }
 0x4d1   : > { %2523 = vst.msk [vmem:[#allocation2 + $0x128] sm:$0xff] %vm426_vm0, %v2369_v30 }
 0x4d3   : > { %v2379_v33 = vpop.permute.xlu0 %2378 }
 0x4d4   : > { %2528 = vst.msk [vmem:[#allocation2 + $0x150] sm:$0xff] %vm426_vm0, %v2379_v33  ;;  %v2381_v27 = vpop.permute.xlu1 %2380 }
 0x4d5   : > { %2529 = vst.msk [vmem:[#allocation2 + $0x158] sm:$0xff] %vm426_vm0, %v2381_v27 }
 0x4d7   : > { %v2375_v41 = vpop.permute.xlu0 %2374 }
 0x4d8   : > { %2526 = vst.msk [vmem:[#allocation2 + $0x140] sm:$0xff] %vm426_vm0, %v2375_v41  ;;  %v2377_v56 = vpop.permute.xlu1 %2376 }
 0x4d9   : > { %2527 = vst.msk [vmem:[#allocation2 + $0x148] sm:$0xff] %vm426_vm0, %v2377_v56 }
 0x4db   : > { %v2387_v51 = vpop.permute.xlu0 %2386 }
 0x4dc   : > { %2532 = vst.msk [vmem:[#allocation2 + $0x170] sm:$0xff] %vm426_vm0, %v2387_v51  ;;  %v2389_v32 = vpop.permute.xlu1 %2388 }
 0x4dd   : > { %2533 = vst.msk [vmem:[#allocation2 + $0x178] sm:$0xff] %vm426_vm0, %v2389_v32 }
 0x4df   : > { %v2383_v10 = vpop.permute.xlu0 %2382 }
 0x4e0   : > { %2530 = vst.msk [vmem:[#allocation2 + $0x160] sm:$0xff] %vm426_vm0, %v2383_v10  ;;  %v2385_v12 = vpop.permute.xlu1 %2384 }
 0x4e1   : > { %2531 = vst.msk [vmem:[#allocation2 + $0x168] sm:$0xff] %vm426_vm0, %v2385_v12 }
 0x4e3   : > { %v2395_v9 = vpop.permute.xlu0 %2394 }
 0x4e4   : > { %2536 = vst.msk [vmem:[#allocation2 + $0x190] sm:$0xff] %vm426_vm0, %v2395_v9  ;;  %v2397_v36 = vpop.permute.xlu1 %2396 }
 0x4e5   : > { %2537 = vst.msk [vmem:[#allocation2 + $0x198] sm:$0xff] %vm426_vm0, %v2397_v36 }
 0x4e7   : > { %v2391_v8 = vpop.permute.xlu0 %2390 }
 0x4e8   : > { %2534 = vst.msk [vmem:[#allocation2 + $0x180] sm:$0xff] %vm426_vm0, %v2391_v8  ;;  %v2393_v17 = vpop.permute.xlu1 %2392 }
 0x4e9   : > { %2535 = vst.msk [vmem:[#allocation2 + $0x188] sm:$0xff] %vm426_vm0, %v2393_v17 }
 0x4eb   : > { %v2403_v59 = vpop.permute.xlu0 %2402 }
 0x4ec   : > { %2540 = vst.msk [vmem:[#allocation2 + $0x1b0] sm:$0xff] %vm426_vm0, %v2403_v59  ;;  %v2405_v37 = vpop.permute.xlu1 %2404 }
 0x4ed   : > { %2541 = vst.msk [vmem:[#allocation2 + $0x1b8] sm:$0xff] %vm426_vm0, %v2405_v37 }
 0x4ef   : > { %v2399_v25 = vpop.permute.xlu0 %2398 }
 0x4f0   : > { %2538 = vst.msk [vmem:[#allocation2 + $0x1a0] sm:$0xff] %vm426_vm0, %v2399_v25  ;;  %v2401_v5 = vpop.permute.xlu1 %2400 }
 0x4f1   : > { %2539 = vst.msk [vmem:[#allocation2 + $0x1a8] sm:$0xff] %vm426_vm0, %v2401_v5 }
 0x4f3   : > { %v2411_v26 = vpop.permute.xlu0 %2410 }
 0x4f4   : > { %2544 = vst.msk [vmem:[#allocation2 + $0x1d0] sm:$0xff] %vm426_vm0, %v2411_v26  ;;  %v2413_v34 = vpop.permute.xlu1 %2412 }
 0x4f5   : > { %2545 = vst.msk [vmem:[#allocation2 + $0x1d8] sm:$0xff] %vm426_vm0, %v2413_v34 }
 0x4f7   : > { %v2407_v19 = vpop.permute.xlu0 %2406 }
 0x4f8   : > { %2542 = vst.msk [vmem:[#allocation2 + $0x1c0] sm:$0xff] %vm426_vm0, %v2407_v19  ;;  %v2409_v62 = vpop.permute.xlu1 %2408 }
 0x4f9   : > { %2543 = vst.msk [vmem:[#allocation2 + $0x1c8] sm:$0xff] %vm426_vm0, %v2409_v62 }
 0x4fb   : > { %v2415_v0 = vpop.permute.xlu0 %2414 }
 0x4fc   : > { %2546 = vst.msk [vmem:[#allocation2 + $0x1e0] sm:$0xff] %vm426_vm0, %v2415_v0 }
 0x4fd   : > { %v2417_v53 = vpop.permute.xlu1 %2416 }
 0x4fe   : > { %2547 = vst.msk [vmem:[#allocation2 + $0x1e8] sm:$0xff] %vm426_vm0, %v2417_v53 }
 0x4ff   : > { %v2419_v6 = vpop.permute.xlu0 %2418 }
 0x500   : > { %2548 = vst.msk [vmem:[#allocation2 + $0x1f0] sm:$0xff] %vm426_vm0, %v2419_v6 }
 0x501   : > { %v2421_v63 = vpop.permute.xlu1 %2420 }
 0x502   : > { %2549 = vst.msk [vmem:[#allocation2 + $0x1f8] sm:$0xff] %vm426_vm0, %v2421_v63 }
 0x503 PF: > { %p3154_p8 = scmp.ne.s32.totalorder %s4056_s20, 1 }
 0x504   : > { %v2554_v57 = vld [vmem:[#allocation2] sm:$0xff] (!%p3154_p8)  ;;  %vm2618_vm1 = vcmask (!%p3154_p8), 523264   ;;  %v2555_v16 = vld [vmem:[#allocation2 + $0x8] sm:$0xff] (!%p3154_p8)  ;;  %v2556_v18 = vld [vmem:[#allocation2 + $0x10] sm:$0xff] (!%p3154_p8) }
 0x505   : > { %2553 = sbr.rel (%p3154_p8) target bundleno = 1317 (0x525), region = 64  ;;  %2619 = vst.msk [vmem:[%s4301_s17] sm:$0xff] (!%p3154_p8), %vm2618_vm1, %v2554_v57  ;;  %2620 = vst.msk [vmem:[%s4301_s17 + $0x8] sm:$0xff] (!%p3154_p8), %vm2618_vm1, %v2555_v16  ;;  %v2557_v7 = vld [vmem:[#allocation2 + $0x18] sm:$0xff] (!%p3154_p8)  ;;  %v2558_v39 = vld [vmem:[#allocation2 + $0x20] sm:$0xff] (!%p3154_p8) }
 0x506   : > { %2621 = vst.msk [vmem:[%s4301_s17 + $0x10] sm:$0xff] (!%p3154_p8), %vm2618_vm1, %v2556_v18  ;;  %v2559_v43 = vld [vmem:[#allocation2 + $0x28] sm:$0xff] (!%p3154_p8)  ;;  %2622 = vst.msk [vmem:[%s4301_s17 + $0x18] sm:$0xff] (!%p3154_p8), %vm2618_vm1, %v2557_v7  ;;  %v2560_v61 = vld [vmem:[#allocation2 + $0x30] sm:$0xff] (!%p3154_p8) }
 0x507   : > { %2623 = vst.msk [vmem:[%s4301_s17 + $0x20] sm:$0xff] (!%p3154_p8), %vm2618_vm1, %v2558_v39  ;;  %2624 = vst.msk [vmem:[%s4301_s17 + $0x28] sm:$0xff] (!%p3154_p8), %vm2618_vm1, %v2559_v43  ;;  %v2561_v50 = vld [vmem:[#allocation2 + $0x38] sm:$0xff] (!%p3154_p8)  ;;  %v2562_v49 = vld [vmem:[#allocation2 + $0x40] sm:$0xff] (!%p3154_p8) }
 0x508   : > { %2625 = vst.msk [vmem:[%s4301_s17 + $0x30] sm:$0xff] (!%p3154_p8), %vm2618_vm1, %v2560_v61  ;;  %2626 = vst.msk [vmem:[%s4301_s17 + $0x38] sm:$0xff] (!%p3154_p8), %vm2618_vm1, %v2561_v50  ;;  %v2563_v48 = vld [vmem:[#allocation2 + $0x48] sm:$0xff] (!%p3154_p8)  ;;  %v2564_v21 = vld [vmem:[#allocation2 + $0x50] sm:$0xff] (!%p3154_p8) }
 0x509   : > { %2627 = vst.msk [vmem:[%s4301_s17 + $0x40] sm:$0xff] (!%p3154_p8), %vm2618_vm1, %v2562_v49  ;;  %v2565_v55 = vld [vmem:[#allocation2 + $0x58] sm:$0xff] (!%p3154_p8)  ;;  %2628 = vst.msk [vmem:[%s4301_s17 + $0x48] sm:$0xff] (!%p3154_p8), %vm2618_vm1, %v2563_v48  ;;  %v2566_v40 = vld [vmem:[#allocation2 + $0x60] sm:$0xff] (!%p3154_p8) }
 0x50a   : > { %2629 = vst.msk [vmem:[%s4301_s17 + $0x50] sm:$0xff] (!%p3154_p8), %vm2618_vm1, %v2564_v21  ;;  %2630 = vst.msk [vmem:[%s4301_s17 + $0x58] sm:$0xff] (!%p3154_p8), %vm2618_vm1, %v2565_v55  ;;  %v2567_v1 = vld [vmem:[#allocation2 + $0x68] sm:$0xff] (!%p3154_p8)  ;;  %v2568_v29 = vld [vmem:[#allocation2 + $0x70] sm:$0xff] (!%p3154_p8) }
 0x50b   : > { %2631 = vst.msk [vmem:[%s4301_s17 + $0x60] sm:$0xff] (!%p3154_p8), %vm2618_vm1, %v2566_v40  ;;  %2632 = vst.msk [vmem:[%s4301_s17 + $0x68] sm:$0xff] (!%p3154_p8), %vm2618_vm1, %v2567_v1  ;;  %v2569_v35 = vld [vmem:[#allocation2 + $0x78] sm:$0xff] (!%p3154_p8)  ;;  %v2570_v38 = vld [vmem:[#allocation2 + $0x80] sm:$0xff] (!%p3154_p8) }
 0x50c   : > { %2633 = vst.msk [vmem:[%s4301_s17 + $0x70] sm:$0xff] %vm2618_vm1, %v2568_v29  ;;  %v2571_v45 = vld [vmem:[#allocation2 + $0x88] sm:$0xff]  ;;  %2634 = vst.msk [vmem:[%s4301_s17 + $0x78] sm:$0xff] %vm2618_vm1, %v2569_v35  ;;  %v2572_v14 = vld [vmem:[#allocation2 + $0x90] sm:$0xff] }
 0x50d   : > { %2635 = vst.msk [vmem:[%s4301_s17 + $0x80] sm:$0xff] %vm2618_vm1, %v2570_v38  ;;  %2636 = vst.msk [vmem:[%s4301_s17 + $0x88] sm:$0xff] %vm2618_vm1, %v2571_v45  ;;  %v2573_v44 = vld [vmem:[#allocation2 + $0x98] sm:$0xff]  ;;  %v2574_v22 = vld [vmem:[#allocation2 + $0xa0] sm:$0xff] }
 0x50e   : > { %2637 = vst.msk [vmem:[%s4301_s17 + $0x90] sm:$0xff] %vm2618_vm1, %v2572_v14  ;;  %2638 = vst.msk [vmem:[%s4301_s17 + $0x98] sm:$0xff] %vm2618_vm1, %v2573_v44  ;;  %v2575_v24 = vld [vmem:[#allocation2 + $0xa8] sm:$0xff]  ;;  %v2576_v54 = vld [vmem:[#allocation2 + $0xb0] sm:$0xff] }
 0x50f   : > { %2639 = vst.msk [vmem:[%s4301_s17 + $0xa0] sm:$0xff] %vm2618_vm1, %v2574_v22  ;;  %v2577_v4 = vld [vmem:[#allocation2 + $0xb8] sm:$0xff]  ;;  %2640 = vst.msk [vmem:[%s4301_s17 + $0xa8] sm:$0xff] %vm2618_vm1, %v2575_v24  ;;  %v2578_v15 = vld [vmem:[#allocation2 + $0xc0] sm:$0xff] }
 0x510   : > { %2641 = vst.msk [vmem:[%s4301_s17 + $0xb0] sm:$0xff] %vm2618_vm1, %v2576_v54  ;;  %2642 = vst.msk [vmem:[%s4301_s17 + $0xb8] sm:$0xff] %vm2618_vm1, %v2577_v4  ;;  %v2579_v46 = vld [vmem:[#allocation2 + $0xc8] sm:$0xff]  ;;  %v2580_v42 = vld [vmem:[#allocation2 + $0xd0] sm:$0xff] }
 0x511   : > { %2643 = vst.msk [vmem:[%s4301_s17 + $0xc0] sm:$0xff] %vm2618_vm1, %v2578_v15  ;;  %2644 = vst.msk [vmem:[%s4301_s17 + $0xc8] sm:$0xff] %vm2618_vm1, %v2579_v46  ;;  %v2581_v23 = vld [vmem:[#allocation2 + $0xd8] sm:$0xff]  ;;  %v2582_v47 = vld [vmem:[#allocation2 + $0xe0] sm:$0xff] }
 0x512   : > { %2645 = vst.msk [vmem:[%s4301_s17 + $0xd0] sm:$0xff] %vm2618_vm1, %v2580_v42  ;;  %v2583_v13 = vld [vmem:[#allocation2 + $0xe8] sm:$0xff]  ;;  %2646 = vst.msk [vmem:[%s4301_s17 + $0xd8] sm:$0xff] %vm2618_vm1, %v2581_v23  ;;  %v2584_v3 = vld [vmem:[#allocation2 + $0xf0] sm:$0xff] }
 0x513   : > { %2647 = vst.msk [vmem:[%s4301_s17 + $0xe0] sm:$0xff] %vm2618_vm1, %v2582_v47  ;;  %2648 = vst.msk [vmem:[%s4301_s17 + $0xe8] sm:$0xff] %vm2618_vm1, %v2583_v13  ;;  %v2585_v2 = vld [vmem:[#allocation2 + $0xf8] sm:$0xff]  ;;  %v2586_v60 = vld [vmem:[#allocation2 + $0x100] sm:$0xff] }
 0x514   : > { %2649 = vst.msk [vmem:[%s4301_s17 + $0xf0] sm:$0xff] %vm2618_vm1, %v2584_v3  ;;  %2650 = vst.msk [vmem:[%s4301_s17 + $0xf8] sm:$0xff] %vm2618_vm1, %v2585_v2  ;;  %v2587_v11 = vld [vmem:[#allocation2 + $0x108] sm:$0xff]  ;;  %v2588_v58 = vld [vmem:[#allocation2 + $0x110] sm:$0xff] }
 0x515   : > { %2651 = vst.msk [vmem:[%s4301_s17 + $0x100] sm:$0xff] %vm2618_vm1, %v2586_v60  ;;  %v2589_v31 = vld [vmem:[#allocation2 + $0x118] sm:$0xff]  ;;  %2652 = vst.msk [vmem:[%s4301_s17 + $0x108] sm:$0xff] %vm2618_vm1, %v2587_v11  ;;  %v2590_v20 = vld [vmem:[#allocation2 + $0x120] sm:$0xff] }
 0x516   : > { %2653 = vst.msk [vmem:[%s4301_s17 + $0x110] sm:$0xff] %vm2618_vm1, %v2588_v58  ;;  %2654 = vst.msk [vmem:[%s4301_s17 + $0x118] sm:$0xff] %vm2618_vm1, %v2589_v31  ;;  %v2591_v52 = vld [vmem:[#allocation2 + $0x128] sm:$0xff]  ;;  %v2592_v28 = vld [vmem:[#allocation2 + $0x130] sm:$0xff] }
 0x517   : > { %2655 = vst.msk [vmem:[%s4301_s17 + $0x120] sm:$0xff] %vm2618_vm1, %v2590_v20  ;;  %2656 = vst.msk [vmem:[%s4301_s17 + $0x128] sm:$0xff] %vm2618_vm1, %v2591_v52  ;;  %v2593_v30 = vld [vmem:[#allocation2 + $0x138] sm:$0xff]  ;;  %v2594_v33 = vld [vmem:[#allocation2 + $0x140] sm:$0xff] }
 0x518   : > { %2657 = vst.msk [vmem:[%s4301_s17 + $0x130] sm:$0xff] %vm2618_vm1, %v2592_v28  ;;  %v2595_v27 = vld [vmem:[#allocation2 + $0x148] sm:$0xff]  ;;  %2658 = vst.msk [vmem:[%s4301_s17 + $0x138] sm:$0xff] %vm2618_vm1, %v2593_v30  ;;  %v2596_v41 = vld [vmem:[#allocation2 + $0x150] sm:$0xff] }
 0x519   : > { %2659 = vst.msk [vmem:[%s4301_s17 + $0x140] sm:$0xff] %vm2618_vm1, %v2594_v33  ;;  %2660 = vst.msk [vmem:[%s4301_s17 + $0x148] sm:$0xff] %vm2618_vm1, %v2595_v27  ;;  %v2597_v56 = vld [vmem:[#allocation2 + $0x158] sm:$0xff]  ;;  %v2598_v51 = vld [vmem:[#allocation2 + $0x160] sm:$0xff] }
 0x51a   : > { %2661 = vst.msk [vmem:[%s4301_s17 + $0x150] sm:$0xff] %vm2618_vm1, %v2596_v41  ;;  %2662 = vst.msk [vmem:[%s4301_s17 + $0x158] sm:$0xff] %vm2618_vm1, %v2597_v56  ;;  %v2599_v32 = vld [vmem:[#allocation2 + $0x168] sm:$0xff]  ;;  %v2600_v10 = vld [vmem:[#allocation2 + $0x170] sm:$0xff] }
 0x51b   : > { %2663 = vst.msk [vmem:[%s4301_s17 + $0x160] sm:$0xff] %vm2618_vm1, %v2598_v51  ;;  %v2601_v12 = vld [vmem:[#allocation2 + $0x178] sm:$0xff]  ;;  %2664 = vst.msk [vmem:[%s4301_s17 + $0x168] sm:$0xff] %vm2618_vm1, %v2599_v32  ;;  %v2602_v9 = vld [vmem:[#allocation2 + $0x180] sm:$0xff] }
 0x51c   : > { %2665 = vst.msk [vmem:[%s4301_s17 + $0x170] sm:$0xff] %vm2618_vm1, %v2600_v10  ;;  %2666 = vst.msk [vmem:[%s4301_s17 + $0x178] sm:$0xff] %vm2618_vm1, %v2601_v12  ;;  %v2603_v36 = vld [vmem:[#allocation2 + $0x188] sm:$0xff]  ;;  %v2604_v8 = vld [vmem:[#allocation2 + $0x190] sm:$0xff] }
 0x51d   : > { %2667 = vst.msk [vmem:[%s4301_s17 + $0x180] sm:$0xff] %vm2618_vm1, %v2602_v9  ;;  %2668 = vst.msk [vmem:[%s4301_s17 + $0x188] sm:$0xff] %vm2618_vm1, %v2603_v36  ;;  %v2605_v17 = vld [vmem:[#allocation2 + $0x198] sm:$0xff]  ;;  %v2606_v59 = vld [vmem:[#allocation2 + $0x1a0] sm:$0xff] }
 0x51e   : > { %2669 = vst.msk [vmem:[%s4301_s17 + $0x190] sm:$0xff] %vm2618_vm1, %v2604_v8  ;;  %v2607_v37 = vld [vmem:[#allocation2 + $0x1a8] sm:$0xff]  ;;  %2670 = vst.msk [vmem:[%s4301_s17 + $0x198] sm:$0xff] %vm2618_vm1, %v2605_v17  ;;  %v2608_v25 = vld [vmem:[#allocation2 + $0x1b0] sm:$0xff] }
 0x51f   : > { %2671 = vst.msk [vmem:[%s4301_s17 + $0x1a0] sm:$0xff] %vm2618_vm1, %v2606_v59  ;;  %2672 = vst.msk [vmem:[%s4301_s17 + $0x1a8] sm:$0xff] %vm2618_vm1, %v2607_v37  ;;  %v2609_v5 = vld [vmem:[#allocation2 + $0x1b8] sm:$0xff]  ;;  %v2610_v26 = vld [vmem:[#allocation2 + $0x1c0] sm:$0xff] }
 0x520   : > { %2673 = vst.msk [vmem:[%s4301_s17 + $0x1b0] sm:$0xff] %vm2618_vm1, %v2608_v25  ;;  %2674 = vst.msk [vmem:[%s4301_s17 + $0x1b8] sm:$0xff] %vm2618_vm1, %v2609_v5  ;;  %v2611_v34 = vld [vmem:[#allocation2 + $0x1c8] sm:$0xff]  ;;  %v2612_v19 = vld [vmem:[#allocation2 + $0x1d0] sm:$0xff] }
 0x521   : > { %2675 = vst.msk [vmem:[%s4301_s17 + $0x1c0] sm:$0xff] %vm2618_vm1, %v2610_v26  ;;  %v2613_v62 = vld [vmem:[#allocation2 + $0x1d8] sm:$0xff]  ;;  %2676 = vst.msk [vmem:[%s4301_s17 + $0x1c8] sm:$0xff] %vm2618_vm1, %v2611_v34  ;;  %v2614_v0 = vld [vmem:[#allocation2 + $0x1e0] sm:$0xff] }
 0x522   : > { %2677 = vst.msk [vmem:[%s4301_s17 + $0x1d0] sm:$0xff] %vm2618_vm1, %v2612_v19  ;;  %2678 = vst.msk [vmem:[%s4301_s17 + $0x1d8] sm:$0xff] %vm2618_vm1, %v2613_v62  ;;  %v2615_v53 = vld [vmem:[#allocation2 + $0x1e8] sm:$0xff]  ;;  %v2616_v6 = vld [vmem:[#allocation2 + $0x1f0] sm:$0xff] }
 0x523   : > { %2679 = vst.msk [vmem:[%s4301_s17 + $0x1e0] sm:$0xff] %vm2618_vm1, %v2614_v0  ;;  %2680 = vst.msk [vmem:[%s4301_s17 + $0x1e8] sm:$0xff] %vm2618_vm1, %v2615_v53  ;;  %v2617_v63 = vld [vmem:[#allocation2 + $0x1f8] sm:$0xff] }
 0x524   : > { %2681 = vst.msk [vmem:[%s4301_s17 + $0x1f0] sm:$0xff] %vm2618_vm1, %v2616_v6  ;;  %2682 = vst.msk [vmem:[%s4301_s17 + $0x1f8] sm:$0xff] %vm2618_vm1, %v2617_v63 }
 0x525 PF: > { %p5717_p12 = scmp.ne.s32.totalorder %s5637_s30, 0 }
 0x526   : > { %s3161_s8 = sshll.u32 (%p5717_p12), %s4060_s21, 7  ;;  %v2848_v57 = vld [vmem:[%s4301_s17] sm:$0xff] (%p5717_p12)  ;;  %v2850_v16 = vld [vmem:[%s4301_s17 + $0x8] sm:$0xff] (%p5717_p12)  ;;  %v2852_v18 = vld [vmem:[%s4301_s17 + $0x10] sm:$0xff] (%p5717_p12) }
 0x527   : > { %2689 = sbr.rel (!%p5717_p12) target bundleno = 1354 (0x54a), region = 68  ;;  %s2692_s30 = sadd.s32 (%p5717_p12), %s4056_s20, %s3161_s8  ;;  %v2854_v7 = vld [vmem:[%s4301_s17 + $0x18] sm:$0xff] (%p5717_p12)  ;;  %v2856_v39 = vld [vmem:[%s4301_s17 + $0x20] sm:$0xff] (%p5717_p12)  ;;  %v2858_v43 = vld [vmem:[%s4301_s17 + $0x28] sm:$0xff] (%p5717_p12) }
 0x528   : > { %s3158_s28 = sshll.u32 (%p5717_p12), %s2692_s30, 3  ;;  %v2860_v61 = vld [vmem:[%s4301_s17 + $0x30] sm:$0xff] (%p5717_p12)  ;;  %v2862_v50 = vld [vmem:[%s4301_s17 + $0x38] sm:$0xff] (%p5717_p12)  ;;  %v2880_v38 = vld [vmem:[%s4301_s17 + $0x80] sm:$0xff] (%p5717_p12) }
 0x529   : > { %v2864_v49 = vld [vmem:[%s4301_s17 + $0x40] sm:$0xff] (%p5717_p12)  ;;  %s5443_s13 = scalar_lea.vmem (%p5717_p12), %s5590_s5, %s3158_s28  ;;  %v2866_v48 = vld [vmem:[%s4301_s17 + $0x48] sm:$0xff] (%p5717_p12)  ;;  %v2884_v14 = vld [vmem:[%s4301_s17 + $0x90] sm:$0xff] (%p5717_p12) }
 0x52a   : > { %v2868_v21 = vld [vmem:[%s4301_s17 + $0x50] sm:$0xff] (%p5717_p12)  ;;  %v2870_v55 = vld [vmem:[%s4301_s17 + $0x58] sm:$0xff] (%p5717_p12)  ;;  %2849 = vst [vmem:[%s5443_s13] sm:$0xff] (%p5717_p12), %v2848_v57  ;;  %2851 = vst [vmem:[%s5443_s13 + $0x10] sm:$0xff] (%p5717_p12), %v2850_v16 }
 0x52b   : > { %2853 = vst [vmem:[%s5443_s13 + $0x20] sm:$0xff] (%p5717_p12), %v2852_v18  ;;  %2855 = vst [vmem:[%s5443_s13 + $0x30] sm:$0xff] (%p5717_p12), %v2854_v7  ;;  %v2872_v40 = vld [vmem:[%s4301_s17 + $0x60] sm:$0xff] (%p5717_p12)  ;;  %v2874_v1 = vld [vmem:[%s4301_s17 + $0x68] sm:$0xff] (%p5717_p12) }
 0x52c   : > { %2857 = vst [vmem:[%s5443_s13 + $0x40] sm:$0xff] (%p5717_p12), %v2856_v39  ;;  %2859 = vst [vmem:[%s5443_s13 + $0x50] sm:$0xff] (%p5717_p12), %v2858_v43  ;;  %v2876_v29 = vld [vmem:[%s4301_s17 + $0x70] sm:$0xff] (%p5717_p12)  ;;  %v2878_v35 = vld [vmem:[%s4301_s17 + $0x78] sm:$0xff] (%p5717_p12) }
 0x52d   : > { %2861 = vst [vmem:[%s5443_s13 + $0x60] sm:$0xff] (%p5717_p12), %v2860_v61  ;;  %2863 = vst [vmem:[%s5443_s13 + $0x70] sm:$0xff] (%p5717_p12), %v2862_v50  ;;  %v2882_v45 = vld [vmem:[%s4301_s17 + $0x88] sm:$0xff] (%p5717_p12)  ;;  %v2886_v44 = vld [vmem:[%s4301_s17 + $0x98] sm:$0xff] (%p5717_p12) }
 0x52e   : > { %2865 = vst [vmem:[%s5443_s13 + $0x80] sm:$0xff] %v2864_v49  ;;  %2867 = vst [vmem:[%s5443_s13 + $0x90] sm:$0xff] %v2866_v48  ;;  %v2888_v22 = vld [vmem:[%s4301_s17 + $0xa0] sm:$0xff]  ;;  %v2890_v24 = vld [vmem:[%s4301_s17 + $0xa8] sm:$0xff] }
 0x52f   : > { %2869 = vst [vmem:[%s5443_s13 + $0xa0] sm:$0xff] %v2868_v21  ;;  %2871 = vst [vmem:[%s5443_s13 + $0xb0] sm:$0xff] %v2870_v55  ;;  %v2892_v54 = vld [vmem:[%s4301_s17 + $0xb0] sm:$0xff]  ;;  %v2894_v4 = vld [vmem:[%s4301_s17 + $0xb8] sm:$0xff] }
 0x530   : > { %2873 = vst [vmem:[%s5443_s13 + $0xc0] sm:$0xff] %v2872_v40  ;;  %2875 = vst [vmem:[%s5443_s13 + $0xd0] sm:$0xff] %v2874_v1  ;;  %v2896_v15 = vld [vmem:[%s4301_s17 + $0xc0] sm:$0xff]  ;;  %v2898_v46 = vld [vmem:[%s4301_s17 + $0xc8] sm:$0xff] }
 0x531   : > { %2877 = vst [vmem:[%s5443_s13 + $0xe0] sm:$0xff] %v2876_v29  ;;  %2879 = vst [vmem:[%s5443_s13 + $0xf0] sm:$0xff] %v2878_v35  ;;  %v2900_v42 = vld [vmem:[%s4301_s17 + $0xd0] sm:$0xff]  ;;  %v2902_v23 = vld [vmem:[%s4301_s17 + $0xd8] sm:$0xff] }
 0x532   : > { %2881 = vst [vmem:[%s5443_s13 + $0x100] sm:$0xff] %v2880_v38  ;;  %2883 = vst [vmem:[%s5443_s13 + $0x110] sm:$0xff] %v2882_v45  ;;  %v2904_v47 = vld [vmem:[%s4301_s17 + $0xe0] sm:$0xff]  ;;  %v2906_v13 = vld [vmem:[%s4301_s17 + $0xe8] sm:$0xff] }
 0x533   : > { %2885 = vst [vmem:[%s5443_s13 + $0x120] sm:$0xff] %v2884_v14  ;;  %2887 = vst [vmem:[%s5443_s13 + $0x130] sm:$0xff] %v2886_v44  ;;  %v2908_v3 = vld [vmem:[%s4301_s17 + $0xf0] sm:$0xff]  ;;  %v2910_v2 = vld [vmem:[%s4301_s17 + $0xf8] sm:$0xff] }
 0x534   : > { %2889 = vst [vmem:[%s5443_s13 + $0x140] sm:$0xff] %v2888_v22  ;;  %2891 = vst [vmem:[%s5443_s13 + $0x150] sm:$0xff] %v2890_v24  ;;  %v2912_v60 = vld [vmem:[%s4301_s17 + $0x100] sm:$0xff]  ;;  %v2914_v11 = vld [vmem:[%s4301_s17 + $0x108] sm:$0xff] }
 0x535   : > { %2893 = vst [vmem:[%s5443_s13 + $0x160] sm:$0xff] %v2892_v54  ;;  %2895 = vst [vmem:[%s5443_s13 + $0x170] sm:$0xff] %v2894_v4  ;;  %v2916_v58 = vld [vmem:[%s4301_s17 + $0x110] sm:$0xff]  ;;  %v2918_v31 = vld [vmem:[%s4301_s17 + $0x118] sm:$0xff] }
 0x536   : > { %2897 = vst [vmem:[%s5443_s13 + $0x180] sm:$0xff] %v2896_v15  ;;  %2899 = vst [vmem:[%s5443_s13 + $0x190] sm:$0xff] %v2898_v46  ;;  %v2920_v20 = vld [vmem:[%s4301_s17 + $0x120] sm:$0xff]  ;;  %v2922_v52 = vld [vmem:[%s4301_s17 + $0x128] sm:$0xff] }
 0x537   : > { %2901 = vst [vmem:[%s5443_s13 + $0x1a0] sm:$0xff] %v2900_v42  ;;  %2903 = vst [vmem:[%s5443_s13 + $0x1b0] sm:$0xff] %v2902_v23  ;;  %v2924_v28 = vld [vmem:[%s4301_s17 + $0x130] sm:$0xff]  ;;  %v2926_v30 = vld [vmem:[%s4301_s17 + $0x138] sm:$0xff] }
 0x538   : > { %2905 = vst [vmem:[%s5443_s13 + $0x1c0] sm:$0xff] %v2904_v47  ;;  %2907 = vst [vmem:[%s5443_s13 + $0x1d0] sm:$0xff] %v2906_v13  ;;  %v2928_v33 = vld [vmem:[%s4301_s17 + $0x140] sm:$0xff]  ;;  %v2930_v27 = vld [vmem:[%s4301_s17 + $0x148] sm:$0xff] }
 0x539   : > { %2909 = vst [vmem:[%s5443_s13 + $0x1e0] sm:$0xff] %v2908_v3  ;;  %2911 = vst [vmem:[%s5443_s13 + $0x1f0] sm:$0xff] %v2910_v2  ;;  %v2932_v41 = vld [vmem:[%s4301_s17 + $0x150] sm:$0xff]  ;;  %v2934_v56 = vld [vmem:[%s4301_s17 + $0x158] sm:$0xff] }
 0x53a   : > { %2913 = vst [vmem:[%s5443_s13 + $0x200] sm:$0xff] %v2912_v60  ;;  %2915 = vst [vmem:[%s5443_s13 + $0x210] sm:$0xff] %v2914_v11  ;;  %v2936_v51 = vld [vmem:[%s4301_s17 + $0x160] sm:$0xff]  ;;  %v2938_v32 = vld [vmem:[%s4301_s17 + $0x168] sm:$0xff] }
 0x53b   : > { %2917 = vst [vmem:[%s5443_s13 + $0x220] sm:$0xff] %v2916_v58  ;;  %2919 = vst [vmem:[%s5443_s13 + $0x230] sm:$0xff] %v2918_v31  ;;  %v2940_v10 = vld [vmem:[%s4301_s17 + $0x170] sm:$0xff]  ;;  %v2942_v12 = vld [vmem:[%s4301_s17 + $0x178] sm:$0xff] }
 0x53c   : > { %2921 = vst [vmem:[%s5443_s13 + $0x240] sm:$0xff] %v2920_v20  ;;  %2923 = vst [vmem:[%s5443_s13 + $0x250] sm:$0xff] %v2922_v52  ;;  %v2944_v9 = vld [vmem:[%s4301_s17 + $0x180] sm:$0xff]  ;;  %v2946_v36 = vld [vmem:[%s4301_s17 + $0x188] sm:$0xff] }
 0x53d   : > { %2925 = vst [vmem:[%s5443_s13 + $0x260] sm:$0xff] %v2924_v28  ;;  %2927 = vst [vmem:[%s5443_s13 + $0x270] sm:$0xff] %v2926_v30  ;;  %v2948_v8 = vld [vmem:[%s4301_s17 + $0x190] sm:$0xff]  ;;  %v2950_v17 = vld [vmem:[%s4301_s17 + $0x198] sm:$0xff] }
 0x53e   : > { %2929 = vst [vmem:[%s5443_s13 + $0x280] sm:$0xff] %v2928_v33  ;;  %2931 = vst [vmem:[%s5443_s13 + $0x290] sm:$0xff] %v2930_v27  ;;  %v2952_v59 = vld [vmem:[%s4301_s17 + $0x1a0] sm:$0xff]  ;;  %v2954_v37 = vld [vmem:[%s4301_s17 + $0x1a8] sm:$0xff] }
 0x53f   : > { %2933 = vst [vmem:[%s5443_s13 + $0x2a0] sm:$0xff] %v2932_v41  ;;  %2935 = vst [vmem:[%s5443_s13 + $0x2b0] sm:$0xff] %v2934_v56  ;;  %v2956_v25 = vld [vmem:[%s4301_s17 + $0x1b0] sm:$0xff]  ;;  %v2958_v5 = vld [vmem:[%s4301_s17 + $0x1b8] sm:$0xff] }
 0x540   : > { %2937 = vst [vmem:[%s5443_s13 + $0x2c0] sm:$0xff] %v2936_v51  ;;  %2939 = vst [vmem:[%s5443_s13 + $0x2d0] sm:$0xff] %v2938_v32  ;;  %v2960_v26 = vld [vmem:[%s4301_s17 + $0x1c0] sm:$0xff]  ;;  %v2962_v34 = vld [vmem:[%s4301_s17 + $0x1c8] sm:$0xff] }
 0x541   : > { %2941 = vst [vmem:[%s5443_s13 + $0x2e0] sm:$0xff] %v2940_v10  ;;  %2943 = vst [vmem:[%s5443_s13 + $0x2f0] sm:$0xff] %v2942_v12  ;;  %v2964_v19 = vld [vmem:[%s4301_s17 + $0x1d0] sm:$0xff]  ;;  %v2966_v62 = vld [vmem:[%s4301_s17 + $0x1d8] sm:$0xff] }
 0x542   : > { %2945 = vst [vmem:[%s5443_s13 + $0x300] sm:$0xff] %v2944_v9  ;;  %2947 = vst [vmem:[%s5443_s13 + $0x310] sm:$0xff] %v2946_v36  ;;  %v2968_v0 = vld [vmem:[%s4301_s17 + $0x1e0] sm:$0xff]  ;;  %v2970_v53 = vld [vmem:[%s4301_s17 + $0x1e8] sm:$0xff] }
 0x543   : > { %2949 = vst [vmem:[%s5443_s13 + $0x320] sm:$0xff] %v2948_v8  ;;  %2951 = vst [vmem:[%s5443_s13 + $0x330] sm:$0xff] %v2950_v17  ;;  %v2972_v6 = vld [vmem:[%s4301_s17 + $0x1f0] sm:$0xff]  ;;  %v2974_v63 = vld [vmem:[%s4301_s17 + $0x1f8] sm:$0xff] }
 0x544   : > { %2953 = vst [vmem:[%s5443_s13 + $0x340] sm:$0xff] %v2952_v59  ;;  %2955 = vst [vmem:[%s5443_s13 + $0x350] sm:$0xff] %v2954_v37 }
 0x545   : > { %2957 = vst [vmem:[%s5443_s13 + $0x360] sm:$0xff] %v2956_v25  ;;  %2959 = vst [vmem:[%s5443_s13 + $0x370] sm:$0xff] %v2958_v5 }
 0x546   : > { %2961 = vst [vmem:[%s5443_s13 + $0x380] sm:$0xff] %v2960_v26  ;;  %2963 = vst [vmem:[%s5443_s13 + $0x390] sm:$0xff] %v2962_v34 }
 0x547   : > { %2965 = vst [vmem:[%s5443_s13 + $0x3a0] sm:$0xff] %v2964_v19  ;;  %2967 = vst [vmem:[%s5443_s13 + $0x3b0] sm:$0xff] %v2966_v62 }
 0x548   : > { %2969 = vst [vmem:[%s5443_s13 + $0x3c0] sm:$0xff] %v2968_v0  ;;  %2971 = vst [vmem:[%s5443_s13 + $0x3d0] sm:$0xff] %v2970_v53 }
 0x549   : > { %2973 = vst [vmem:[%s5443_s13 + $0x3e0] sm:$0xff] %v2972_v6  ;;  %2975 = vst [vmem:[%s5443_s13 + $0x3f0] sm:$0xff] %v2974_v63 }
 0x54a PF: > { %s18_s24 = sadd.s32 1, %s4072_s24   ;;  %s5718_s20 = sld [smem:[#allocation14_spill]] }
 0x54b   : > { %p15_p0 = scmp.ge.s32.totalorder %s18_s24, 8   ;;  %s5719_s21 = sld [smem:[#allocation15_spill]] }
 0x54c   : > { %s5720_s22 = sld [smem:[#allocation16_spill]]  ;;  %s5721_s23 = sld [smem:[#allocation17_spill]] }
 0x54d   : > { %s5722_s18 = smov %s4052_s19  ;;  %s5723_s19 = smov %s4184_s11 }
 0x54e   :  { %17 = sbr.rel (!%p15_p0) target bundleno = 6 (0x6), region = 133 }
 0x555   :  { %2991 = vsyncpa [#allocation4], 1 }
 0x556   :  { %2993 = vsyncpa [#allocation4 + $0x1], 1 }
 0x557   :  { %2994 = vsyncpa [#allocation6], 1 }
 0x558   :  { %2995 = vsyncpa [#allocation9], 1 }

</bundles_post_ra>
